<compile_context>
chip_gen: v7x
topology: tpu7x:2x2x1
jax: 0.10.0
libtpu: 0.0.40
codegen_flags: <defaults>
</compile_context>

<pallas_src>
import functools

import jax
import jax.numpy as jnp
import numpy as np
from jax import lax
from jax.experimental import pallas as pl
from jax.experimental.pallas import tpu as pltpu

K = 5        # conv kernel size
WCP = 128    # padded lane width of a conv-input row (W*Cin -> 128)
HALFP = 128  # padded lane width of a pooled conv-output row (Wo2*Cout -> 128)
NFC = 128    # padded fc lane width (120 / 84 / 43 -> 128)


# ---------------------------------------------------------------------------
# Pallas kernels
# ---------------------------------------------------------------------------

def _conv_pool_kernel(x_ref, t_ref, b_ref, o_ref, *, G, P, Q, Bt):
    """Fused VALID 5x5 conv + 2x2/2 max-pool + bias + ReLU, batch in M.

    x_ref : (G, Hg, Bt, WCP)   bf16  image row h of image b at [h%G, h//G, b, :],
                                     lane = w*Cin + ci (zero-padded to WCP).
    t_ref : (K, WCP, 2*HALFP)  bf16  Toeplitz planes; plane[kh] maps one input
                                     row to conv outputs at columns wo=2*wo2+dj,
                                     lane = dj*HALFP + wo2*Cout + co.
    b_ref : (1, HALFP)         f32   bias tiled over wo2 (zero in padded lanes).
    o_ref : (P, Q, Bt, HALFP)  bf16  pooled row ho2 = P*q + p of image b stored
                                     at [p, q, b, :] (parity layout for conv2).
    """
    bias = b_ref[...]                      # read/broadcast once, reused per p
    # Distinct contiguous input row-slices: pooled parity p, pre-pool offset di
    # and tap kh need image rows G*q + s with s = 2*p + di + kh.  Each slice is
    # (Q, Bt, WCP), collapsed to (Q*Bt, WCP) so the whole batch tile rides M.
    xs = {}
    for p in range(P):
        for di in range(2):
            for kh in range(K):
                s = 2 * p + di + kh
                if s not in xs:
                    xs[s] = x_ref[s % G, pl.ds(s // G, Q), :, :].reshape(Q * Bt, WCP)
    for p in range(P):
        pooled = None
        for di in range(2):
            acc = None
            for kh in range(K):            # K accumulated dots, both dj in one matmul
                part = jnp.dot(xs[2 * p + di + kh], t_ref[kh],
                               preferred_element_type=jnp.float32)
                acc = part if acc is None else acc + part
            cur = jnp.maximum(acc[:, :HALFP], acc[:, HALFP:])        # pool over dj
            pooled = cur if pooled is None else jnp.maximum(pooled, cur)  # over di
        # relu(. + bias) commutes with the max (bias shared across the window),
        # so pool first, then one bias + ReLU.
        out = jnp.maximum(pooled + bias, 0.0)
        o_ref[p, :, :, :] = out.reshape(Q, Bt, HALFP).astype(o_ref.dtype)


def _conv_fc_kernel(x_ref, t_ref, b_ref, w1_ref, b1_ref, w2_ref, b2_ref,
                    w3_ref, b3_ref, o_ref, *, Q, Bt):
    """Fused conv2 + pool + ReLU + fc1 + ReLU + fc2 + ReLU + fc3 per batch tile.

    x_ref : (2, Hg, Bt, WCP)   bf16  conv1 pooled output, rows parity-split mod 2.
    t_ref : (K, WCP, 2*HALFP)  bf16  conv2 Toeplitz planes (dj concatenated).
    b_ref : (1, HALFP)         f32   conv2 bias tiled over wo2.
    w1_ref: (Q, HALFP, NFC)    bf16  fc1 weight as one (128,128) block per pooled
                                     row q (torch-flatten permutation baked in).
    w2_ref, w3_ref : (NFC,NFC) bf16 ; b1/b2/b3 : (1, NFC) f32.
    o_ref : (Bt, NFC)          f32   padded logits (lanes >= 43 are zero).
    """
    # ---- conv2 + 2x2/2 max pool + bias + ReLU --------------------------------
    xs = {}
    for di in range(2):
        for kh in range(K):
            s = di + kh
            if s not in xs:
                xs[s] = x_ref[s % 2, pl.ds(s // 2, Q), :, :].reshape(Q * Bt, WCP)
    pooled = None
    for di in range(2):
        acc = None
        for kh in range(K):
            part = jnp.dot(xs[di + kh], t_ref[kh],
                           preferred_element_type=jnp.float32)
            acc = part if acc is None else acc + part
        cur = jnp.maximum(acc[:, :HALFP], acc[:, HALFP:])
        pooled = cur if pooled is None else jnp.maximum(pooled, cur)
    act = jnp.maximum(pooled + b_ref[...], 0.0)            # (Q*Bt, HALFP) f32
    act = act.astype(jnp.bfloat16).reshape(Q, Bt, HALFP)

    # ---- fc1 as Q accumulated (Bt,128)x(128,128) dots (no transpose needed) --
    h = None
    for q in range(Q):
        part = jnp.dot(act[q], w1_ref[q], preferred_element_type=jnp.float32)
        h = part if h is None else h + part
    h = jnp.maximum(h + b1_ref[...], 0.0).astype(jnp.bfloat16)
    h = jnp.maximum(jnp.dot(h, w2_ref[...], preferred_element_type=jnp.float32)
                    + b2_ref[...], 0.0).astype(jnp.bfloat16)
    o_ref[...] = (jnp.dot(h, w3_ref[...], preferred_element_type=jnp.float32)
                  + b3_ref[...])


# ---------------------------------------------------------------------------
# pallas_call wrappers
# ---------------------------------------------------------------------------

def _conv1_pool(x, t, bias, *, Bt):
    """x: (4, 8, Bp, 128) bf16 -> (2, 7, Bp, 128) bf16 (conv1 + ReLU + pool)."""
    G, Hg, Bp, _ = x.shape
    P, Q = 2, 7
    flops = 2 * (P * 2 * K) * (Q * Bp) * WCP * (2 * HALFP)
    bytes_acc = x.size * 2 + t.size * 2 + bias.size * 4 + P * Q * Bp * HALFP * 2
    return pl.pallas_call(
        functools.partial(_conv_pool_kernel, G=G, P=P, Q=Q, Bt=Bt),
        out_shape=jax.ShapeDtypeStruct((P, Q, Bp, HALFP), jnp.bfloat16),
        grid=(Bp // Bt,),
        in_specs=[
            pl.BlockSpec((G, Hg, Bt, WCP), lambda i: (0, 0, i, 0)),
            pl.BlockSpec((K, WCP, 2 * HALFP), lambda i: (0, 0, 0)),
            pl.BlockSpec((1, HALFP), lambda i: (0, 0)),
        ],
        out_specs=pl.BlockSpec((P, Q, Bt, HALFP), lambda i: (0, 0, i, 0)),
        compiler_params=pltpu.CompilerParams(
            dimension_semantics=("parallel",)),
        cost_estimate=pl.CostEstimate(flops=int(flops), transcendentals=0,
                                      bytes_accessed=int(bytes_acc)),
    )(x, t, bias)


def _conv2_fc(a1, prep, *, Bt):
    """a1: (2, 7, Bp, 128) bf16 -> (Bp, 128) f32 padded logits."""
    G, Hg, Bp, _ = a1.shape
    Q = 5
    flops = (2 * (2 * K) * (Q * Bp) * WCP * (2 * HALFP)
             + 2 * Bp * (Q * HALFP * NFC + 2 * NFC * NFC))
    w_bytes = 2 * (prep["c2_t"].size + prep["w1"].size
                   + prep["w2"].size + prep["w3"].size)
    bytes_acc = a1.size * 2 + w_bytes + Bp * NFC * 4 + 4 * 4 * NFC
    return pl.pallas_call(
        functools.partial(_conv_fc_kernel, Q=Q, Bt=Bt),
        out_shape=jax.ShapeDtypeStruct((Bp, NFC), jnp.float32),
        grid=(Bp // Bt,),
        in_specs=[
            pl.BlockSpec((G, Hg, Bt, WCP), lambda i: (0, 0, i, 0)),
            pl.BlockSpec((K, WCP, 2 * HALFP), lambda i: (0, 0, 0)),
            pl.BlockSpec((1, HALFP), lambda i: (0, 0)),
            pl.BlockSpec((Q, HALFP, NFC), lambda i: (0, 0, 0)),
            pl.BlockSpec((1, NFC), lambda i: (0, 0)),
            pl.BlockSpec((NFC, NFC), lambda i: (0, 0)),
            pl.BlockSpec((1, NFC), lambda i: (0, 0)),
            pl.BlockSpec((NFC, NFC), lambda i: (0, 0)),
            pl.BlockSpec((1, NFC), lambda i: (0, 0)),
        ],
        out_specs=pl.BlockSpec((Bt, NFC), lambda i: (i, 0)),
        compiler_params=pltpu.CompilerParams(
            dimension_semantics=("parallel",)),
        cost_estimate=pl.CostEstimate(flops=int(flops), transcendentals=0,
                                      bytes_accessed=int(bytes_acc)),
    )(a1, prep["c2_t"], prep["c2_b"], prep["w1"], prep["b1"],
      prep["w2"], prep["b2"], prep["w3"], prep["b3"])


# ---------------------------------------------------------------------------
# Forward pass
# ---------------------------------------------------------------------------

def _pick_batch_tile(B):
    """Batch tile: multiple of 16 (bf16 sublane packing), capped at 128 so
    per-step VMEM stays ~8 MiB (safe on v7x's 32 MiB scoped default) and, for
    B >= 32, small enough that the 'parallel' grid has >= 2 steps so both v7x
    TensorCores get work."""
    if B <= 16:
        return 16
    half = (B + 1) // 2
    return int(min(128, ((half + 15) // 16) * 16))


def basicnet_forward(x_nchw, prep):
    """x_nchw: (B, 3, 32, 32) float32 -> logits (B, 43) float32."""
    B = x_nchw.shape[0]
    Bt = _pick_batch_tile(B)
    Bp = ((B + Bt - 1) // Bt) * Bt

    # NCHW -> rows x (W*Cin) lane layout: lanes padded 96 -> 128, rows split
    # into 4 parity groups, batch moved next to the lane axis so every in-kernel
    # row slice is a contiguous (Q, Bt, 128) block:
    # pixel (b, h, w, c) -> [h % 4, h // 4, b, w*3 + c].
    x = jnp.transpose(x_nchw, (0, 2, 3, 1)).reshape(B, 32, 32 * 3)
    x = jnp.pad(x, ((0, Bp - B), (0, 0), (0, WCP - 32 * 3)))
    x = x.reshape(Bp, 8, 4, WCP).transpose(2, 1, 0, 3).astype(jnp.bfloat16)

    a1 = _conv1_pool(x, prep["c1_t"], prep["c1_b"], Bt=Bt)  # (2, 7, Bp, 128) bf16
    logits = _conv2_fc(a1, prep, Bt=Bt)                     # (Bp, 128) f32
    return logits[:B, :43]


# ---------------------------------------------------------------------------
# One-time host-side weight re-layout (outside jit)
# ---------------------------------------------------------------------------

def _conv_toeplitz_planes(w_oihw, bias, W):
    """Build (K, WCP, 2*HALFP) bf16 planes and a (1, HALFP) f32 bias row.

    plane[kh] maps one zero-padded input row (lane = w*Cin + ci) to the conv
    outputs at columns wo = 2*wo2 + dj, stored at lane dj*HALFP + wo2*Cout + co,
    so ONE matmul produces both pooling column-parities."""
    w = np.asarray(w_oihw, np.float32)               # (Cout, Cin, K, K)
    Cout, Cin, k, _ = w.shape
    Wo = W - k + 1
    Wo2 = Wo // 2
    T = np.zeros((k, WCP, 2 * HALFP), np.float32)
    for kh in range(k):
        for kw in range(k):
            for wo in range(Wo):
                wo2, dj = wo // 2, wo % 2
                r0 = (wo + kw) * Cin
                c0 = dj * HALFP + wo2 * Cout
                T[kh, r0:r0 + Cin, c0:c0 + Cout] = w[:, :, kh, kw].T
    brow = np.zeros((1, HALFP), np.float32)
    brow[0, :Wo2 * Cout] = np.tile(np.asarray(bias, np.float32), Wo2)
    return jnp.asarray(T, jnp.bfloat16), jnp.asarray(brow)


def prepare_params(params):
    """Pre-transform all weights once: Toeplitz planes (dj-concat, 128-lane
    padding), fc1 block permutation to the kernel flatten order, transposes,
    128-lane padding, bf16 cast of every MXU operand."""
    c1_t, c1_b = _conv_toeplitz_planes(params["conv1_w"], params["conv1_b"], W=32)
    c2_t, c2_b = _conv_toeplitz_planes(params["conv2_w"], params["conv2_b"], W=14)

    # fc1 weight as one (128, 128) block per pooled conv2 row q.  Row index
    # inside a block is the conv2 output lane w*16 + c, which corresponds to
    # torch's NCHW flatten index c*25 + q*5 + w.
    f1 = np.asarray(params["fc1_w"], np.float32)     # (120, 400)
    w1 = np.zeros((5, HALFP, NFC), np.float32)
    for q in range(5):
        for w in range(5):
            for c in range(16):
                w1[q, w * 16 + c, :120] = f1[:, c * 25 + q * 5 + w]

    def pad_mat(a, shape):
        out = np.zeros(shape, np.float32)
        out[:a.shape[0], :a.shape[1]] = a
        return out

    def pad_row(a):
        a = np.asarray(a, np.float32)
        out = np.zeros((1, NFC), np.float32)
        out[0, :a.shape[0]] = a
        return out

    return dict(
        c1_t=c1_t, c1_b=c1_b, c2_t=c2_t, c2_b=c2_b,
        w1=jnp.asarray(w1, jnp.bfloat16),
        b1=jnp.asarray(pad_row(params["fc1_b"])),
        w2=jnp.asarray(pad_mat(np.asarray(params["fc2_w"], np.float32).T,
                               (NFC, NFC)), jnp.bfloat16),
        b2=jnp.asarray(pad_row(params["fc2_b"])),
        w3=jnp.asarray(pad_mat(np.asarray(params["fc3_w"], np.float32).T,
                               (NFC, NFC)), jnp.bfloat16),
        b3=jnp.asarray(pad_row(params["fc3_b"])),
    )


# ---------------------------------------------------------------------------
# Deterministic parameter init (PyTorch-shaped, synthetic values)
# ---------------------------------------------------------------------------

def _uniform(key, shape, bound):
    return jax.random.uniform(key, shape, jnp.float32, -bound, bound)


def init_params(key):
    ks = jax.random.split(key, 10)

    def conv_init(kw, kb, cout, cin, k):
        bound = 1.0 / np.sqrt(cin * k * k)
        return _uniform(kw, (cout, cin, k, k), bound), _uniform(kb, (cout,), bound)

    def lin_init(kw, kb, out_f, in_f):
        bound = 1.0 / np.sqrt(in_f)
        return _uniform(kw, (out_f, in_f), bound), _uniform(kb, (out_f,), bound)

    c1w, c1b = conv_init(ks[0], ks[1], 6, 3, 5)
    c2w, c2b = conv_init(ks[2], ks[3], 16, 6, 5)
    f1w, f1b = lin_init(ks[4], ks[5], 120, 16 * 5 * 5)
    f2w, f2b = lin_init(ks[6], ks[7], 84, 120)
    f3w, f3b = lin_init(ks[8], ks[9], 43, 84)
    return dict(conv1_w=c1w, conv1_b=c1b, conv2_w=c2w, conv2_b=c2b,
                fc1_w=f1w, fc1_b=f1b, fc2_w=f2w, fc2_b=f2b,
                fc3_w=f3w, fc3_b=f3b)


# ---------------------------------------------------------------------------
# Pure-XLA reference with the same bf16 operand rounding / f32 accumulation
# as the Pallas kernels (keeps the correctness check tight).
# ---------------------------------------------------------------------------

def reference_forward(x_nchw, params):
    def q(a):  # emulate bf16 MXU operands with f32 accumulation
        return a.astype(jnp.bfloat16).astype(jnp.float32)

    x = q(jnp.transpose(x_nchw, (0, 2, 3, 1)))

    def conv(y, w, b):
        wh = q(jnp.transpose(w, (2, 3, 1, 0)))       # OIHW -> HWIO, bf16-rounded
        dn = lax.conv_dimension_numbers(y.shape, wh.shape, ("NHWC", "HWIO", "NHWC"))
        out = lax.conv_general_dilated(y, wh, (1, 1), "VALID",
                                       dimension_numbers=dn)
        return jnp.maximum(out + b, 0.0)

    def pool(y):
        return lax.reduce_window(y, -jnp.inf, lax.max,
                                 (1, 2, 2, 1), (1, 2, 2, 1), "VALID")

    x = q(pool(conv(x, params["conv1_w"], params["conv1_b"])))  # kernel stores bf16
    x = pool(conv(x, params["conv2_w"], params["conv2_b"]))
    flat = jnp.transpose(x, (0, 3, 1, 2)).reshape(x.shape[0], 16 * 5 * 5)
    h = jnp.maximum(q(flat) @ q(params["fc1_w"].T) + params["fc1_b"], 0.0)
    h = jnp.maximum(q(h) @ q(params["fc2_w"].T) + params["fc2_b"], 0.0)
    return q(h) @ q(params["fc3_w"].T) + params["fc3_b"]


# ---------------------------------------------------------------------------

if __name__ == "__main__":
    key = jax.random.PRNGKey(0)
    k_x, k_p = jax.random.split(key)

    params = init_params(k_p)
    prep = prepare_params(params)          # one-time host-side re-layout
    fwd = jax.jit(basicnet_forward)
    ref_fn = jax.jit(reference_forward)

    # B=2: tiny smoke test (single padded 16-image tile).
    # B=130: exercises batch padding, Bt=80 tiles and a 2-step 'parallel' grid.
    for B in (2, 130):
        x = jax.random.normal(jax.random.fold_in(k_x, B), (B, 3, 32, 32),
                              jnp.float32)
        out = jax.block_until_ready(fwd(x, prep))
        assert out.shape == (B, 43), out.shape
        ref = jax.block_until_ready(ref_fn(x, params))
        np.testing.assert_allclose(np.asarray(out), np.asarray(ref),
                                   rtol=1e-2, atol=1e-2)

    print("KERNEL_OK")
</pallas_src>

<mosaic_0001>
module attributes {stable_mosaic.version = 11 : i64} {
  func.func @_conv_pool_kernel(%arg0: i32, %arg1: memref<4x8x16x128xbf16, #tpu.memory_space<vmem>>, %arg2: memref<5x128x256xbf16, #tpu.memory_space<vmem>>, %arg3: memref<1x128xf32, #tpu.memory_space<vmem>>, %arg4: memref<2x7x16x128xbf16, #tpu.memory_space<vmem>>) attributes {dimension_semantics = [#tpu.dimension_semantics<parallel>], iteration_bounds = array<i64: 1>, scalar_prefetch = 0 : i64, scratch_operands = 0 : i64, tpu.core_type = #tpu.core_type<tc>, window_params = [{transform_indices = @transform_0, window_bounds = array<i64: 4, 8, 16, 128>}, {pipeline_mode = #tpu.pipeline_mode<synchronous>, transform_indices = @transform_1, window_bounds = array<i64: 5, 128, 256>}, {pipeline_mode = #tpu.pipeline_mode<synchronous>, transform_indices = @transform_2, window_bounds = array<i64: 1, 128>}, {transform_indices = @transform_3, window_bounds = array<i64: 2, 7, 16, 128>}]} {
    %c0 = arith.constant 0 : index
    %c0_0 = arith.constant 0 : index
    %0 = vector.load %arg3[%c0, %c0_0] : memref<1x128xf32, #tpu.memory_space<vmem>>, vector<1x128xf32>
    %c0_1 = arith.constant 0 : index
    %c0_2 = arith.constant 0 : index
    %c0_3 = arith.constant 0 : index
    %c0_4 = arith.constant 0 : index
    %1 = vector.load %arg1[%c0_1, %c0_2, %c0_3, %c0_4] : memref<4x8x16x128xbf16, #tpu.memory_space<vmem>>, vector<1x7x16x128xbf16>
    %2 = vector.shape_cast %1 : vector<1x7x16x128xbf16> to vector<7x16x128xbf16>
    %3 = vector.shape_cast %2 : vector<7x16x128xbf16> to vector<112x128xbf16>
    %c1 = arith.constant 1 : index
    %c0_5 = arith.constant 0 : index
    %c0_6 = arith.constant 0 : index
    %c0_7 = arith.constant 0 : index
    %4 = vector.load %arg1[%c1, %c0_5, %c0_6, %c0_7] : memref<4x8x16x128xbf16, #tpu.memory_space<vmem>>, vector<1x7x16x128xbf16>
    %5 = vector.shape_cast %4 : vector<1x7x16x128xbf16> to vector<7x16x128xbf16>
    %6 = vector.shape_cast %5 : vector<7x16x128xbf16> to vector<112x128xbf16>
    %c2 = arith.constant 2 : index
    %c0_8 = arith.constant 0 : index
    %c0_9 = arith.constant 0 : index
    %c0_10 = arith.constant 0 : index
    %7 = vector.load %arg1[%c2, %c0_8, %c0_9, %c0_10] : memref<4x8x16x128xbf16, #tpu.memory_space<vmem>>, vector<1x7x16x128xbf16>
    %8 = vector.shape_cast %7 : vector<1x7x16x128xbf16> to vector<7x16x128xbf16>
    %9 = vector.shape_cast %8 : vector<7x16x128xbf16> to vector<112x128xbf16>
    %c3 = arith.constant 3 : index
    %c0_11 = arith.constant 0 : index
    %c0_12 = arith.constant 0 : index
    %c0_13 = arith.constant 0 : index
    %10 = vector.load %arg1[%c3, %c0_11, %c0_12, %c0_13] : memref<4x8x16x128xbf16, #tpu.memory_space<vmem>>, vector<1x7x16x128xbf16>
    %11 = vector.shape_cast %10 : vector<1x7x16x128xbf16> to vector<7x16x128xbf16>
    %12 = vector.shape_cast %11 : vector<7x16x128xbf16> to vector<112x128xbf16>
    %c0_14 = arith.constant 0 : index
    %c1_15 = arith.constant 1 : index
    %c0_16 = arith.constant 0 : index
    %c0_17 = arith.constant 0 : index
    %13 = vector.load %arg1[%c0_14, %c1_15, %c0_16, %c0_17] : memref<4x8x16x128xbf16, #tpu.memory_space<vmem>>, vector<1x7x16x128xbf16>
    %14 = vector.shape_cast %13 : vector<1x7x16x128xbf16> to vector<7x16x128xbf16>
    %15 = vector.shape_cast %14 : vector<7x16x128xbf16> to vector<112x128xbf16>
    %c1_18 = arith.constant 1 : index
    %c1_19 = arith.constant 1 : index
    %c0_20 = arith.constant 0 : index
    %c0_21 = arith.constant 0 : index
    %16 = vector.load %arg1[%c1_18, %c1_19, %c0_20, %c0_21] : memref<4x8x16x128xbf16, #tpu.memory_space<vmem>>, vector<1x7x16x128xbf16>
    %17 = vector.shape_cast %16 : vector<1x7x16x128xbf16> to vector<7x16x128xbf16>
    %18 = vector.shape_cast %17 : vector<7x16x128xbf16> to vector<112x128xbf16>
    %c2_22 = arith.constant 2 : index
    %c1_23 = arith.constant 1 : index
    %c0_24 = arith.constant 0 : index
    %c0_25 = arith.constant 0 : index
    %19 = vector.load %arg1[%c2_22, %c1_23, %c0_24, %c0_25] : memref<4x8x16x128xbf16, #tpu.memory_space<vmem>>, vector<1x7x16x128xbf16>
    %20 = vector.shape_cast %19 : vector<1x7x16x128xbf16> to vector<7x16x128xbf16>
    %21 = vector.shape_cast %20 : vector<7x16x128xbf16> to vector<112x128xbf16>
    %c3_26 = arith.constant 3 : index
    %c1_27 = arith.constant 1 : index
    %c0_28 = arith.constant 0 : index
    %c0_29 = arith.constant 0 : index
    %22 = vector.load %arg1[%c3_26, %c1_27, %c0_28, %c0_29] : memref<4x8x16x128xbf16, #tpu.memory_space<vmem>>, vector<1x7x16x128xbf16>
    %23 = vector.shape_cast %22 : vector<1x7x16x128xbf16> to vector<7x16x128xbf16>
    %24 = vector.shape_cast %23 : vector<7x16x128xbf16> to vector<112x128xbf16>
    %c0_30 = arith.constant 0 : index
    %c0_31 = arith.constant 0 : index
    %c0_32 = arith.constant 0 : index
    %25 = vector.load %arg2[%c0_30, %c0_31, %c0_32] : memref<5x128x256xbf16, #tpu.memory_space<vmem>>, vector<1x128x256xbf16>
    %26 = vector.shape_cast %25 : vector<1x128x256xbf16> to vector<128x256xbf16>
    %cst = arith.constant dense<0.000000e+00> : vector<112x256xf32>
    %27 = tpu.matmul %3, %26, %cst {dimension_numbers = #tpu.dot_dimension_numbers<[1], [0], [0], [1], [0, 0, 1, 1], [], []>} : vector<112x128xbf16>, vector<128x256xbf16>, vector<112x256xf32> -> vector<112x256xf32>
    %c1_33 = arith.constant 1 : index
    %c0_34 = arith.constant 0 : index
    %c0_35 = arith.constant 0 : index
    %28 = vector.load %arg2[%c1_33, %c0_34, %c0_35] : memref<5x128x256xbf16, #tpu.memory_space<vmem>>, vector<1x128x256xbf16>
    %29 = vector.shape_cast %28 : vector<1x128x256xbf16> to vector<128x256xbf16>
    %cst_36 = arith.constant dense<0.000000e+00> : vector<112x256xf32>
    %30 = tpu.matmul %6, %29, %cst_36 {dimension_numbers = #tpu.dot_dimension_numbers<[1], [0], [0], [1], [0, 0, 1, 1], [], []>} : vector<112x128xbf16>, vector<128x256xbf16>, vector<112x256xf32> -> vector<112x256xf32>
    %31 = arith.addf %27, %30 : vector<112x256xf32>
    %c2_37 = arith.constant 2 : index
    %c0_38 = arith.constant 0 : index
    %c0_39 = arith.constant 0 : index
    %32 = vector.load %arg2[%c2_37, %c0_38, %c0_39] : memref<5x128x256xbf16, #tpu.memory_space<vmem>>, vector<1x128x256xbf16>
    %33 = vector.shape_cast %32 : vector<1x128x256xbf16> to vector<128x256xbf16>
    %cst_40 = arith.constant dense<0.000000e+00> : vector<112x256xf32>
    %34 = tpu.matmul %9, %33, %cst_40 {dimension_numbers = #tpu.dot_dimension_numbers<[1], [0], [0], [1], [0, 0, 1, 1], [], []>} : vector<112x128xbf16>, vector<128x256xbf16>, vector<112x256xf32> -> vector<112x256xf32>
    %35 = arith.addf %31, %34 : vector<112x256xf32>
    %c3_41 = arith.constant 3 : index
    %c0_42 = arith.constant 0 : index
    %c0_43 = arith.constant 0 : index
    %36 = vector.load %arg2[%c3_41, %c0_42, %c0_43] : memref<5x128x256xbf16, #tpu.memory_space<vmem>>, vector<1x128x256xbf16>
    %37 = vector.shape_cast %36 : vector<1x128x256xbf16> to vector<128x256xbf16>
    %cst_44 = arith.constant dense<0.000000e+00> : vector<112x256xf32>
    %38 = tpu.matmul %12, %37, %cst_44 {dimension_numbers = #tpu.dot_dimension_numbers<[1], [0], [0], [1], [0, 0, 1, 1], [], []>} : vector<112x128xbf16>, vector<128x256xbf16>, vector<112x256xf32> -> vector<112x256xf32>
    %39 = arith.addf %35, %38 : vector<112x256xf32>
    %c4 = arith.constant 4 : index
    %c0_45 = arith.constant 0 : index
    %c0_46 = arith.constant 0 : index
    %40 = vector.load %arg2[%c4, %c0_45, %c0_46] : memref<5x128x256xbf16, #tpu.memory_space<vmem>>, vector<1x128x256xbf16>
    %41 = vector.shape_cast %40 : vector<1x128x256xbf16> to vector<128x256xbf16>
    %cst_47 = arith.constant dense<0.000000e+00> : vector<112x256xf32>
    %42 = tpu.matmul %15, %41, %cst_47 {dimension_numbers = #tpu.dot_dimension_numbers<[1], [0], [0], [1], [0, 0, 1, 1], [], []>} : vector<112x128xbf16>, vector<128x256xbf16>, vector<112x256xf32> -> vector<112x256xf32>
    %43 = arith.addf %39, %42 : vector<112x256xf32>
    %44 = vector.extract_strided_slice %43 {offsets = [0, 0], sizes = [112, 128], strides = [1, 1]} : vector<112x256xf32> to vector<112x128xf32>
    %45 = vector.extract_strided_slice %43 {offsets = [0, 128], sizes = [112, 128], strides = [1, 1]} : vector<112x256xf32> to vector<112x128xf32>
    %46 = arith.maximumf %44, %45 : vector<112x128xf32>
    %c0_48 = arith.constant 0 : index
    %c0_49 = arith.constant 0 : index
    %c0_50 = arith.constant 0 : index
    %47 = vector.load %arg2[%c0_48, %c0_49, %c0_50] : memref<5x128x256xbf16, #tpu.memory_space<vmem>>, vector<1x128x256xbf16>
    %48 = vector.shape_cast %47 : vector<1x128x256xbf16> to vector<128x256xbf16>
    %cst_51 = arith.constant dense<0.000000e+00> : vector<112x256xf32>
    %49 = tpu.matmul %6, %48, %cst_51 {dimension_numbers = #tpu.dot_dimension_numbers<[1], [0], [0], [1], [0, 0, 1, 1], [], []>} : vector<112x128xbf16>, vector<128x256xbf16>, vector<112x256xf32> -> vector<112x256xf32>
    %c1_52 = arith.constant 1 : index
    %c0_53 = arith.constant 0 : index
    %c0_54 = arith.constant 0 : index
    %50 = vector.load %arg2[%c1_52, %c0_53, %c0_54] : memref<5x128x256xbf16, #tpu.memory_space<vmem>>, vector<1x128x256xbf16>
    %51 = vector.shape_cast %50 : vector<1x128x256xbf16> to vector<128x256xbf16>
    %cst_55 = arith.constant dense<0.000000e+00> : vector<112x256xf32>
    %52 = tpu.matmul %9, %51, %cst_55 {dimension_numbers = #tpu.dot_dimension_numbers<[1], [0], [0], [1], [0, 0, 1, 1], [], []>} : vector<112x128xbf16>, vector<128x256xbf16>, vector<112x256xf32> -> vector<112x256xf32>
    %53 = arith.addf %49, %52 : vector<112x256xf32>
    %c2_56 = arith.constant 2 : index
    %c0_57 = arith.constant 0 : index
    %c0_58 = arith.constant 0 : index
    %54 = vector.load %arg2[%c2_56, %c0_57, %c0_58] : memref<5x128x256xbf16, #tpu.memory_space<vmem>>, vector<1x128x256xbf16>
    %55 = vector.shape_cast %54 : vector<1x128x256xbf16> to vector<128x256xbf16>
    %cst_59 = arith.constant dense<0.000000e+00> : vector<112x256xf32>
    %56 = tpu.matmul %12, %55, %cst_59 {dimension_numbers = #tpu.dot_dimension_numbers<[1], [0], [0], [1], [0, 0, 1, 1], [], []>} : vector<112x128xbf16>, vector<128x256xbf16>, vector<112x256xf32> -> vector<112x256xf32>
    %57 = arith.addf %53, %56 : vector<112x256xf32>
    %c3_60 = arith.constant 3 : index
    %c0_61 = arith.constant 0 : index
    %c0_62 = arith.constant 0 : index
    %58 = vector.load %arg2[%c3_60, %c0_61, %c0_62] : memref<5x128x256xbf16, #tpu.memory_space<vmem>>, vector<1x128x256xbf16>
    %59 = vector.shape_cast %58 : vector<1x128x256xbf16> to vector<128x256xbf16>
    %cst_63 = arith.constant dense<0.000000e+00> : vector<112x256xf32>
    %60 = tpu.matmul %15, %59, %cst_63 {dimension_numbers = #tpu.dot_dimension_numbers<[1], [0], [0], [1], [0, 0, 1, 1], [], []>} : vector<112x128xbf16>, vector<128x256xbf16>, vector<112x256xf32> -> vector<112x256xf32>
    %61 = arith.addf %57, %60 : vector<112x256xf32>
    %c4_64 = arith.constant 4 : index
    %c0_65 = arith.constant 0 : index
    %c0_66 = arith.constant 0 : index
    %62 = vector.load %arg2[%c4_64, %c0_65, %c0_66] : memref<5x128x256xbf16, #tpu.memory_space<vmem>>, vector<1x128x256xbf16>
    %63 = vector.shape_cast %62 : vector<1x128x256xbf16> to vector<128x256xbf16>
    %cst_67 = arith.constant dense<0.000000e+00> : vector<112x256xf32>
    %64 = tpu.matmul %18, %63, %cst_67 {dimension_numbers = #tpu.dot_dimension_numbers<[1], [0], [0], [1], [0, 0, 1, 1], [], []>} : vector<112x128xbf16>, vector<128x256xbf16>, vector<112x256xf32> -> vector<112x256xf32>
    %65 = arith.addf %61, %64 : vector<112x256xf32>
    %66 = vector.extract_strided_slice %65 {offsets = [0, 0], sizes = [112, 128], strides = [1, 1]} : vector<112x256xf32> to vector<112x128xf32>
    %67 = vector.extract_strided_slice %65 {offsets = [0, 128], sizes = [112, 128], strides = [1, 1]} : vector<112x256xf32> to vector<112x128xf32>
    %68 = arith.maximumf %66, %67 : vector<112x128xf32>
    %69 = arith.maximumf %46, %68 : vector<112x128xf32>
    %70 = vector.broadcast %0 : vector<1x128xf32> to vector<112x128xf32>
    %71 = arith.addf %69, %70 : vector<112x128xf32>
    %cst_68 = arith.constant 0.000000e+00 : f32
    %72 = vector.broadcast %cst_68 : f32 to vector<112x128xf32>
    %73 = arith.maximumf %71, %72 : vector<112x128xf32>
    %74 = vector.shape_cast %73 : vector<112x128xf32> to vector<7x16x128xf32>
    %75 = arith.truncf %74 : vector<7x16x128xf32> to vector<7x16x128xbf16>
    %c0_69 = arith.constant 0 : index
    %c0_70 = arith.constant 0 : index
    %c0_71 = arith.constant 0 : index
    %c0_72 = arith.constant 0 : index
    %76 = vector.load %arg4[%c0_69, %c0_70, %c0_71, %c0_72] : memref<2x7x16x128xbf16, #tpu.memory_space<vmem>>, vector<1x7x16x128xbf16>
    %77 = vector.shape_cast %76 : vector<1x7x16x128xbf16> to vector<7x16x128xbf16>
    %78 = vector.shape_cast %75 : vector<7x16x128xbf16> to vector<1x7x16x128xbf16>
    tpu.vector_store %arg4[%c0_69, %c0_70, %c0_71, %c0_72], %78 {strides = array<i32>} : memref<2x7x16x128xbf16, #tpu.memory_space<vmem>>, vector<1x7x16x128xbf16>,
    %c0_73 = arith.constant 0 : index
    %c0_74 = arith.constant 0 : index
    %c0_75 = arith.constant 0 : index
    %79 = vector.load %arg2[%c0_73, %c0_74, %c0_75] : memref<5x128x256xbf16, #tpu.memory_space<vmem>>, vector<1x128x256xbf16>
    %80 = vector.shape_cast %79 : vector<1x128x256xbf16> to vector<128x256xbf16>
    %cst_76 = arith.constant dense<0.000000e+00> : vector<112x256xf32>
    %81 = tpu.matmul %9, %80, %cst_76 {dimension_numbers = #tpu.dot_dimension_numbers<[1], [0], [0], [1], [0, 0, 1, 1], [], []>} : vector<112x128xbf16>, vector<128x256xbf16>, vector<112x256xf32> -> vector<112x256xf32>
    %c1_77 = arith.constant 1 : index
    %c0_78 = arith.constant 0 : index
    %c0_79 = arith.constant 0 : index
    %82 = vector.load %arg2[%c1_77, %c0_78, %c0_79] : memref<5x128x256xbf16, #tpu.memory_space<vmem>>, vector<1x128x256xbf16>
    %83 = vector.shape_cast %82 : vector<1x128x256xbf16> to vector<128x256xbf16>
    %cst_80 = arith.constant dense<0.000000e+00> : vector<112x256xf32>
    %84 = tpu.matmul %12, %83, %cst_80 {dimension_numbers = #tpu.dot_dimension_numbers<[1], [0], [0], [1], [0, 0, 1, 1], [], []>} : vector<112x128xbf16>, vector<128x256xbf16>, vector<112x256xf32> -> vector<112x256xf32>
    %85 = arith.addf %81, %84 : vector<112x256xf32>
    %c2_81 = arith.constant 2 : index
    %c0_82 = arith.constant 0 : index
    %c0_83 = arith.constant 0 : index
    %86 = vector.load %arg2[%c2_81, %c0_82, %c0_83] : memref<5x128x256xbf16, #tpu.memory_space<vmem>>, vector<1x128x256xbf16>
    %87 = vector.shape_cast %86 : vector<1x128x256xbf16> to vector<128x256xbf16>
    %cst_84 = arith.constant dense<0.000000e+00> : vector<112x256xf32>
    %88 = tpu.matmul %15, %87, %cst_84 {dimension_numbers = #tpu.dot_dimension_numbers<[1], [0], [0], [1], [0, 0, 1, 1], [], []>} : vector<112x128xbf16>, vector<128x256xbf16>, vector<112x256xf32> -> vector<112x256xf32>
    %89 = arith.addf %85, %88 : vector<112x256xf32>
    %c3_85 = arith.constant 3 : index
    %c0_86 = arith.constant 0 : index
    %c0_87 = arith.constant 0 : index
    %90 = vector.load %arg2[%c3_85, %c0_86, %c0_87] : memref<5x128x256xbf16, #tpu.memory_space<vmem>>, vector<1x128x256xbf16>
    %91 = vector.shape_cast %90 : vector<1x128x256xbf16> to vector<128x256xbf16>
    %cst_88 = arith.constant dense<0.000000e+00> : vector<112x256xf32>
    %92 = tpu.matmul %18, %91, %cst_88 {dimension_numbers = #tpu.dot_dimension_numbers<[1], [0], [0], [1], [0, 0, 1, 1], [], []>} : vector<112x128xbf16>, vector<128x256xbf16>, vector<112x256xf32> -> vector<112x256xf32>
    %93 = arith.addf %89, %92 : vector<112x256xf32>
    %c4_89 = arith.constant 4 : index
    %c0_90 = arith.constant 0 : index
    %c0_91 = arith.constant 0 : index
    %94 = vector.load %arg2[%c4_89, %c0_90, %c0_91] : memref<5x128x256xbf16, #tpu.memory_space<vmem>>, vector<1x128x256xbf16>
    %95 = vector.shape_cast %94 : vector<1x128x256xbf16> to vector<128x256xbf16>
    %cst_92 = arith.constant dense<0.000000e+00> : vector<112x256xf32>
    %96 = tpu.matmul %21, %95, %cst_92 {dimension_numbers = #tpu.dot_dimension_numbers<[1], [0], [0], [1], [0, 0, 1, 1], [], []>} : vector<112x128xbf16>, vector<128x256xbf16>, vector<112x256xf32> -> vector<112x256xf32>
    %97 = arith.addf %93, %96 : vector<112x256xf32>
    %98 = vector.extract_strided_slice %97 {offsets = [0, 0], sizes = [112, 128], strides = [1, 1]} : vector<112x256xf32> to vector<112x128xf32>
    %99 = vector.extract_strided_slice %97 {offsets = [0, 128], sizes = [112, 128], strides = [1, 1]} : vector<112x256xf32> to vector<112x128xf32>
    %100 = arith.maximumf %98, %99 : vector<112x128xf32>
    %c0_93 = arith.constant 0 : index
    %c0_94 = arith.constant 0 : index
    %c0_95 = arith.constant 0 : index
    %101 = vector.load %arg2[%c0_93, %c0_94, %c0_95] : memref<5x128x256xbf16, #tpu.memory_space<vmem>>, vector<1x128x256xbf16>
    %102 = vector.shape_cast %101 : vector<1x128x256xbf16> to vector<128x256xbf16>
    %cst_96 = arith.constant dense<0.000000e+00> : vector<112x256xf32>
    %103 = tpu.matmul %12, %102, %cst_96 {dimension_numbers = #tpu.dot_dimension_numbers<[1], [0], [0], [1], [0, 0, 1, 1], [], []>} : vector<112x128xbf16>, vector<128x256xbf16>, vector<112x256xf32> -> vector<112x256xf32>
    %c1_97 = arith.constant 1 : index
    %c0_98 = arith.constant 0 : index
    %c0_99 = arith.constant 0 : index
    %104 = vector.load %arg2[%c1_97, %c0_98, %c0_99] : memref<5x128x256xbf16, #tpu.memory_space<vmem>>, vector<1x128x256xbf16>
    %105 = vector.shape_cast %104 : vector<1x128x256xbf16> to vector<128x256xbf16>
    %cst_100 = arith.constant dense<0.000000e+00> : vector<112x256xf32>
    %106 = tpu.matmul %15, %105, %cst_100 {dimension_numbers = #tpu.dot_dimension_numbers<[1], [0], [0], [1], [0, 0, 1, 1], [], []>} : vector<112x128xbf16>, vector<128x256xbf16>, vector<112x256xf32> -> vector<112x256xf32>
    %107 = arith.addf %103, %106 : vector<112x256xf32>
    %c2_101 = arith.constant 2 : index
    %c0_102 = arith.constant 0 : index
    %c0_103 = arith.constant 0 : index
    %108 = vector.load %arg2[%c2_101, %c0_102, %c0_103] : memref<5x128x256xbf16, #tpu.memory_space<vmem>>, vector<1x128x256xbf16>
    %109 = vector.shape_cast %108 : vector<1x128x256xbf16> to vector<128x256xbf16>
    %cst_104 = arith.constant dense<0.000000e+00> : vector<112x256xf32>
    %110 = tpu.matmul %18, %109, %cst_104 {dimension_numbers = #tpu.dot_dimension_numbers<[1], [0], [0], [1], [0, 0, 1, 1], [], []>} : vector<112x128xbf16>, vector<128x256xbf16>, vector<112x256xf32> -> vector<112x256xf32>
    %111 = arith.addf %107, %110 : vector<112x256xf32>
    %c3_105 = arith.constant 3 : index
    %c0_106 = arith.constant 0 : index
    %c0_107 = arith.constant 0 : index
    %112 = vector.load %arg2[%c3_105, %c0_106, %c0_107] : memref<5x128x256xbf16, #tpu.memory_space<vmem>>, vector<1x128x256xbf16>
    %113 = vector.shape_cast %112 : vector<1x128x256xbf16> to vector<128x256xbf16>
    %cst_108 = arith.constant dense<0.000000e+00> : vector<112x256xf32>
    %114 = tpu.matmul %21, %113, %cst_108 {dimension_numbers = #tpu.dot_dimension_numbers<[1], [0], [0], [1], [0, 0, 1, 1], [], []>} : vector<112x128xbf16>, vector<128x256xbf16>, vector<112x256xf32> -> vector<112x256xf32>
    %115 = arith.addf %111, %114 : vector<112x256xf32>
    %c4_109 = arith.constant 4 : index
    %c0_110 = arith.constant 0 : index
    %c0_111 = arith.constant 0 : index
    %116 = vector.load %arg2[%c4_109, %c0_110, %c0_111] : memref<5x128x256xbf16, #tpu.memory_space<vmem>>, vector<1x128x256xbf16>
    %117 = vector.shape_cast %116 : vector<1x128x256xbf16> to vector<128x256xbf16>
    %cst_112 = arith.constant dense<0.000000e+00> : vector<112x256xf32>
    %118 = tpu.matmul %24, %117, %cst_112 {dimension_numbers = #tpu.dot_dimension_numbers<[1], [0], [0], [1], [0, 0, 1, 1], [], []>} : vector<112x128xbf16>, vector<128x256xbf16>, vector<112x256xf32> -> vector<112x256xf32>
    %119 = arith.addf %115, %118 : vector<112x256xf32>
    %120 = vector.extract_strided_slice %119 {offsets = [0, 0], sizes = [112, 128], strides = [1, 1]} : vector<112x256xf32> to vector<112x128xf32>
    %121 = vector.extract_strided_slice %119 {offsets = [0, 128], sizes = [112, 128], strides = [1, 1]} : vector<112x256xf32> to vector<112x128xf32>
    %122 = arith.maximumf %120, %121 : vector<112x128xf32>
    %123 = arith.maximumf %100, %122 : vector<112x128xf32>
    %124 = vector.broadcast %0 : vector<1x128xf32> to vector<112x128xf32>
    %125 = arith.addf %123, %124 : vector<112x128xf32>
    %cst_113 = arith.constant 0.000000e+00 : f32
    %126 = vector.broadcast %cst_113 : f32 to vector<112x128xf32>
    %127 = arith.maximumf %125, %126 : vector<112x128xf32>
    %128 = vector.shape_cast %127 : vector<112x128xf32> to vector<7x16x128xf32>
    %129 = arith.truncf %128 : vector<7x16x128xf32> to vector<7x16x128xbf16>
    %c1_114 = arith.constant 1 : index
    %c0_115 = arith.constant 0 : index
    %c0_116 = arith.constant 0 : index
    %c0_117 = arith.constant 0 : index
    %130 = vector.load %arg4[%c1_114, %c0_115, %c0_116, %c0_117] : memref<2x7x16x128xbf16, #tpu.memory_space<vmem>>, vector<1x7x16x128xbf16>
    %131 = vector.shape_cast %130 : vector<1x7x16x128xbf16> to vector<7x16x128xbf16>
    %132 = vector.shape_cast %129 : vector<7x16x128xbf16> to vector<1x7x16x128xbf16>
    tpu.vector_store %arg4[%c1_114, %c0_115, %c0_116, %c0_117], %132 {strides = array<i32>} : memref<2x7x16x128xbf16, #tpu.memory_space<vmem>>, vector<1x7x16x128xbf16>,
    return
  }
  func.func @transform_0(%arg0: i32) -> (i32, i32, i32, i32) {
    %c0_i32 = arith.constant 0 : i32
    %c0_i32_0 = arith.constant 0 : i32
    %c0_i32_1 = arith.constant 0 : i32
    %c0_i32_2 = arith.constant 0 : i32
    return %c0_i32, %c0_i32_0, %arg0, %c0_i32_1 : i32, i32, i32, i32
  }
  func.func @transform_1(%arg0: i32) -> (i32, i32, i32) {
    %c0_i32 = arith.constant 0 : i32
    %c0_i32_0 = arith.constant 0 : i32
    %c0_i32_1 = arith.constant 0 : i32
    %c0_i32_2 = arith.constant 0 : i32
    return %c0_i32, %c0_i32_0, %c0_i32_1 : i32, i32, i32
  }
  func.func @transform_2(%arg0: i32) -> (i32, i32) {
    %c0_i32 = arith.constant 0 : i32
    %c0_i32_0 = arith.constant 0 : i32
    %c0_i32_1 = arith.constant 0 : i32
    return %c0_i32, %c0_i32_0 : i32, i32
  }
  func.func @transform_3(%arg0: i32) -> (i32, i32, i32, i32) {
    %c0_i32 = arith.constant 0 : i32
    %c0_i32_0 = arith.constant 0 : i32
    %c0_i32_1 = arith.constant 0 : i32
    %c0_i32_2 = arith.constant 0 : i32
    return %c0_i32, %c0_i32_0, %arg0, %c0_i32_1 : i32, i32, i32, i32
  }
}

module attributes {stable_mosaic.version = 11 : i64} {
  func.func @_conv_fc_kernel(%arg0: i32, %arg1: memref<2x7x16x128xbf16, #tpu.memory_space<vmem>>, %arg2: memref<5x128x256xbf16, #tpu.memory_space<vmem>>, %arg3: memref<1x128xf32, #tpu.memory_space<vmem>>, %arg4: memref<5x128x128xbf16, #tpu.memory_space<vmem>>, %arg5: memref<1x128xf32, #tpu.memory_space<vmem>>, %arg6: memref<128x128xbf16, #tpu.memory_space<vmem>>, %arg7: memref<1x128xf32, #tpu.memory_space<vmem>>, %arg8: memref<128x128xbf16, #tpu.memory_space<vmem>>, %arg9: memref<1x128xf32, #tpu.memory_space<vmem>>, %arg10: memref<16x128xf32, #tpu.memory_space<vmem>>) attributes {dimension_semantics = [#tpu.dimension_semantics<parallel>], iteration_bounds = array<i64: 1>, scalar_prefetch = 0 : i64, scratch_operands = 0 : i64, tpu.core_type = #tpu.core_type<tc>, window_params = [{transform_indices = @transform_0, window_bounds = array<i64: 2, 7, 16, 128>}, {pipeline_mode = #tpu.pipeline_mode<synchronous>, transform_indices = @transform_1, window_bounds = array<i64: 5, 128, 256>}, {pipeline_mode = #tpu.pipeline_mode<synchronous>, transform_indices = @transform_2, window_bounds = array<i64: 1, 128>}, {pipeline_mode = #tpu.pipeline_mode<synchronous>, transform_indices = @transform_3, window_bounds = array<i64: 5, 128, 128>}, {pipeline_mode = #tpu.pipeline_mode<synchronous>, transform_indices = @transform_4, window_bounds = array<i64: 1, 128>}, {pipeline_mode = #tpu.pipeline_mode<synchronous>, transform_indices = @transform_5, window_bounds = array<i64: 128, 128>}, {pipeline_mode = #tpu.pipeline_mode<synchronous>, transform_indices = @transform_6, window_bounds = array<i64: 1, 128>}, {pipeline_mode = #tpu.pipeline_mode<synchronous>, transform_indices = @transform_7, window_bounds = array<i64: 128, 128>}, {pipeline_mode = #tpu.pipeline_mode<synchronous>, transform_indices = @transform_8, window_bounds = array<i64: 1, 128>}, {transform_indices = @transform_9, window_bounds = array<i64: 16, 128>}]} {
    %c0 = arith.constant 0 : index
    %c0_0 = arith.constant 0 : index
    %c0_1 = arith.constant 0 : index
    %c0_2 = arith.constant 0 : index
    %0 = vector.load %arg1[%c0, %c0_0, %c0_1, %c0_2] : memref<2x7x16x128xbf16, #tpu.memory_space<vmem>>, vector<1x5x16x128xbf16>
    %1 = vector.shape_cast %0 : vector<1x5x16x128xbf16> to vector<5x16x128xbf16>
    %2 = vector.shape_cast %1 : vector<5x16x128xbf16> to vector<80x128xbf16>
    %c1 = arith.constant 1 : index
    %c0_3 = arith.constant 0 : index
    %c0_4 = arith.constant 0 : index
    %c0_5 = arith.constant 0 : index
    %3 = vector.load %arg1[%c1, %c0_3, %c0_4, %c0_5] : memref<2x7x16x128xbf16, #tpu.memory_space<vmem>>, vector<1x5x16x128xbf16>
    %4 = vector.shape_cast %3 : vector<1x5x16x128xbf16> to vector<5x16x128xbf16>
    %5 = vector.shape_cast %4 : vector<5x16x128xbf16> to vector<80x128xbf16>
    %c0_6 = arith.constant 0 : index
    %c1_7 = arith.constant 1 : index
    %c0_8 = arith.constant 0 : index
    %c0_9 = arith.constant 0 : index
    %6 = vector.load %arg1[%c0_6, %c1_7, %c0_8, %c0_9] : memref<2x7x16x128xbf16, #tpu.memory_space<vmem>>, vector<1x5x16x128xbf16>
    %7 = vector.shape_cast %6 : vector<1x5x16x128xbf16> to vector<5x16x128xbf16>
    %8 = vector.shape_cast %7 : vector<5x16x128xbf16> to vector<80x128xbf16>
    %c1_10 = arith.constant 1 : index
    %c1_11 = arith.constant 1 : index
    %c0_12 = arith.constant 0 : index
    %c0_13 = arith.constant 0 : index
    %9 = vector.load %arg1[%c1_10, %c1_11, %c0_12, %c0_13] : memref<2x7x16x128xbf16, #tpu.memory_space<vmem>>, vector<1x5x16x128xbf16>
    %10 = vector.shape_cast %9 : vector<1x5x16x128xbf16> to vector<5x16x128xbf16>
    %11 = vector.shape_cast %10 : vector<5x16x128xbf16> to vector<80x128xbf16>
    %c0_14 = arith.constant 0 : index
    %c2 = arith.constant 2 : index
    %c0_15 = arith.constant 0 : index
    %c0_16 = arith.constant 0 : index
    %12 = vector.load %arg1[%c0_14, %c2, %c0_15, %c0_16] : memref<2x7x16x128xbf16, #tpu.memory_space<vmem>>, vector<1x5x16x128xbf16>
    %13 = vector.shape_cast %12 : vector<1x5x16x128xbf16> to vector<5x16x128xbf16>
    %14 = vector.shape_cast %13 : vector<5x16x128xbf16> to vector<80x128xbf16>
    %c1_17 = arith.constant 1 : index
    %c2_18 = arith.constant 2 : index
    %c0_19 = arith.constant 0 : index
    %c0_20 = arith.constant 0 : index
    %15 = vector.load %arg1[%c1_17, %c2_18, %c0_19, %c0_20] : memref<2x7x16x128xbf16, #tpu.memory_space<vmem>>, vector<1x5x16x128xbf16>
    %16 = vector.shape_cast %15 : vector<1x5x16x128xbf16> to vector<5x16x128xbf16>
    %17 = vector.shape_cast %16 : vector<5x16x128xbf16> to vector<80x128xbf16>
    %c0_21 = arith.constant 0 : index
    %c0_22 = arith.constant 0 : index
    %c0_23 = arith.constant 0 : index
    %18 = vector.load %arg2[%c0_21, %c0_22, %c0_23] : memref<5x128x256xbf16, #tpu.memory_space<vmem>>, vector<1x128x256xbf16>
    %19 = vector.shape_cast %18 : vector<1x128x256xbf16> to vector<128x256xbf16>
    %cst = arith.constant dense<0.000000e+00> : vector<80x256xf32>
    %20 = tpu.matmul %2, %19, %cst {dimension_numbers = #tpu.dot_dimension_numbers<[1], [0], [0], [1], [0, 0, 1, 1], [], []>} : vector<80x128xbf16>, vector<128x256xbf16>, vector<80x256xf32> -> vector<80x256xf32>
    %c1_24 = arith.constant 1 : index
    %c0_25 = arith.constant 0 : index
    %c0_26 = arith.constant 0 : index
    %21 = vector.load %arg2[%c1_24, %c0_25, %c0_26] : memref<5x128x256xbf16, #tpu.memory_space<vmem>>, vector<1x128x256xbf16>
    %22 = vector.shape_cast %21 : vector<1x128x256xbf16> to vector<128x256xbf16>
    %cst_27 = arith.constant dense<0.000000e+00> : vector<80x256xf32>
    %23 = tpu.matmul %5, %22, %cst_27 {dimension_numbers = #tpu.dot_dimension_numbers<[1], [0], [0], [1], [0, 0, 1, 1], [], []>} : vector<80x128xbf16>, vector<128x256xbf16>, vector<80x256xf32> -> vector<80x256xf32>
    %24 = arith.addf %20, %23 : vector<80x256xf32>
    %c2_28 = arith.constant 2 : index
    %c0_29 = arith.constant 0 : index
    %c0_30 = arith.constant 0 : index
    %25 = vector.load %arg2[%c2_28, %c0_29, %c0_30] : memref<5x128x256xbf16, #tpu.memory_space<vmem>>, vector<1x128x256xbf16>
    %26 = vector.shape_cast %25 : vector<1x128x256xbf16> to vector<128x256xbf16>
    %cst_31 = arith.constant dense<0.000000e+00> : vector<80x256xf32>
    %27 = tpu.matmul %8, %26, %cst_31 {dimension_numbers = #tpu.dot_dimension_numbers<[1], [0], [0], [1], [0, 0, 1, 1], [], []>} : vector<80x128xbf16>, vector<128x256xbf16>, vector<80x256xf32> -> vector<80x256xf32>
    %28 = arith.addf %24, %27 : vector<80x256xf32>
    %c3 = arith.constant 3 : index
    %c0_32 = arith.constant 0 : index
    %c0_33 = arith.constant 0 : index
    %29 = vector.load %arg2[%c3, %c0_32, %c0_33] : memref<5x128x256xbf16, #tpu.memory_space<vmem>>, vector<1x128x256xbf16>
    %30 = vector.shape_cast %29 : vector<1x128x256xbf16> to vector<128x256xbf16>
    %cst_34 = arith.constant dense<0.000000e+00> : vector<80x256xf32>
    %31 = tpu.matmul %11, %30, %cst_34 {dimension_numbers = #tpu.dot_dimension_numbers<[1], [0], [0], [1], [0, 0, 1, 1], [], []>} : vector<80x128xbf16>, vector<128x256xbf16>, vector<80x256xf32> -> vector<80x256xf32>
    %32 = arith.addf %28, %31 : vector<80x256xf32>
    %c4 = arith.constant 4 : index
    %c0_35 = arith.constant 0 : index
    %c0_36 = arith.constant 0 : index
    %33 = vector.load %arg2[%c4, %c0_35, %c0_36] : memref<5x128x256xbf16, #tpu.memory_space<vmem>>, vector<1x128x256xbf16>
    %34 = vector.shape_cast %33 : vector<1x128x256xbf16> to vector<128x256xbf16>
    %cst_37 = arith.constant dense<0.000000e+00> : vector<80x256xf32>
    %35 = tpu.matmul %14, %34, %cst_37 {dimension_numbers = #tpu.dot_dimension_numbers<[1], [0], [0], [1], [0, 0, 1, 1], [], []>} : vector<80x128xbf16>, vector<128x256xbf16>, vector<80x256xf32> -> vector<80x256xf32>
    %36 = arith.addf %32, %35 : vector<80x256xf32>
    %37 = vector.extract_strided_slice %36 {offsets = [0, 0], sizes = [80, 128], strides = [1, 1]} : vector<80x256xf32> to vector<80x128xf32>
    %38 = vector.extract_strided_slice %36 {offsets = [0, 128], sizes = [80, 128], strides = [1, 1]} : vector<80x256xf32> to vector<80x128xf32>
    %39 = arith.maximumf %37, %38 : vector<80x128xf32>
    %c0_38 = arith.constant 0 : index
    %c0_39 = arith.constant 0 : index
    %c0_40 = arith.constant 0 : index
    %40 = vector.load %arg2[%c0_38, %c0_39, %c0_40] : memref<5x128x256xbf16, #tpu.memory_space<vmem>>, vector<1x128x256xbf16>
    %41 = vector.shape_cast %40 : vector<1x128x256xbf16> to vector<128x256xbf16>
    %cst_41 = arith.constant dense<0.000000e+00> : vector<80x256xf32>
    %42 = tpu.matmul %5, %41, %cst_41 {dimension_numbers = #tpu.dot_dimension_numbers<[1], [0], [0], [1], [0, 0, 1, 1], [], []>} : vector<80x128xbf16>, vector<128x256xbf16>, vector<80x256xf32> -> vector<80x256xf32>
    %c1_42 = arith.constant 1 : index
    %c0_43 = arith.constant 0 : index
    %c0_44 = arith.constant 0 : index
    %43 = vector.load %arg2[%c1_42, %c0_43, %c0_44] : memref<5x128x256xbf16, #tpu.memory_space<vmem>>, vector<1x128x256xbf16>
    %44 = vector.shape_cast %43 : vector<1x128x256xbf16> to vector<128x256xbf16>
    %cst_45 = arith.constant dense<0.000000e+00> : vector<80x256xf32>
    %45 = tpu.matmul %8, %44, %cst_45 {dimension_numbers = #tpu.dot_dimension_numbers<[1], [0], [0], [1], [0, 0, 1, 1], [], []>} : vector<80x128xbf16>, vector<128x256xbf16>, vector<80x256xf32> -> vector<80x256xf32>
    %46 = arith.addf %42, %45 : vector<80x256xf32>
    %c2_46 = arith.constant 2 : index
    %c0_47 = arith.constant 0 : index
    %c0_48 = arith.constant 0 : index
    %47 = vector.load %arg2[%c2_46, %c0_47, %c0_48] : memref<5x128x256xbf16, #tpu.memory_space<vmem>>, vector<1x128x256xbf16>
    %48 = vector.shape_cast %47 : vector<1x128x256xbf16> to vector<128x256xbf16>
    %cst_49 = arith.constant dense<0.000000e+00> : vector<80x256xf32>
    %49 = tpu.matmul %11, %48, %cst_49 {dimension_numbers = #tpu.dot_dimension_numbers<[1], [0], [0], [1], [0, 0, 1, 1], [], []>} : vector<80x128xbf16>, vector<128x256xbf16>, vector<80x256xf32> -> vector<80x256xf32>
    %50 = arith.addf %46, %49 : vector<80x256xf32>
    %c3_50 = arith.constant 3 : index
    %c0_51 = arith.constant 0 : index
    %c0_52 = arith.constant 0 : index
    %51 = vector.load %arg2[%c3_50, %c0_51, %c0_52] : memref<5x128x256xbf16, #tpu.memory_space<vmem>>, vector<1x128x256xbf16>
    %52 = vector.shape_cast %51 : vector<1x128x256xbf16> to vector<128x256xbf16>
    %cst_53 = arith.constant dense<0.000000e+00> : vector<80x256xf32>
    %53 = tpu.matmul %14, %52, %cst_53 {dimension_numbers = #tpu.dot_dimension_numbers<[1], [0], [0], [1], [0, 0, 1, 1], [], []>} : vector<80x128xbf16>, vector<128x256xbf16>, vector<80x256xf32> -> vector<80x256xf32>
    %54 = arith.addf %50, %53 : vector<80x256xf32>
    %c4_54 = arith.constant 4 : index
    %c0_55 = arith.constant 0 : index
    %c0_56 = arith.constant 0 : index
    %55 = vector.load %arg2[%c4_54, %c0_55, %c0_56] : memref<5x128x256xbf16, #tpu.memory_space<vmem>>, vector<1x128x256xbf16>
    %56 = vector.shape_cast %55 : vector<1x128x256xbf16> to vector<128x256xbf16>
    %cst_57 = arith.constant dense<0.000000e+00> : vector<80x256xf32>
    %57 = tpu.matmul %17, %56, %cst_57 {dimension_numbers = #tpu.dot_dimension_numbers<[1], [0], [0], [1], [0, 0, 1, 1], [], []>} : vector<80x128xbf16>, vector<128x256xbf16>, vector<80x256xf32> -> vector<80x256xf32>
    %58 = arith.addf %54, %57 : vector<80x256xf32>
    %59 = vector.extract_strided_slice %58 {offsets = [0, 0], sizes = [80, 128], strides = [1, 1]} : vector<80x256xf32> to vector<80x128xf32>
    %60 = vector.extract_strided_slice %58 {offsets = [0, 128], sizes = [80, 128], strides = [1, 1]} : vector<80x256xf32> to vector<80x128xf32>
    %61 = arith.maximumf %59, %60 : vector<80x128xf32>
    %62 = arith.maximumf %39, %61 : vector<80x128xf32>
    %c0_58 = arith.constant 0 : index
    %c0_59 = arith.constant 0 : index
    %63 = vector.load %arg3[%c0_58, %c0_59] : memref<1x128xf32, #tpu.memory_space<vmem>>, vector<1x128xf32>
    %64 = vector.broadcast %63 : vector<1x128xf32> to vector<80x128xf32>
    %65 = arith.addf %62, %64 : vector<80x128xf32>
    %cst_60 = arith.constant 0.000000e+00 : f32
    %66 = vector.broadcast %cst_60 : f32 to vector<80x128xf32>
    %67 = arith.maximumf %65, %66 : vector<80x128xf32>
    %68 = arith.truncf %67 : vector<80x128xf32> to vector<80x128xbf16>
    %69 = vector.shape_cast %68 : vector<80x128xbf16> to vector<5x16x128xbf16>
    %70 = vector.extract_strided_slice %69 {offsets = [0, 0, 0], sizes = [1, 16, 128], strides = [1, 1, 1]} : vector<5x16x128xbf16> to vector<1x16x128xbf16>
    %71 = vector.shape_cast %70 : vector<1x16x128xbf16> to vector<16x128xbf16>
    %c0_61 = arith.constant 0 : index
    %c0_62 = arith.constant 0 : index
    %c0_63 = arith.constant 0 : index
    %72 = vector.load %arg4[%c0_61, %c0_62, %c0_63] : memref<5x128x128xbf16, #tpu.memory_space<vmem>>, vector<1x128x128xbf16>
    %73 = vector.shape_cast %72 : vector<1x128x128xbf16> to vector<128x128xbf16>
    %cst_64 = arith.constant dense<0.000000e+00> : vector<16x128xf32>
    %74 = tpu.matmul %71, %73, %cst_64 {dimension_numbers = #tpu.dot_dimension_numbers<[1], [0], [0], [1], [0, 0, 1, 1], [], []>} : vector<16x128xbf16>, vector<128x128xbf16>, vector<16x128xf32> -> vector<16x128xf32>
    %75 = vector.extract_strided_slice %69 {offsets = [1, 0, 0], sizes = [1, 16, 128], strides = [1, 1, 1]} : vector<5x16x128xbf16> to vector<1x16x128xbf16>
    %76 = vector.shape_cast %75 : vector<1x16x128xbf16> to vector<16x128xbf16>
    %c1_65 = arith.constant 1 : index
    %c0_66 = arith.constant 0 : index
    %c0_67 = arith.constant 0 : index
    %77 = vector.load %arg4[%c1_65, %c0_66, %c0_67] : memref<5x128x128xbf16, #tpu.memory_space<vmem>>, vector<1x128x128xbf16>
    %78 = vector.shape_cast %77 : vector<1x128x128xbf16> to vector<128x128xbf16>
    %cst_68 = arith.constant dense<0.000000e+00> : vector<16x128xf32>
    %79 = tpu.matmul %76, %78, %cst_68 {dimension_numbers = #tpu.dot_dimension_numbers<[1], [0], [0], [1], [0, 0, 1, 1], [], []>} : vector<16x128xbf16>, vector<128x128xbf16>, vector<16x128xf32> -> vector<16x128xf32>
    %80 = arith.addf %74, %79 : vector<16x128xf32>
    %81 = vector.extract_strided_slice %69 {offsets = [2, 0, 0], sizes = [1, 16, 128], strides = [1, 1, 1]} : vector<5x16x128xbf16> to vector<1x16x128xbf16>
    %82 = vector.shape_cast %81 : vector<1x16x128xbf16> to vector<16x128xbf16>
    %c2_69 = arith.constant 2 : index
    %c0_70 = arith.constant 0 : index
    %c0_71 = arith.constant 0 : index
    %83 = vector.load %arg4[%c2_69, %c0_70, %c0_71] : memref<5x128x128xbf16, #tpu.memory_space<vmem>>, vector<1x128x128xbf16>
    %84 = vector.shape_cast %83 : vector<1x128x128xbf16> to vector<128x128xbf16>
    %cst_72 = arith.constant dense<0.000000e+00> : vector<16x128xf32>
    %85 = tpu.matmul %82, %84, %cst_72 {dimension_numbers = #tpu.dot_dimension_numbers<[1], [0], [0], [1], [0, 0, 1, 1], [], []>} : vector<16x128xbf16>, vector<128x128xbf16>, vector<16x128xf32> -> vector<16x128xf32>
    %86 = arith.addf %80, %85 : vector<16x128xf32>
    %87 = vector.extract_strided_slice %69 {offsets = [3, 0, 0], sizes = [1, 16, 128], strides = [1, 1, 1]} : vector<5x16x128xbf16> to vector<1x16x128xbf16>
    %88 = vector.shape_cast %87 : vector<1x16x128xbf16> to vector<16x128xbf16>
    %c3_73 = arith.constant 3 : index
    %c0_74 = arith.constant 0 : index
    %c0_75 = arith.constant 0 : index
    %89 = vector.load %arg4[%c3_73, %c0_74, %c0_75] : memref<5x128x128xbf16, #tpu.memory_space<vmem>>, vector<1x128x128xbf16>
    %90 = vector.shape_cast %89 : vector<1x128x128xbf16> to vector<128x128xbf16>
    %cst_76 = arith.constant dense<0.000000e+00> : vector<16x128xf32>
    %91 = tpu.matmul %88, %90, %cst_76 {dimension_numbers = #tpu.dot_dimension_numbers<[1], [0], [0], [1], [0, 0, 1, 1], [], []>} : vector<16x128xbf16>, vector<128x128xbf16>, vector<16x128xf32> -> vector<16x128xf32>
    %92 = arith.addf %86, %91 : vector<16x128xf32>
    %93 = vector.extract_strided_slice %69 {offsets = [4, 0, 0], sizes = [1, 16, 128], strides = [1, 1, 1]} : vector<5x16x128xbf16> to vector<1x16x128xbf16>
    %94 = vector.shape_cast %93 : vector<1x16x128xbf16> to vector<16x128xbf16>
    %c4_77 = arith.constant 4 : index
    %c0_78 = arith.constant 0 : index
    %c0_79 = arith.constant 0 : index
    %95 = vector.load %arg4[%c4_77, %c0_78, %c0_79] : memref<5x128x128xbf16, #tpu.memory_space<vmem>>, vector<1x128x128xbf16>
    %96 = vector.shape_cast %95 : vector<1x128x128xbf16> to vector<128x128xbf16>
    %cst_80 = arith.constant dense<0.000000e+00> : vector<16x128xf32>
    %97 = tpu.matmul %94, %96, %cst_80 {dimension_numbers = #tpu.dot_dimension_numbers<[1], [0], [0], [1], [0, 0, 1, 1], [], []>} : vector<16x128xbf16>, vector<128x128xbf16>, vector<16x128xf32> -> vector<16x128xf32>
    %98 = arith.addf %92, %97 : vector<16x128xf32>
    %c0_81 = arith.constant 0 : index
    %c0_82 = arith.constant 0 : index
    %99 = vector.load %arg5[%c0_81, %c0_82] : memref<1x128xf32, #tpu.memory_space<vmem>>, vector<1x128xf32>
    %100 = vector.broadcast %99 : vector<1x128xf32> to vector<16x128xf32>
    %101 = arith.addf %98, %100 : vector<16x128xf32>
    %cst_83 = arith.constant 0.000000e+00 : f32
    %102 = vector.broadcast %cst_83 : f32 to vector<16x128xf32>
    %103 = arith.maximumf %101, %102 : vector<16x128xf32>
    %104 = arith.truncf %103 : vector<16x128xf32> to vector<16x128xbf16>
    %c0_84 = arith.constant 0 : index
    %c0_85 = arith.constant 0 : index
    %105 = vector.load %arg6[%c0_84, %c0_85] : memref<128x128xbf16, #tpu.memory_space<vmem>>, vector<128x128xbf16>
    %cst_86 = arith.constant dense<0.000000e+00> : vector<16x128xf32>
    %106 = tpu.matmul %104, %105, %cst_86 {dimension_numbers = #tpu.dot_dimension_numbers<[1], [0], [0], [1], [0, 0, 1, 1], [], []>} : vector<16x128xbf16>, vector<128x128xbf16>, vector<16x128xf32> -> vector<16x128xf32>
    %c0_87 = arith.constant 0 : index
    %c0_88 = arith.constant 0 : index
    %107 = vector.load %arg7[%c0_87, %c0_88] : memref<1x128xf32, #tpu.memory_space<vmem>>, vector<1x128xf32>
    %108 = vector.broadcast %107 : vector<1x128xf32> to vector<16x128xf32>
    %109 = arith.addf %106, %108 : vector<16x128xf32>
    %cst_89 = arith.constant 0.000000e+00 : f32
    %110 = vector.broadcast %cst_89 : f32 to vector<16x128xf32>
    %111 = arith.maximumf %109, %110 : vector<16x128xf32>
    %112 = arith.truncf %111 : vector<16x128xf32> to vector<16x128xbf16>
    %c0_90 = arith.constant 0 : index
    %c0_91 = arith.constant 0 : index
    %113 = vector.load %arg8[%c0_90, %c0_91] : memref<128x128xbf16, #tpu.memory_space<vmem>>, vector<128x128xbf16>
    %cst_92 = arith.constant dense<0.000000e+00> : vector<16x128xf32>
    %114 = tpu.matmul %112, %113, %cst_92 {dimension_numbers = #tpu.dot_dimension_numbers<[1], [0], [0], [1], [0, 0, 1, 1], [], []>} : vector<16x128xbf16>, vector<128x128xbf16>, vector<16x128xf32> -> vector<16x128xf32>
    %c0_93 = arith.constant 0 : index
    %c0_94 = arith.constant 0 : index
    %115 = vector.load %arg9[%c0_93, %c0_94] : memref<1x128xf32, #tpu.memory_space<vmem>>, vector<1x128xf32>
    %116 = vector.broadcast %115 : vector<1x128xf32> to vector<16x128xf32>
    %117 = arith.addf %114, %116 : vector<16x128xf32>
    %c0_95 = arith.constant 0 : index
    %c0_96 = arith.constant 0 : index
    %118 = vector.load %arg10[%c0_95, %c0_96] : memref<16x128xf32, #tpu.memory_space<vmem>>, vector<16x128xf32>
    tpu.vector_store %arg10[%c0_95, %c0_96], %117 {strides = array<i32>} : memref<16x128xf32, #tpu.memory_space<vmem>>, vector<16x128xf32>,
    return
  }
  func.func @transform_0(%arg0: i32) -> (i32, i32, i32, i32) {
    %c0_i32 = arith.constant 0 : i32
    %c0_i32_0 = arith.constant 0 : i32
    %c0_i32_1 = arith.constant 0 : i32
    %c0_i32_2 = arith.constant 0 : i32
    return %c0_i32, %c0_i32_0, %arg0, %c0_i32_1 : i32, i32, i32, i32
  }
  func.func @transform_1(%arg0: i32) -> (i32, i32, i32) {
    %c0_i32 = arith.constant 0 : i32
    %c0_i32_0 = arith.constant 0 : i32
    %c0_i32_1 = arith.constant 0 : i32
    %c0_i32_2 = arith.constant 0 : i32
    return %c0_i32, %c0_i32_0, %c0_i32_1 : i32, i32, i32
  }
  func.func @transform_2(%arg0: i32) -> (i32, i32) {
    %c0_i32 = arith.constant 0 : i32
    %c0_i32_0 = arith.constant 0 : i32
    %c0_i32_1 = arith.constant 0 : i32
    return %c0_i32, %c0_i32_0 : i32, i32
  }
  func.func @transform_3(%arg0: i32) -> (i32, i32, i32) {
    %c0_i32 = arith.constant 0 : i32
    %c0_i32_0 = arith.constant 0 : i32
    %c0_i32_1 = arith.constant 0 : i32
    %c0_i32_2 = arith.constant 0 : i32
    return %c0_i32, %c0_i32_0, %c0_i32_1 : i32, i32, i32
  }
  func.func @transform_4(%arg0: i32) -> (i32, i32) {
    %c0_i32 = arith.constant 0 : i32
    %c0_i32_0 = arith.constant 0 : i32
    %c0_i32_1 = arith.constant 0 : i32
    return %c0_i32, %c0_i32_0 : i32, i32
  }
  func.func @transform_5(%arg0: i32) -> (i32, i32) {
    %c0_i32 = arith.constant 0 : i32
    %c0_i32_0 = arith.constant 0 : i32
    %c0_i32_1 = arith.constant 0 : i32
    return %c0_i32, %c0_i32_0 : i32, i32
  }
  func.func @transform_6(%arg0: i32) -> (i32, i32) {
    %c0_i32 = arith.constant 0 : i32
    %c0_i32_0 = arith.constant 0 : i32
    %c0_i32_1 = arith.constant 0 : i32
    return %c0_i32, %c0_i32_0 : i32, i32
  }
  func.func @transform_7(%arg0: i32) -> (i32, i32) {
    %c0_i32 = arith.constant 0 : i32
    %c0_i32_0 = arith.constant 0 : i32
    %c0_i32_1 = arith.constant 0 : i32
    return %c0_i32, %c0_i32_0 : i32, i32
  }
  func.func @transform_8(%arg0: i32) -> (i32, i32) {
    %c0_i32 = arith.constant 0 : i32
    %c0_i32_0 = arith.constant 0 : i32
    %c0_i32_1 = arith.constant 0 : i32
    return %c0_i32, %c0_i32_0 : i32, i32
  }
  func.func @transform_9(%arg0: i32) -> (i32, i32) {
    %c0_i32 = arith.constant 0 : i32
    %c0_i32_0 = arith.constant 0 : i32
    return %arg0, %c0_i32 : i32, i32
  }
}

</mosaic_0001>

<bundles_post_ra>
// kernel: basicnet_forward.3
= control target key start
LH: loop header
LB: loop body
LE: loop exit
PB: predicated region body
PF: predicated region fallthrough
CT: control target
= control target key end

     0   :  { %v3474_v1 = vmov 0   ;;  %vm3476_vm0 = vmmov 0   ;;  %s4251_s1 = inlined_call_operand.vmem [shape: bf16[5,128,256], index: 1, kind: input, shape index: {}]   ;;  %s4252_s0 = inlined_call_operand.vmem [shape: bf16[2,7,16,128], index: 0, kind: input, shape index: {}]   ;;  %s4253_s3 = inlined_call_operand.vmem [shape: bf16[5,128,128], index: 3, kind: input, shape index: {}]   ;;  %s4254_s2 = inlined_call_operand.vmem [shape: f32[1,128], index: 2, kind: input, shape index: {}]   ;;  %s4255_s5 = inlined_call_operand.vmem [shape: bf16[128,128], index: 5, kind: input, shape index: {}]   ;;  %s4256_s7 = inlined_call_operand.vmem [shape: bf16[128,128], index: 7, kind: input, shape index: {}]   ;;  %s4257_s4 = inlined_call_operand.vmem [shape: f32[1,128], index: 4, kind: input, shape index: {}]   ;;  %s4258_s6 = inlined_call_operand.vmem [shape: f32[1,128], index: 6, kind: input, shape index: {}]   ;;  %s4259_s8 = inlined_call_operand.vmem [shape: f32[1,128], index: 8, kind: input, shape index: {}]   ;;  %s4260_s9 = inlined_call_operand.vmem [shape: f32[16,128], index: 9, kind: output, shape index: {}]  }
   0x1   :  { %v3268_v0 = vld [vmem:[%s4251_s1 + $0x84] ss:$8 sps:$4 sm:$0xff]   ;;  %273 = vmatprep.mubr.bf16.mxu0 %v3474_v1  ;;  %1249 = vmatprep.mubr.bf16.mxu1 %v3474_v1  ;;  %v3270_v2 = vld [vmem:[%s4251_s1 + $0x80] ss:$8 sps:$4 sm:$0xff]   ;;  %v3271_v3 = vld [vmem:[%s4251_s1 + $0x94] ss:$8 sps:$4 sm:$0xff]  }
   0x2   :  { %241 = vmatprep.subr.bf16.mxu0 %v3268_v0  ;;  %1217 = vmatprep.subr.bf16.mxu1 %v3268_v0  ;;  %v3273_v4 = vld [vmem:[%s4251_s1 + $0x90] ss:$8 sps:$4 sm:$0xff]   ;;  %v3274_v5 = vld [vmem:[%s4251_s1 + $0xa4] ss:$8 sps:$4 sm:$0xff]   ;;  %v3276_v6 = vld [vmem:[%s4251_s1 + $0xa0] ss:$8 sps:$4 sm:$0xff]  }
   0x3   :  { %242 = vmatpush1.bf16.msra.mxu0 %v3270_v2  ;;  %1218 = vmatpush1.bf16.msra.mxu1 %v3270_v2  ;;  %v3277_v7 = vld [vmem:[%s4251_s1 + $0xb4] ss:$8 sps:$4 sm:$0xff]   ;;  %v3279_v8 = vld [vmem:[%s4251_s1 + $0xb0] ss:$8 sps:$4 sm:$0xff]   ;;  %v3280_v9 = vld [vmem:[%s4251_s1 + $0xc4] ss:$8 sps:$4 sm:$0xff]  }
   0x4   :  { %243 = vmatprep.subr.bf16.mxu0 %v3271_v3  ;;  %1219 = vmatprep.subr.bf16.mxu1 %v3271_v3  ;;  %v3282_v10 = vld [vmem:[%s4251_s1 + $0xc0] ss:$8 sps:$4 sm:$0xff]   ;;  %v3283_v11 = vld [vmem:[%s4251_s1 + $0xd4] ss:$8 sps:$4 sm:$0xff]   ;;  %v3285_v12 = vld [vmem:[%s4251_s1 + $0xd0] ss:$8 sps:$4 sm:$0xff]  }
   0x5   :  { %v3286_v13 = vld [vmem:[%s4251_s1 + $0xe4] ss:$8 sps:$4 sm:$0xff]   ;;  %v3288_v14 = vld [vmem:[%s4251_s1 + $0xe0] ss:$8 sps:$4 sm:$0xff]   ;;  %v3289_v15 = vld [vmem:[%s4251_s1 + $0xf4] ss:$8 sps:$4 sm:$0xff]  }
   0x6   :  { %v3291_v16 = vld [vmem:[%s4251_s1 + $0xf0] ss:$8 sps:$4 sm:$0xff]   ;;  %v3295_v17 = vld [vmem:[%s4251_s1 + $0x4] ss:$8 sps:$4 sm:$0xff]   ;;  %v3293_v20 = vld [vmem:[%s4251_s1] ss:$8 sps:$4 sm:$0xff]  }
   0x7   :  { %244 = vmatpush1.bf16.msra.mxu0 %v3273_v4  ;;  %1220 = vmatpush1.bf16.msra.mxu1 %v3273_v4  ;;  %v3583_v18 = vld [vmem:[%s4252_s0 + $0x38] sm:$0xff]   ;;  %v3588_v19 = vld [vmem:[%s4252_s0 + $0x8] sm:$0xff]   ;;  %v3609_v24 = vld [vmem:[%s4252_s0 + $0x40] sm:$0xff]  }
   0x8   :  { %245 = vmatprep.subr.bf16.mxu0 %v3274_v5  ;;  %1221 = vmatprep.subr.bf16.mxu1 %v3274_v5  ;;  %v3299_v21 = vld [vmem:[%s4251_s1 + $0x14] ss:$8 sps:$4 sm:$0xff]   ;;  %v3297_v22 = vld [vmem:[%s4251_s1 + $0x10] ss:$8 sps:$4 sm:$0xff]   ;;  %v3304_v23 = vld [vmem:[%s4251_s1 + $0x24] ss:$8 sps:$4 sm:$0xff]  }
   0x9   :  { %v3614_v25 = vld [vmem:[%s4252_s0 + $0x10] sm:$0xff]   ;;  %v3302_v26 = vld [vmem:[%s4251_s1 + $0x20] ss:$8 sps:$4 sm:$0xff]   ;;  %v3312_v29 = vld [vmem:[%s4251_s1 + $0x44] ss:$8 sps:$4 sm:$0xff]  }
   0xa   :  { %v3307_v27 = vld [vmem:[%s4251_s1 + $0x34] ss:$8 sps:$4 sm:$0xff]   ;;  %v3305_v28 = vld [vmem:[%s4251_s1 + $0x30] ss:$8 sps:$4 sm:$0xff]   ;;  %v3635_v30 = vld [vmem:[%s4252_s0 + $0x48] sm:$0xff]  }
   0xb   :  { %246 = vmatpush1.bf16.msra.mxu0 %v3276_v6  ;;  %1222 = vmatpush1.bf16.msra.mxu1 %v3276_v6  ;;  %v3640_v31 = vld [vmem:[%s4252_s0 + $0x18] sm:$0xff]   ;;  %v3310_v32 = vld [vmem:[%s4251_s1 + $0x40] ss:$8 sps:$4 sm:$0xff]   ;;  %v3320_v35 = vld [vmem:[%s4251_s1 + $0x64] ss:$8 sps:$4 sm:$0xff]  }
   0xc   :  { %247 = vmatprep.subr.bf16.mxu0 %v3277_v7  ;;  %1223 = vmatprep.subr.bf16.mxu1 %v3277_v7  ;;  %v3317_v33 = vld [vmem:[%s4251_s1 + $0x54] ss:$8 sps:$4 sm:$0xff]   ;;  %v3315_v34 = vld [vmem:[%s4251_s1 + $0x50] ss:$8 sps:$4 sm:$0xff]   ;;  %v3666_v37 = vld [vmem:[%s4252_s0 + $0x20] sm:$0xff]  }
   0xd   :  { %v3661_v36 = vld [vmem:[%s4252_s0 + $0x50] sm:$0xff]   ;;  %v3318_v38 = vld [vmem:[%s4251_s1 + $0x60] ss:$8 sps:$4 sm:$0xff]   ;;  %v3329_v41 = vld [vmem:[%s4251_s1 + $0x104] ss:$8 sps:$4 sm:$0xff]  }
   0xe   :  { %v3325_v39 = vld [vmem:[%s4251_s1 + $0x74] ss:$8 sps:$4 sm:$0xff]   ;;  %v3323_v40 = vld [vmem:[%s4251_s1 + $0x70] ss:$8 sps:$4 sm:$0xff]   ;;  %v3692_v43 = vld [vmem:[%s4252_s0 + $0x28] sm:$0xff]  }
   0xf   :  { %248 = vmatpush1.bf16.msra.mxu0 %v3279_v8  ;;  %1224 = vmatpush1.bf16.msra.mxu1 %v3279_v8  ;;  %v3687_v42 = vld [vmem:[%s4252_s0 + $0x58] sm:$0xff]   ;;  %v3326_v44 = vld [vmem:[%s4252_s0] sm:$0xff]   ;;  %v3333_v49 = vld [vmem:[%s4252_s0 + $0x8] sm:$0xff]  }
  0x10   :  { %249 = vmatprep.subr.bf16.mxu0 %v3280_v9  ;;  %1225 = vmatprep.subr.bf16.mxu1 %v3280_v9  ;;  %v3327_v45 = vld [vmem:[%s4251_s1 + $0x100] ss:$8 sps:$4 sm:$0xff]   ;;  %v3332_v46 = vld [vmem:[%s4251_s1 + $0x114] ss:$8 sps:$4 sm:$0xff]   ;;  %v3330_v47 = vld [vmem:[%s4251_s1 + $0x110] ss:$8 sps:$4 sm:$0xff]  }
  0x11   :  { %v3336_v48 = vld [vmem:[%s4251_s1 + $0x124] ss:$8 sps:$4 sm:$0xff]   ;;  %v3334_v50 = vld [vmem:[%s4251_s1 + $0x120] ss:$8 sps:$4 sm:$0xff]   ;;  %v3339_v51 = vld [vmem:[%s4251_s1 + $0x134] ss:$8 sps:$4 sm:$0xff]  }
  0x12   :  { %v3337_v52 = vld [vmem:[%s4251_s1 + $0x130] ss:$8 sps:$4 sm:$0xff]   ;;  %v3343_v53 = vld [vmem:[%s4251_s1 + $0x144] ss:$8 sps:$4 sm:$0xff]   ;;  %v3341_v55 = vld [vmem:[%s4251_s1 + $0x140] ss:$8 sps:$4 sm:$0xff]  }
  0x13   :  { %250 = vmatpush1.bf16.msra.mxu0 %v3282_v10  ;;  %1226 = vmatpush1.bf16.msra.mxu1 %v3282_v10  ;;  %v3340_v54 = vld [vmem:[%s4252_s0 + $0x10] sm:$0xff]   ;;  %v3350_v58 = vld [vmem:[%s4251_s1 + $0x164] ss:$8 sps:$4 sm:$0xff]   ;;  %v3344_v59 = vld [vmem:[%s4252_s0 + $0x18] sm:$0xff]  }
  0x14   :  { %251 = vmatprep.subr.bf16.mxu0 %v3283_v11  ;;  %1227 = vmatprep.subr.bf16.mxu1 %v3283_v11  ;;  %v3347_v56 = vld [vmem:[%s4251_s1 + $0x154] ss:$8 sps:$4 sm:$0xff]   ;;  %v3345_v57 = vld [vmem:[%s4251_s1 + $0x150] ss:$8 sps:$4 sm:$0xff]   ;;  %v3348_v60 = vld [vmem:[%s4251_s1 + $0x160] ss:$8 sps:$4 sm:$0xff]  }
  0x15   :  { %v3354_v61 = vld [vmem:[%s4251_s1 + $0x174] ss:$8 sps:$4 sm:$0xff]   ;;  %v3352_v62 = vld [vmem:[%s4251_s1 + $0x170] ss:$8 sps:$4 sm:$0xff]   ;;  %v3357_v63 = vld [vmem:[%s4251_s1 + $0x184] ss:$8 sps:$4 sm:$0xff]  }
  0x16   :  { %v3351_v0 = vld [vmem:[%s4252_s0 + $0x20] sm:$0xff]   ;;  %v3361_v4 = vld [vmem:[%s4251_s1 + $0x194] ss:$8 sps:$4 sm:$0xff]   ;;  %v3359_v5 = vld [vmem:[%s4251_s1 + $0x190] ss:$8 sps:$4 sm:$0xff]  }
  0x17   :  { %252 = vmatpush1.bf16.msra.mxu0 %v3285_v12  ;;  %1228 = vmatpush1.bf16.msra.mxu1 %v3285_v12  ;;  %v3779_v2 = vld [vmem:[%s4252_s0 + $0x40] sm:$0xff]   ;;  %v3798_v7 = vld [vmem:[%s4252_s0 + $0x48] sm:$0xff]   ;;  %v3368_v9 = vld [vmem:[%s4251_s1 + $0x1b4] ss:$8 sps:$4 sm:$0xff]  }
  0x18   :  { %253 = vmatprep.subr.bf16.mxu0 %v3286_v13  ;;  %1229 = vmatprep.subr.bf16.mxu1 %v3286_v13  ;;  %v3355_v3 = vld [vmem:[%s4251_s1 + $0x180] ss:$8 sps:$4 sm:$0xff]   ;;  %v3365_v6 = vld [vmem:[%s4251_s1 + $0x1a4] ss:$8 sps:$4 sm:$0xff]   ;;  %v3366_v10 = vld [vmem:[%s4251_s1 + $0x1b0] ss:$8 sps:$4 sm:$0xff]  }
  0x19   :  { %v3363_v8 = vld [vmem:[%s4251_s1 + $0x1a0] ss:$8 sps:$4 sm:$0xff]   ;;  %v3372_v11 = vld [vmem:[%s4251_s1 + $0x1c4] ss:$8 sps:$4 sm:$0xff]   ;;  %v3820_v12 = vld [vmem:[%s4252_s0 + $0x50] sm:$0xff]  }
  0x1a   :  { %v3370_v13 = vld [vmem:[%s4251_s1 + $0x1c0] ss:$8 sps:$4 sm:$0xff]  }
  0x1b   :  { %254 = vmatpush1.bf16.msra.mxu0 %v3288_v14  ;;  %1230 = vmatpush1.bf16.msra.mxu1 %v3288_v14  ;;  %v3376_v14 = vld [vmem:[%s4251_s1 + $0x1d4] ss:$8 sps:$4 sm:$0xff]  }
  0x1c   :  { %255 = vmatprep.subr.bf16.mxu0 %v3289_v15  ;;  %1231 = vmatprep.subr.bf16.mxu1 %v3289_v15  ;;  %v3374_v15 = vld [vmem:[%s4251_s1 + $0x1d0] ss:$8 sps:$4 sm:$0xff]  }
  0x1f   :  { %256 = vmatpush1.bf16.msra.mxu0 %v3291_v16  ;;  %1232 = vmatpush1.bf16.msra.mxu1 %v3291_v16  ;;  %v3379_v16 = vld [vmem:[%s4251_s1 + $0x1e4] ss:$8 sps:$4 sm:$0xff]  }
  0x20   :  { %434 = vmatprep.subr.bf16.mxu0 %v3295_v17  ;;  %1300 = vmatprep.subr.bf16.mxu1 %v3295_v17  ;;  %v3842_v17 = vld [vmem:[%s4252_s0 + $0x58] sm:$0xff]  }
  0x22   :  { %274 = vmatmul.mubr.bf16.vlgmr.msra.gmra.mrb[0].mxu0 %v3583_v18  ;;  %1250 = vmatmul.mubr.bf16.vlgmr.msra.gmra.mrb[0].mxu1 %v3588_v19 }
  0x23   :  { %435 = vmatpush1.bf16.msra.mxu0 %v3293_v20  ;;  %1301 = vmatpush1.bf16.msra.mxu1 %v3293_v20  ;;  %v3381_v20 = vld [vmem:[%s4251_s1 + $0x1f0] ss:$8 sps:$4 sm:$0xff]  }
  0x24   :  { %436 = vmatprep.subr.bf16.mxu0 %v3299_v21  ;;  %1302 = vmatprep.subr.bf16.mxu1 %v3299_v21  ;;  %v3386_v21 = vld [vmem:[%s4251_s1 + $0x204] ss:$8 sps:$4 sm:$0xff]  }
  0x25   :  { %283 = vmatprep.mubr.bf16.mxu0 %v3474_v1  ;;  %1259 = vmatprep.mubr.bf16.mxu1 %v3474_v1 }
  0x27   :  { %437 = vmatpush1.bf16.msra.mxu0 %v3297_v22  ;;  %1303 = vmatpush1.bf16.msra.mxu1 %v3297_v22  ;;  %v3863_v22 = vld [vmem:[%s4252_s0 + $0x60] sm:$0xff]  }
  0x28   :  { %438 = vmatprep.subr.bf16.mxu0 %v3304_v23  ;;  %1304 = vmatprep.subr.bf16.mxu1 %v3304_v23  ;;  %v3872_v23 = vld [vmem:[%s4252_s0 + $0x10] sm:$0xff]  }
  0x2a   :  { %284 = vmatmul.mubr.bf16.gmra.mrb[4].mxu0 %v3609_v24  ;;  %1260 = vmatmul.mubr.bf16.gmra.mrb[4].mxu1 %v3614_v25 }
  0x2b   :  { %439 = vmatpush1.bf16.msra.mxu0 %v3302_v26  ;;  %1305 = vmatpush1.bf16.msra.mxu1 %v3302_v26  ;;  %v3388_v26 = vld [vmem:[%s4251_s1 + $0x210] ss:$8 sps:$4 sm:$0xff]  }
  0x2c   :  { %293 = vmatprep.mubr.bf16.mxu0 %v3474_v1  ;;  %440 = vmatprep.subr.bf16.mxu0 %v3307_v27 }
  0x2d   :  { %1269 = vmatprep.mubr.bf16.mxu1 %v3474_v1  ;;  %1306 = vmatprep.subr.bf16.mxu1 %v3307_v27  ;;  %v3394_v27 = vld [vmem:[%s4251_s1 + $0x224] ss:$8 sps:$4 sm:$0xff]  }
  0x2f   :  { %441 = vmatpush1.bf16.msra.mxu0 %v3305_v28  ;;  %1307 = vmatpush1.bf16.msra.mxu1 %v3305_v28  ;;  %v3893_v28 = vld [vmem:[%s4252_s0 + $0x18] sm:$0xff]  }
  0x30   :  { %442 = vmatprep.subr.bf16.mxu0 %v3312_v29  ;;  %1308 = vmatprep.subr.bf16.mxu1 %v3312_v29  ;;  %v3392_v29 = vld [vmem:[%s4251_s1 + $0x220] ss:$8 sps:$4 sm:$0xff]  }
  0x32   :  { %294 = vmatmul.mubr.bf16.gmra.mrb[8].mxu0 %v3635_v30  ;;  %1270 = vmatmul.mubr.bf16.gmra.mrb[8].mxu1 %v3640_v31 }
  0x33   :  { %443 = vmatpush1.bf16.msra.mxu0 %v3310_v32  ;;  %1309 = vmatpush1.bf16.msra.mxu1 %v3310_v32  ;;  %v3401_v32 = vld [vmem:[%s4251_s1 + $0x244] ss:$8 sps:$4 sm:$0xff]  }
  0x34   :  { %303 = vmatprep.mubr.bf16.mxu0 %v3474_v1  ;;  %1279 = vmatprep.mubr.bf16.mxu1 %v3474_v1 }
  0x35   :  { %444 = vmatprep.subr.bf16.mxu0 %v3317_v33  ;;  %1310 = vmatprep.subr.bf16.mxu1 %v3317_v33  ;;  %v3914_v33 = vld [vmem:[%s4252_s0 + $0x20] sm:$0xff]  }
  0x37   :  { %445 = vmatpush1.bf16.msra.mxu0 %v3315_v34  ;;  %1311 = vmatpush1.bf16.msra.mxu1 %v3315_v34  ;;  %v3399_v34 = vld [vmem:[%s4251_s1 + $0x240] ss:$8 sps:$4 sm:$0xff]  }
  0x38   :  { %446 = vmatprep.subr.bf16.mxu0 %v3320_v35  ;;  %1312 = vmatprep.subr.bf16.mxu1 %v3320_v35  ;;  %v3405_v35 = vld [vmem:[%s4251_s1 + $0x254] ss:$8 sps:$4 sm:$0xff]  }
  0x3a   :  { %304 = vmatmul.mubr.bf16.gmra.mrb[12].mxu0 %v3661_v36  ;;  %1280 = vmatmul.mubr.bf16.gmra.mrb[12].mxu1 %v3666_v37 }
  0x3b   :  { %313 = vmatprep.mubr.bf16.mxu0 %v3474_v1  ;;  %447 = vmatpush1.bf16.msra.mxu0 %v3318_v38 }
  0x3c   :  { %1289 = vmatprep.mubr.bf16.mxu1 %v3474_v1  ;;  %1313 = vmatpush1.bf16.msra.mxu1 %v3318_v38  ;;  %v3935_v38 = vld [vmem:[%s4252_s0 + $0x28] sm:$0xff]  }
  0x3d   :  { %448 = vmatprep.subr.bf16.mxu0 %v3325_v39  ;;  %1314 = vmatprep.subr.bf16.mxu1 %v3325_v39  ;;  %v3406_v39 = vld [vmem:[%s4251_s1 + $0x260] ss:$8 sps:$4 sm:$0xff]  }
  0x3f   :  { %449 = vmatpush1.bf16.msra.mxu0 %v3323_v40 }
  0x40   :  { %1315 = vmatpush1.bf16.msra.mxu1 %v3323_v40  ;;  %644 = vmatprep.subr.bf16.mxu0 %v3329_v41  ;;  %v3412_v40 = vld [vmem:[%s4251_s1 + $0x274] ss:$8 sps:$4 sm:$0xff]  }
  0x41   :  { %1383 = vmatprep.subr.bf16.mxu1 %v3329_v41  ;;  %v3410_v41 = vld [vmem:[%s4251_s1 + $0x270] ss:$8 sps:$4 sm:$0xff]  }
  0x42   :  { %314 = vmatmul.mubr.bf16.gmra.mrb[16].mxu0 %v3687_v42  ;;  %1290 = vmatmul.mubr.bf16.gmra.mrb[16].mxu1 %v3692_v43 }
  0x43   :  { %466 = vmatprep.mubr.bf16.mxu0 %v3474_v1  ;;  %1332 = vmatprep.mubr.bf16.mxu1 %v3474_v1 }
  0x4a   :  { %467 = vmatmul.mubr.bf16.vlgmr.msra.gmra.mrb[0].mxu0 %v3326_v44  ;;  %1333 = vmatmul.mubr.bf16.vlgmr.msra.gmra.mrb[0].mxu1 %v3583_v18  ;;  %v3377_v18 = vld [vmem:[%s4251_s1 + $0x1e0] ss:$8 sps:$4 sm:$0xff]  }
  0x4b   :  { %645 = vmatpush1.bf16.msra.mxu0 %v3327_v45  ;;  %1384 = vmatpush1.bf16.msra.mxu1 %v3327_v45  ;;  %v3413_v44 = vld [vmem:[%s4252_s0 + $0x48] sm:$0xff]   ;;  %v3418_v45 = vld [vmem:[%s4253_s3] sm:$0xff]  }
  0x4c   :  { %646 = vmatprep.subr.bf16.mxu0 %v3332_v46  ;;  %1385 = vmatprep.subr.bf16.mxu1 %v3332_v46  ;;  %v3419_v46 = vld [vmem:[%s4253_s3 + $0x40] sm:$0xff]  }
  0x4d   :  { %476 = vmatprep.mubr.bf16.mxu0 %v3474_v1  ;;  %1342 = vmatprep.mubr.bf16.mxu1 %v3474_v1 }
  0x4f   :  { %647 = vmatpush1.bf16.msra.mxu0 %v3330_v47  ;;  %1386 = vmatpush1.bf16.msra.mxu1 %v3330_v47  ;;  %v3420_v47 = vld [vmem:[%s4253_s3 + $0x8] sm:$0xff]  }
  0x50   :  { %648 = vmatprep.subr.bf16.mxu0 %v3336_v48  ;;  %1387 = vmatprep.subr.bf16.mxu1 %v3336_v48  ;;  %v3421_v48 = vld [vmem:[%s4253_s3 + $0x48] sm:$0xff]  }
  0x52   :  { %477 = vmatmul.mubr.bf16.gmra.mrb[4].mxu0 %v3333_v49  ;;  %1343 = vmatmul.mubr.bf16.gmra.mrb[4].mxu1 %v3609_v24  ;;  %v3384_v24 = vld [vmem:[%s4251_s1 + $0x200] ss:$8 sps:$4 sm:$0xff]   ;;  %v3414_v49 = vld [vmem:[%s4252_s0 + $0x50] sm:$0xff]  }
  0x53   :  { %649 = vmatpush1.bf16.msra.mxu0 %v3334_v50  ;;  %1388 = vmatpush1.bf16.msra.mxu1 %v3334_v50  ;;  %v3422_v50 = vld [vmem:[%s4253_s3 + $0x10] sm:$0xff]  }
  0x54   :  { %486 = vmatprep.mubr.bf16.mxu0 %v3474_v1  ;;  %650 = vmatprep.subr.bf16.mxu0 %v3339_v51 }
  0x55   :  { %1352 = vmatprep.mubr.bf16.mxu1 %v3474_v1  ;;  %1389 = vmatprep.subr.bf16.mxu1 %v3339_v51  ;;  %v3423_v51 = vld [vmem:[%s4253_s3 + $0x50] sm:$0xff]  }
  0x57   :  { %651 = vmatpush1.bf16.msra.mxu0 %v3337_v52  ;;  %1390 = vmatpush1.bf16.msra.mxu1 %v3337_v52  ;;  %v3424_v52 = vld [vmem:[%s4253_s3 + $0x18] sm:$0xff]  }
  0x58   :  { %652 = vmatprep.subr.bf16.mxu0 %v3343_v53  ;;  %1391 = vmatprep.subr.bf16.mxu1 %v3343_v53  ;;  %v3425_v53 = vld [vmem:[%s4253_s3 + $0x58] sm:$0xff]  }
  0x5a   :  { %487 = vmatmul.mubr.bf16.gmra.mrb[8].mxu0 %v3340_v54  ;;  %1353 = vmatmul.mubr.bf16.gmra.mrb[8].mxu1 %v3635_v30  ;;  %v3397_v30 = vld [vmem:[%s4251_s1 + $0x234] ss:$8 sps:$4 sm:$0xff]  }
  0x5b   :  { %653 = vmatpush1.bf16.msra.mxu0 %v3341_v55  ;;  %1392 = vmatpush1.bf16.msra.mxu1 %v3341_v55  ;;  %v3415_v54 = vld [vmem:[%s4252_s0 + $0x58] sm:$0xff]   ;;  %v3426_v55 = vld [vmem:[%s4253_s3 + $0x20] sm:$0xff]  }
  0x5c   :  { %496 = vmatprep.mubr.bf16.mxu0 %v3474_v1  ;;  %1362 = vmatprep.mubr.bf16.mxu1 %v3474_v1 }
  0x5d   :  { %654 = vmatprep.subr.bf16.mxu0 %v3347_v56  ;;  %1393 = vmatprep.subr.bf16.mxu1 %v3347_v56  ;;  %v3416_v56 = vld [vmem:[%s4252_s0 + $0x60] sm:$0xff]  }
  0x5f   :  { %655 = vmatpush1.bf16.msra.mxu0 %v3345_v57  ;;  %1394 = vmatpush1.bf16.msra.mxu1 %v3345_v57  ;;  %v3417_v57 = vld [vmem:[%s4252_s0 + $0x68] sm:$0xff]  }
  0x60   :  { %656 = vmatprep.subr.bf16.mxu0 %v3350_v58  ;;  %1395 = vmatprep.subr.bf16.mxu1 %v3350_v58  ;;  %v3427_v58 = vld [vmem:[%s4253_s3 + $0x28] sm:$0xff]  }
  0x62   :  { %497 = vmatmul.mubr.bf16.gmra.mrb[12].mxu0 %v3344_v59  ;;  %1363 = vmatmul.mubr.bf16.gmra.mrb[12].mxu1 %v3661_v36  ;;  %v3403_v36 = vld [vmem:[%s4251_s1 + $0x250] ss:$8 sps:$4 sm:$0xff]   ;;  %v3428_v59 = vld [vmem:[%s4253_s3 + $0x60] sm:$0xff]  }
  0x63   :  { %506 = vmatprep.mubr.bf16.mxu0 %v3474_v1  ;;  %657 = vmatpush1.bf16.msra.mxu0 %v3348_v60 }
  0x64   :  { %1372 = vmatprep.mubr.bf16.mxu1 %v3474_v1  ;;  %1396 = vmatpush1.bf16.msra.mxu1 %v3348_v60  ;;  %v3430_v60 = vld [vmem:[%s4253_s3 + $0x68] sm:$0xff]  }
  0x65   :  { %658 = vmatprep.subr.bf16.mxu0 %v3354_v61  ;;  %1397 = vmatprep.subr.bf16.mxu1 %v3354_v61  ;;  %v3431_v61 = vld [vmem:[%s4253_s3 + $0x38] sm:$0xff]  }
  0x67   :  { %659 = vmatpush1.bf16.msra.mxu0 %v3352_v62 }
  0x68   :  { %1398 = vmatpush1.bf16.msra.mxu1 %v3352_v62  ;;  %874 = vmatprep.subr.bf16.mxu0 %v3357_v63  ;;  %v3432_v62 = vld [vmem:[%s4253_s3 + $0x70] sm:$0xff]  }
  0x69   :  { %1486 = vmatprep.subr.bf16.mxu1 %v3357_v63  ;;  %v3434_v63 = vld [vmem:[%s4253_s3 + $0x78] sm:$0xff]  }
  0x6a   :  { %507 = vmatmul.mubr.bf16.gmra.mrb[16].mxu0 %v3351_v0  ;;  %1373 = vmatmul.mubr.bf16.gmra.mrb[16].mxu1 %v3687_v42  ;;  %v3409_v42 = vld [vmem:[%s4252_s0 + $0x30] sm:$0xff]  }
  0x6b   :  { %676 = vmatprep.mubr.bf16.mxu0 %v3474_v1  ;;  %1415 = vmatprep.mubr.bf16.mxu1 %v3474_v1 }
  0x72   :  { %677 = vmatmul.mubr.bf16.vlgmr.msra.gmra.mrb[0].mxu0 %v3588_v19  ;;  %1416 = vmatmul.mubr.bf16.vlgmr.msra.gmra.mrb[0].mxu1 %v3779_v2  ;;  %v3383_v19 = vld [vmem:[%s4251_s1 + $0x1f4] ss:$8 sps:$4 sm:$0xff]  }
  0x73   :  { %875 = vmatpush1.bf16.msra.mxu0 %v3355_v3  ;;  %1487 = vmatpush1.bf16.msra.mxu1 %v3355_v3 }
  0x74   :  { %876 = vmatprep.subr.bf16.mxu0 %v3361_v4  ;;  %1488 = vmatprep.subr.bf16.mxu1 %v3361_v4 }
  0x75   :  { %686 = vmatprep.mubr.bf16.mxu0 %v3474_v1  ;;  %1425 = vmatprep.mubr.bf16.mxu1 %v3474_v1 }
  0x77   :  { %877 = vmatpush1.bf16.msra.mxu0 %v3359_v5  ;;  %1489 = vmatpush1.bf16.msra.mxu1 %v3359_v5 }
  0x78   :  { %878 = vmatprep.subr.bf16.mxu0 %v3365_v6  ;;  %1490 = vmatprep.subr.bf16.mxu1 %v3365_v6 }
  0x7a   :  { %687 = vmatmul.mubr.bf16.gmra.mrb[4].mxu0 %v3614_v25  ;;  %1426 = vmatmul.mubr.bf16.gmra.mrb[4].mxu1 %v3798_v7  ;;  %v3390_v25 = vld [vmem:[%s4251_s1 + $0x214] ss:$8 sps:$4 sm:$0xff]  }
  0x7b   :  { %879 = vmatpush1.bf16.msra.mxu0 %v3363_v8  ;;  %1491 = vmatpush1.bf16.msra.mxu1 %v3363_v8 }
  0x7c   :  { %696 = vmatprep.mubr.bf16.mxu0 %v3474_v1  ;;  %880 = vmatprep.subr.bf16.mxu0 %v3368_v9 }
  0x7d   :  { %1435 = vmatprep.mubr.bf16.mxu1 %v3474_v1  ;;  %1492 = vmatprep.subr.bf16.mxu1 %v3368_v9  ;;  %v4056_v9 = vld [vmem:[%s4254_s2] ss:$0 sm:$0xff] }
  0x7f   :  { %881 = vmatpush1.bf16.msra.mxu0 %v3366_v10  ;;  %1493 = vmatpush1.bf16.msra.mxu1 %v3366_v10 }
  0x80   :  { %882 = vmatprep.subr.bf16.mxu0 %v3372_v11  ;;  %1494 = vmatprep.subr.bf16.mxu1 %v3372_v11 }
  0x82   :  { %697 = vmatmul.mubr.bf16.gmra.mrb[8].mxu0 %v3640_v31  ;;  %1436 = vmatmul.mubr.bf16.gmra.mrb[8].mxu1 %v3820_v12  ;;  %v3395_v31 = vld [vmem:[%s4251_s1 + $0x230] ss:$8 sps:$4 sm:$0xff]  }
  0x83   :  { %883 = vmatpush1.bf16.msra.mxu0 %v3370_v13  ;;  %1495 = vmatpush1.bf16.msra.mxu1 %v3370_v13 }
  0x84   :  { %706 = vmatprep.mubr.bf16.mxu0 %v3474_v1  ;;  %1445 = vmatprep.mubr.bf16.mxu1 %v3474_v1 }
  0x85   :  { %884 = vmatprep.subr.bf16.mxu0 %v3376_v14  ;;  %1496 = vmatprep.subr.bf16.mxu1 %v3376_v14 }
  0x87   :  { %885 = vmatpush1.bf16.msra.mxu0 %v3374_v15  ;;  %1497 = vmatpush1.bf16.msra.mxu1 %v3374_v15 }
  0x88   :  { %886 = vmatprep.subr.bf16.mxu0 %v3379_v16  ;;  %1498 = vmatprep.subr.bf16.mxu1 %v3379_v16 }
  0x8a   :  { %707 = vmatmul.mubr.bf16.gmra.mrb[12].mxu0 %v3666_v37  ;;  %1446 = vmatmul.mubr.bf16.gmra.mrb[12].mxu1 %v3842_v17  ;;  %v3408_v37 = vld [vmem:[%s4251_s1 + $0x264] ss:$8 sps:$4 sm:$0xff]  }
  0x8b   :  { %716 = vmatprep.mubr.bf16.mxu0 %v3474_v1  ;;  %887 = vmatpush1.bf16.msra.mxu0 %v3377_v18 }
  0x8c   :  { %1455 = vmatprep.mubr.bf16.mxu1 %v3474_v1  ;;  %1499 = vmatpush1.bf16.msra.mxu1 %v3377_v18 }
  0x8d   :  { %888 = vmatprep.subr.bf16.mxu0 %v3383_v19  ;;  %1500 = vmatprep.subr.bf16.mxu1 %v3383_v19 }
  0x8f   :  { %889 = vmatpush1.bf16.msra.mxu0 %v3381_v20 }
  0x90   :  { %1501 = vmatpush1.bf16.msra.mxu1 %v3381_v20  ;;  %1104 = vmatprep.subr.bf16.mxu0 %v3386_v21 }
  0x91   :  { %1619 = vmatprep.subr.bf16.mxu1 %v3386_v21 }
  0x92   :  { %717 = vmatmul.mubr.bf16.gmra.mrb[16].mxu0 %v3692_v43  ;;  %1456 = vmatmul.mubr.bf16.gmra.mrb[16].mxu1 %v3863_v22  ;;  %v3475_v43 = vmov 0.0  }
  0x93   :  { %906 = vmatprep.mubr.bf16.mxu0 %v3474_v1  ;;  %1518 = vmatprep.mubr.bf16.mxu1 %v3474_v1 }
  0x9a   :  { %907 = vmatmul.mubr.bf16.vlgmr.msra.gmra.mrb[0].mxu0 %v3779_v2  ;;  %1519 = vmatmul.mubr.bf16.vlgmr.msra.gmra.mrb[0].mxu1 %v3872_v23 }
  0x9b   :  { %1105 = vmatpush1.bf16.msra.mxu0 %v3384_v24  ;;  %1620 = vmatpush1.bf16.msra.mxu1 %v3384_v24 }
  0x9c   :  { %1106 = vmatprep.subr.bf16.mxu0 %v3390_v25  ;;  %1621 = vmatprep.subr.bf16.mxu1 %v3390_v25 }
  0x9d   :  { %916 = vmatprep.mubr.bf16.mxu0 %v3474_v1  ;;  %1528 = vmatprep.mubr.bf16.mxu1 %v3474_v1 }
  0x9f   :  { %1107 = vmatpush1.bf16.msra.mxu0 %v3388_v26  ;;  %1622 = vmatpush1.bf16.msra.mxu1 %v3388_v26 }
  0xa0   :  { %1108 = vmatprep.subr.bf16.mxu0 %v3394_v27  ;;  %1623 = vmatprep.subr.bf16.mxu1 %v3394_v27 }
  0xa2   :  { %917 = vmatmul.mubr.bf16.gmra.mrb[4].mxu0 %v3798_v7  ;;  %1529 = vmatmul.mubr.bf16.gmra.mrb[4].mxu1 %v3893_v28 }
  0xa3   :  { %1109 = vmatpush1.bf16.msra.mxu0 %v3392_v29  ;;  %1624 = vmatpush1.bf16.msra.mxu1 %v3392_v29 }
  0xa4   :  { %926 = vmatprep.mubr.bf16.mxu0 %v3474_v1  ;;  %1110 = vmatprep.subr.bf16.mxu0 %v3397_v30 }
  0xa5   :  { %1538 = vmatprep.mubr.bf16.mxu1 %v3474_v1  ;;  %1625 = vmatprep.subr.bf16.mxu1 %v3397_v30  ;;  %v3433_v30 = vld [vmem:[%s4253_s3 + $0xc0] sm:$0xff]  }
  0xa7   :  { %1111 = vmatpush1.bf16.msra.mxu0 %v3395_v31  ;;  %1626 = vmatpush1.bf16.msra.mxu1 %v3395_v31 }
  0xa8   :  { %1112 = vmatprep.subr.bf16.mxu0 %v3401_v32  ;;  %1627 = vmatprep.subr.bf16.mxu1 %v3401_v32 }
  0xaa   :  { %927 = vmatmul.mubr.bf16.gmra.mrb[8].mxu0 %v3820_v12  ;;  %1539 = vmatmul.mubr.bf16.gmra.mrb[8].mxu1 %v3914_v33 }
  0xab   :  { %1113 = vmatpush1.bf16.msra.mxu0 %v3399_v34  ;;  %1628 = vmatpush1.bf16.msra.mxu1 %v3399_v34 }
  0xac   :  { %936 = vmatprep.mubr.bf16.mxu0 %v3474_v1  ;;  %1548 = vmatprep.mubr.bf16.mxu1 %v3474_v1 }
  0xad   :  { %1114 = vmatprep.subr.bf16.mxu0 %v3405_v35  ;;  %1629 = vmatprep.subr.bf16.mxu1 %v3405_v35 }
  0xaf   :  { %1115 = vmatpush1.bf16.msra.mxu0 %v3403_v36  ;;  %1630 = vmatpush1.bf16.msra.mxu1 %v3403_v36 }
  0xb0   :  { %1116 = vmatprep.subr.bf16.mxu0 %v3408_v37  ;;  %1631 = vmatprep.subr.bf16.mxu1 %v3408_v37  ;;  %v3435_v37 = vld [vmem:[%s4253_s3 + $0xc8] sm:$0xff]  }
  0xb2   :  { %937 = vmatmul.mubr.bf16.gmra.mrb[12].mxu0 %v3842_v17  ;;  %1549 = vmatmul.mubr.bf16.gmra.mrb[12].mxu1 %v3935_v38 }
  0xb3   :  { %946 = vmatprep.mubr.bf16.mxu0 %v3474_v1  ;;  %1117 = vmatpush1.bf16.msra.mxu0 %v3406_v39 }
  0xb4   :  { %1558 = vmatprep.mubr.bf16.mxu1 %v3474_v1  ;;  %1632 = vmatpush1.bf16.msra.mxu1 %v3406_v39 }
  0xb5   :  { %1118 = vmatprep.subr.bf16.mxu0 %v3412_v40  ;;  %1633 = vmatprep.subr.bf16.mxu1 %v3412_v40 }
  0xb7   :  { %1119 = vmatpush1.bf16.msra.mxu0 %v3410_v41 }
  0xb8   :  { %1634 = vmatpush1.bf16.msra.mxu1 %v3410_v41  ;;  %2965 = vmatprep.subr.bf16.mxu0 %v3475_v43 }
  0xb9   :  { %2985 = vmatprep.subr.bf16.mxu1 %v3475_v43 }
  0xba   :  { %947 = vmatmul.mubr.bf16.gmra.mrb[16].mxu0 %v3863_v22  ;;  %1559 = vmatmul.mubr.bf16.gmra.mrb[16].mxu1 %v3409_v42 }
  0xbb   :  { %1136 = vmatprep.mubr.bf16.mxu0 %v3474_v1  ;;  %1651 = vmatprep.mubr.bf16.mxu1 %v3474_v1 }
  0xc2   :  { %1137 = vmatmul.mubr.bf16.vlgmr.msra.gmra.mrb[0].mxu0 %v3872_v23  ;;  %1652 = vmatmul.mubr.bf16.vlgmr.msra.gmra.mrb[0].mxu1 %v3413_v44 }
  0xc3   :  { %1146 = vmatprep.mubr.bf16.mxu0 %v3474_v1  ;;  %1661 = vmatprep.mubr.bf16.mxu1 %v3474_v1 }
  0xc4   :  { %2986 = vmatpush3.bf16.msra.mxu1 %v3418_v45  ;;  %2966 = vmatpush3.bf16.msra.mxu0 %v3419_v46 }
  0xc5   :  { %2987 = vmatprep.subr.bf16.mxu1 %v3475_v43  ;;  %2967 = vmatprep.subr.bf16.mxu0 %v3475_v43 }
  0xc8   :  { %2988 = vmatpush3.bf16.msra.mxu1 %v3420_v47  ;;  %2968 = vmatpush3.bf16.msra.mxu0 %v3421_v48 }
  0xc9   :  { %2989 = vmatprep.subr.bf16.mxu1 %v3475_v43  ;;  %2969 = vmatprep.subr.bf16.mxu0 %v3475_v43 }
  0xca   :  { %1147 = vmatmul.mubr.bf16.gmra.mrb[4].mxu0 %v3893_v28  ;;  %1662 = vmatmul.mubr.bf16.gmra.mrb[4].mxu1 %v3414_v49 }
  0xcb   :  { %1156 = vmatprep.mubr.bf16.mxu0 %v3474_v1  ;;  %1671 = vmatprep.mubr.bf16.mxu1 %v3474_v1 }
  0xcc   :  { %2990 = vmatpush3.bf16.msra.mxu1 %v3422_v50  ;;  %2970 = vmatpush3.bf16.msra.mxu0 %v3423_v51 }
  0xcd   :  { %2991 = vmatprep.subr.bf16.mxu1 %v3475_v43  ;;  %2971 = vmatprep.subr.bf16.mxu0 %v3475_v43 }
  0xd0   :  { %2992 = vmatpush3.bf16.msra.mxu1 %v3424_v52  ;;  %2972 = vmatpush3.bf16.msra.mxu0 %v3425_v53  ;;  %v3436_v52 = vld [vmem:[%s4253_s3 + $0x80] sm:$0xff]   ;;  %v3437_v53 = vld [vmem:[%s4253_s3 + $0xd0] sm:$0xff]  }
  0xd1   :  { %2993 = vmatprep.subr.bf16.mxu1 %v3475_v43  ;;  %2973 = vmatprep.subr.bf16.mxu0 %v3475_v43 }
  0xd2   :  { %1157 = vmatmul.mubr.bf16.gmra.mrb[8].mxu0 %v3914_v33  ;;  %1672 = vmatmul.mubr.bf16.gmra.mrb[8].mxu1 %v3415_v54 }
  0xd3   :  { %1166 = vmatprep.mubr.bf16.mxu0 %v3474_v1  ;;  %1681 = vmatprep.mubr.bf16.mxu1 %v3474_v1 }
  0xd4   :  { %2994 = vmatpush3.bf16.msra.mxu1 %v3426_v55  ;;  %2974 = vmatpush3.bf16.msra.mxu0 %v3428_v59 }
  0xd5   :  { %2995 = vmatprep.subr.bf16.mxu1 %v3475_v43  ;;  %2975 = vmatprep.subr.bf16.mxu0 %v3475_v43 }
  0xd8   :  { %2996 = vmatpush3.bf16.msra.mxu1 %v3427_v58  ;;  %2976 = vmatpush3.bf16.msra.mxu0 %v3430_v60  ;;  %v3439_v60 = vld [vmem:[%s4253_s3 + $0xd8] sm:$0xff]  }
  0xd9   :  { %2997 = vmatprep.subr.bf16.mxu1 %v3475_v43  ;;  %2977 = vmatprep.subr.bf16.mxu0 %v3475_v43 }
  0xda   :  { %1167 = vmatmul.mubr.bf16.gmra.mrb[12].mxu0 %v3935_v38  ;;  %1682 = vmatmul.mubr.bf16.gmra.mrb[12].mxu1 %v3416_v56 }
  0xdb   :  { %1176 = vmatprep.mubr.bf16.mxu0 %v3474_v1  ;;  %1691 = vmatprep.mubr.bf16.mxu1 %v3474_v1  ;;  %v3429_v1 = vld [vmem:[%s4253_s3 + $0x30] sm:$0xff]  }
  0xdc   :  { %2998 = vmatpush3.bf16.msra.mxu1 %v3429_v1  ;;  %2978 = vmatpush3.bf16.msra.mxu0 %v3432_v62  ;;  %v3438_v1 = vld [vmem:[%s4253_s3 + $0x88] sm:$0xff]  }
  0xdd   :  { %2999 = vmatprep.subr.bf16.mxu1 %v3475_v43  ;;  %2979 = vmatprep.subr.bf16.mxu0 %v3475_v43 }
  0xe0   :  { %3000 = vmatpush3.bf16.msra.mxu1 %v3431_v61  ;;  %2980 = vmatpush3.bf16.msra.mxu0 %v3434_v63 }
  0xe1   :  { %3025 = vmatprep.subr.bf16.mxu1 %v3475_v43  ;;  %3005 = vmatprep.subr.bf16.mxu0 %v3475_v43 }
  0xe2   :  { %1177 = vmatmul.mubr.bf16.gmra.mrb[16].mxu0 %v3409_v42  ;;  %1692 = vmatmul.mubr.bf16.gmra.mrb[16].mxu1 %v3417_v57 }
  0xe3   :  { %3001 = vmatprep.mubr.msk.bf16.mxu1 %vm3476_vm0, %v3475_v43  ;;  %2981 = vmatprep.mubr.msk.bf16.mxu0 %vm3476_vm0, %v3475_v43 }
 0x195   :  { %v1138_v0 = vpop.f32.mrb[0].mxu0  ;;  %v1653_v2 = vpop.f32.mrb[0].mxu1 }
 0x196   :  { %v1140_v3 = vpop.f32.mrb[1].mxu0  ;;  %v1655_v4 = vpop.f32.mrb[1].mxu1 }
 0x197   :  { %v1207_v5 = vmax.f32 %v1138_v0, %v1140_v3  ;;  %v1722_v6 = vmax.f32 %v1653_v2, %v1655_v4  ;;  %v1142_v7 = vpop.f32.mrb[2].mxu0  ;;  %v1657_v8 = vpop.f32.mrb[2].mxu1 }
 0x198   :  { %v1144_v10 = vpop.f32.mrb[3].mxu0  ;;  %v1659_v11 = vpop.f32.mrb[3].mxu1 }
 0x199   :  { %v1732_v12 = vmax.f32 %v1207_v5, %v1722_v6  ;;  %v1208_v13 = vmax.f32 %v1142_v7, %v1144_v10  ;;  %v1723_v14 = vmax.f32 %v1657_v8, %v1659_v11 }
 0x19b   :  { %v1749_v15 = vadd.f32 %v4056_v9, %v1732_v12  ;;  %v1733_v16 = vmax.f32 %v1208_v13, %v1723_v14  ;;  %v3440_v12 = vld [vmem:[%s4253_s3 + $0x90] sm:$0xff]   ;;  %v3441_v13 = vld [vmem:[%s4253_s3 + $0xe0] sm:$0xff]  }
 0x19d   :  { %v1750_v17 = vadd.f32 %v4056_v9, %v1733_v16  ;;  %v1148_v18 = vpop.f32.mrb[4].mxu0  ;;  %v1663_v19 = vpop.f32.mrb[4].mxu1  ;;  %v1759_v22 = vmax.f32 %v1749_v15, 0.0 }
 0x19e   :  { %v1150_v20 = vpop.f32.mrb[5].mxu0  ;;  %v1665_v21 = vpop.f32.mrb[5].mxu1 }
 0x19f   :  { %v1760_v23 = vmax.f32 %v1750_v17, 0.0  ;;  %v1209_v24 = vmax.f32 %v1148_v18, %v1150_v20  ;;  %v1724_v25 = vmax.f32 %v1663_v19, %v1665_v21  ;;  %v1152_v26 = vpop.f32.mrb[6].mxu0  ;;  %v1667_v27 = vpop.f32.mrb[6].mxu1  ;;  %v3442_v20 = vld [vmem:[%s4253_s3 + $0x98] sm:$0xff]   ;;  %v3443_v21 = vld [vmem:[%s4253_s3 + $0xe8] sm:$0xff]  }
 0x1a0   :  { %v1154_v28 = vpop.f32.mrb[7].mxu0  ;;  %v1669_v29 = vpop.f32.mrb[7].mxu1 }
 0x1a1   :  { %v1769_v31 = vpack.c.bf16 %v1760_v23, %v1759_v22  ;;  %v1734_v32 = vmax.f32 %v1209_v24, %v1724_v25  ;;  %v1210_v33 = vmax.f32 %v1152_v26, %v1154_v28  ;;  %v1725_v34 = vmax.f32 %v1667_v27, %v1669_v29 }
 0x1a3   :  { %v1751_v35 = vadd.f32 %v4056_v9, %v1734_v32  ;;  %v1735_v36 = vmax.f32 %v1210_v33, %v1725_v34  ;;  %3002 = vmatmul.mubr.bf16.vlgmr.msra.gmra.mrb[20].mxu1 %v1769_v31 }
 0x1a4   :  { %3026 = vmatpush3.bf16.msra.mxu1 %v3433_v30  ;;  %3041 = vmatprep.mubr.msk.bf16.mxu1 %vm3476_vm0, %v3475_v43 }
 0x1a5   :  { %v1752_v38 = vadd.f32 %v4056_v9, %v1735_v36  ;;  %v1158_v39 = vpop.f32.mrb[8].mxu0  ;;  %v1673_v40 = vpop.f32.mrb[8].mxu1  ;;  %3027 = vmatprep.subr.bf16.mxu1 %v3475_v43  ;;  %v1761_v44 = vmax.f32 %v1751_v35, 0.0  ;;  %v3444_v35 = vld [vmem:[%s4253_s3 + $0xa0] sm:$0xff]   ;;  %v3445_v36 = vld [vmem:[%s4253_s3 + $0xf0] sm:$0xff]  }
 0x1a6   :  { %v1160_v41 = vpop.f32.mrb[9].mxu0  ;;  %v1675_v42 = vpop.f32.mrb[9].mxu1 }
 0x1a7   :  { %v1762_v45 = vmax.f32 %v1752_v38, 0.0  ;;  %v1211_v46 = vmax.f32 %v1158_v39, %v1160_v41  ;;  %v1726_v47 = vmax.f32 %v1673_v40, %v1675_v42  ;;  %v1162_v48 = vpop.f32.mrb[10].mxu0  ;;  %v1677_v49 = vpop.f32.mrb[10].mxu1 }
 0x1a8   :  { %3028 = vmatpush3.bf16.msra.mxu1 %v3435_v37  ;;  %v1164_v50 = vpop.f32.mrb[11].mxu0  ;;  %v1679_v51 = vpop.f32.mrb[11].mxu1 }
 0x1a9   :  { %v1770_v54 = vpack.c.bf16 %v1762_v45, %v1761_v44  ;;  %v1736_v55 = vmax.f32 %v1211_v46, %v1726_v47  ;;  %v1212_v56 = vmax.f32 %v1162_v48, %v1164_v50  ;;  %v1727_v57 = vmax.f32 %v1677_v49, %v1679_v51  ;;  %3029 = vmatprep.subr.bf16.mxu1 %v3475_v43  ;;  %v3446_v44 = vld [vmem:[%s4253_s3 + $0xa8] sm:$0xff]   ;;  %v3447_v45 = vld [vmem:[%s4253_s3 + $0xf8] sm:$0xff]   ;;  %v3448_v49 = vld [vmem:[%s4253_s3 + $0xb0] sm:$0xff]  }
 0x1aa   :  { %v3450_v51 = vld [vmem:[%s4253_s3 + $0x100] sm:$0xff]  }
 0x1ab   :  { %v1753_v58 = vadd.f32 %v4056_v9, %v1736_v55  ;;  %v1737_v59 = vmax.f32 %v1212_v56, %v1727_v57  ;;  %2982 = vmatmul.mubr.bf16.vlgmr.msra.gmra.mrb[20].mxu0 %v1770_v54  ;;  %v3453_v54 = vld [vmem:[%s4253_s3 + $0x118] sm:$0xff]   ;;  %v3454_v55 = vld [vmem:[%s4253_s3 + $0x120] sm:$0xff]   ;;  %v3455_v56 = vld [vmem:[%s4253_s3 + $0x128] sm:$0xff]  }
 0x1ac   :  { %3006 = vmatpush3.bf16.msra.mxu0 %v3436_v52  ;;  %3030 = vmatpush3.bf16.msra.mxu1 %v3437_v53  ;;  %v3451_v52 = vld [vmem:[%s4253_s3 + $0x108] sm:$0xff]   ;;  %v3452_v53 = vld [vmem:[%s4253_s3 + $0x110] sm:$0xff]  }
 0x1ad   :  { %v1754_v61 = vadd.f32 %v4056_v9, %v1737_v59  ;;  %v1168_v62 = vpop.f32.mrb[12].mxu0  ;;  %v1683_v63 = vpop.f32.mrb[12].mxu1  ;;  %3007 = vmatprep.subr.bf16.mxu0 %v3475_v43  ;;  %3031 = vmatprep.subr.bf16.mxu1 %v3475_v43  ;;  %v1763_v3 = vmax.f32 %v1753_v58, 0.0  ;;  %v3456_v57 = vld [vmem:[%s4253_s3 + $0x130] sm:$0xff]   ;;  %v3457_v58 = vld [vmem:[%s4253_s3 + $0x138] sm:$0xff]   ;;  %v3458_v59 = vld [vmem:[%s4255_s5] sm:$0xff]  }
 0x1ae   :  { %v1170_v0 = vpop.f32.mrb[13].mxu0  ;;  %v1685_v2 = vpop.f32.mrb[13].mxu1  ;;  %3021 = vmatprep.mubr.msk.bf16.mxu0 %vm3476_vm0, %v3475_v43 }
 0x1af   :  { %v1764_v4 = vmax.f32 %v1754_v61, 0.0  ;;  %v1213_v5 = vmax.f32 %v1168_v62, %v1170_v0  ;;  %v1728_v6 = vmax.f32 %v1683_v63, %v1685_v2  ;;  %v1172_v7 = vpop.f32.mrb[14].mxu0  ;;  %v1687_v8 = vpop.f32.mrb[14].mxu1  ;;  %v3461_v61 = vld [vmem:[%s4255_s5 + $0x18] sm:$0xff]   ;;  %v3462_v62 = vld [vmem:[%s4255_s5 + $0x20] sm:$0xff]   ;;  %v3463_v63 = vld [vmem:[%s4255_s5 + $0x28] sm:$0xff]  }
 0x1b0   :  { %3008 = vmatpush3.bf16.msra.mxu0 %v3438_v1  ;;  %3032 = vmatpush3.bf16.msra.mxu1 %v3439_v60  ;;  %v1174_v10 = vpop.f32.mrb[15].mxu0  ;;  %v1689_v11 = vpop.f32.mrb[15].mxu1  ;;  %v3459_v1 = vld [vmem:[%s4255_s5 + $0x8] sm:$0xff]   ;;  %v3460_v60 = vld [vmem:[%s4255_s5 + $0x10] sm:$0xff]   ;;  %v3465_v2 = vld [vmem:[%s4255_s5 + $0x38] sm:$0xff]  }
 0x1b1   :  { %v1771_v14 = vpack.c.bf16 %v1764_v4, %v1763_v3  ;;  %v1738_v15 = vmax.f32 %v1213_v5, %v1728_v6  ;;  %v1214_v16 = vmax.f32 %v1172_v7, %v1174_v10  ;;  %v1729_v17 = vmax.f32 %v1687_v8, %v1689_v11  ;;  %3009 = vmatprep.subr.bf16.mxu0 %v3475_v43  ;;  %v3464_v0 = vld [vmem:[%s4255_s5 + $0x30] sm:$0xff]   ;;  %v3466_v3 = vld [vmem:[%s4256_s7] sm:$0xff]   ;;  %v3467_v4 = vld [vmem:[%s4256_s7 + $0x8] sm:$0xff]  }
 0x1b2   :  { %3033 = vmatprep.subr.bf16.mxu1 %v3475_v43  ;;  %v3468_v5 = vld [vmem:[%s4256_s7 + $0x10] sm:$0xff]   ;;  %v3469_v6 = vld [vmem:[%s4256_s7 + $0x18] sm:$0xff]   ;;  %v3470_v7 = vld [vmem:[%s4256_s7 + $0x20] sm:$0xff]  }
 0x1b3   :  { %v1755_v18 = vadd.f32 %v4056_v9, %v1738_v15  ;;  %v1739_v19 = vmax.f32 %v1214_v16, %v1729_v17  ;;  %v3471_v8 = vld [vmem:[%s4256_s7 + $0x28] sm:$0xff]  }
 0x1b4   :  { %3010 = vmatpush3.bf16.msra.mxu0 %v3440_v12  ;;  %3034 = vmatpush3.bf16.msra.mxu1 %v3441_v13 }
 0x1b5   :  { %v1756_v22 = vadd.f32 %v4056_v9, %v1739_v19  ;;  %v1178_v23 = vpop.f32.mrb[16].mxu0  ;;  %v1693_v24 = vpop.f32.mrb[16].mxu1  ;;  %3011 = vmatprep.subr.bf16.mxu0 %v3475_v43  ;;  %3035 = vmatprep.subr.bf16.mxu1 %v3475_v43  ;;  %v1765_v27 = vmax.f32 %v1755_v18, 0.0 }
 0x1b6   :  { %v1180_v25 = vpop.f32.mrb[17].mxu0  ;;  %v1695_v26 = vpop.f32.mrb[17].mxu1 }
 0x1b7   :  { %v1766_v28 = vmax.f32 %v1756_v22, 0.0  ;;  %v1215_v29 = vmax.f32 %v1178_v23, %v1180_v25  ;;  %v1730_v30 = vmax.f32 %v1693_v24, %v1695_v26  ;;  %v1182_v31 = vpop.f32.mrb[18].mxu0  ;;  %v1697_v32 = vpop.f32.mrb[18].mxu1 }
 0x1b8   :  { %3012 = vmatpush3.bf16.msra.mxu0 %v3442_v20  ;;  %3036 = vmatpush3.bf16.msra.mxu1 %v3443_v21  ;;  %v1184_v33 = vpop.f32.mrb[19].mxu0  ;;  %v1699_v34 = vpop.f32.mrb[19].mxu1 }
 0x1b9   :  { %v1772_v37 = vpack.c.bf16 %v1766_v28, %v1765_v27  ;;  %v1740_v38 = vmax.f32 %v1215_v29, %v1730_v30  ;;  %v1216_v39 = vmax.f32 %v1182_v31, %v1184_v33  ;;  %v1731_v40 = vmax.f32 %v1697_v32, %v1699_v34  ;;  %3013 = vmatprep.subr.bf16.mxu0 %v3475_v43  ;;  %v2883_v33 = vld [vmem:[%s4257_s4] ss:$0 sm:$0xff] }
 0x1ba   :  { %3037 = vmatprep.subr.bf16.mxu1 %v3475_v43 }
 0x1bb   :  { %v1757_v41 = vadd.f32 %v4056_v9, %v1740_v38  ;;  %v1741_v42 = vmax.f32 %v1216_v39, %v1731_v40 }
 0x1bc   :  { %3014 = vmatpush3.bf16.msra.mxu0 %v3444_v35  ;;  %3038 = vmatpush3.bf16.msra.mxu1 %v3445_v36 }
 0x1bd   :  { %v1758_v46 = vadd.f32 %v4056_v9, %v1741_v42  ;;  %3015 = vmatprep.subr.bf16.mxu0 %v3475_v43  ;;  %3039 = vmatprep.subr.bf16.mxu1 %v3475_v43  ;;  %v1767_v47 = vmax.f32 %v1757_v41, 0.0  ;;  %v3449_v9 = vld [vmem:[%s4253_s3 + $0xb8] sm:$0xff]  }
 0x1bf   :  { %v1768_v48 = vmax.f32 %v1758_v46, 0.0  ;;  %v3473_v46 = vld [vmem:[%s4256_s7 + $0x38] sm:$0xff]  }
 0x1c0   :  { %3016 = vmatpush3.bf16.msra.mxu0 %v3446_v44  ;;  %3040 = vmatpush3.bf16.msra.mxu1 %v3447_v45  ;;  %v3472_v45 = vld [vmem:[%s4256_s7 + $0x30] sm:$0xff]  }
 0x1c1   :  { %v1773_v50 = vpack.c.bf16 %v1768_v48, %v1767_v47  ;;  %3017 = vmatprep.subr.bf16.mxu0 %v3475_v43  ;;  %3065 = vmatprep.subr.bf16.mxu1 %v3475_v43  ;;  %v2884_v47 = vld [vmem:[%s4258_s6] ss:$0 sm:$0xff] }
 0x1c3   :  { %3042 = vmatmul.mubr.bf16.vlgmr.msra.gmra.mrb[24].mxu1 %v1772_v37 }
 0x1c4   :  { %3018 = vmatpush3.bf16.msra.mxu0 %v3448_v49  ;;  %3081 = vmatprep.mubr.msk.bf16.mxu1 %vm3476_vm0, %v3475_v43 }
 0x1c5   :  { %3019 = vmatprep.subr.bf16.mxu0 %v3475_v43  ;;  %3066 = vmatpush3.bf16.msra.mxu1 %v3458_v59 }
 0x1c6   :  { %3067 = vmatprep.subr.bf16.mxu1 %v3475_v43 }
 0x1c8   :  { %3020 = vmatpush3.bf16.msra.mxu0 %v3449_v9 }
 0x1c9   :  { %3045 = vmatprep.subr.bf16.mxu0 %v3475_v43  ;;  %3068 = vmatpush3.bf16.msra.mxu1 %v3459_v1 }
 0x1ca   :  { %3069 = vmatprep.subr.bf16.mxu1 %v3475_v43 }
 0x1cb   :  { %3022 = vmatmul.mubr.bf16.vlgmr.msra.gmra.mrb[24].mxu0 %v1771_v14 }
 0x1cc   :  { %3046 = vmatpush3.bf16.msra.mxu0 %v3450_v51  ;;  %3061 = vmatprep.mubr.msk.bf16.mxu0 %vm3476_vm0, %v3475_v43 }
 0x1cd   :  { %3047 = vmatprep.subr.bf16.mxu0 %v3475_v43  ;;  %3070 = vmatpush3.bf16.msra.mxu1 %v3460_v60 }
 0x1ce   :  { %3071 = vmatprep.subr.bf16.mxu1 %v3475_v43 }
 0x1d0   :  { %3048 = vmatpush3.bf16.msra.mxu0 %v3451_v52 }
 0x1d1   :  { %3049 = vmatprep.subr.bf16.mxu0 %v3475_v43  ;;  %3072 = vmatpush3.bf16.msra.mxu1 %v3461_v61 }
 0x1d2   :  { %3073 = vmatprep.subr.bf16.mxu1 %v3475_v43 }
 0x1d4   :  { %3050 = vmatpush3.bf16.msra.mxu0 %v3452_v53 }
 0x1d5   :  { %3051 = vmatprep.subr.bf16.mxu0 %v3475_v43  ;;  %3074 = vmatpush3.bf16.msra.mxu1 %v3462_v62 }
 0x1d6   :  { %3075 = vmatprep.subr.bf16.mxu1 %v3475_v43 }
 0x1d8   :  { %3052 = vmatpush3.bf16.msra.mxu0 %v3453_v54 }
 0x1d9   :  { %3053 = vmatprep.subr.bf16.mxu0 %v3475_v43  ;;  %3076 = vmatpush3.bf16.msra.mxu1 %v3463_v63 }
 0x1da   :  { %3077 = vmatprep.subr.bf16.mxu1 %v3475_v43 }
 0x1dc   :  { %3054 = vmatpush3.bf16.msra.mxu0 %v3454_v55 }
 0x1dd   :  { %3055 = vmatprep.subr.bf16.mxu0 %v3475_v43  ;;  %3078 = vmatpush3.bf16.msra.mxu1 %v3464_v0 }
 0x1de   :  { %3079 = vmatprep.subr.bf16.mxu1 %v3475_v43 }
 0x1e0   :  { %3056 = vmatpush3.bf16.msra.mxu0 %v3455_v56 }
 0x1e1   :  { %3057 = vmatprep.subr.bf16.mxu0 %v3475_v43  ;;  %3080 = vmatpush3.bf16.msra.mxu1 %v3465_v2 }
 0x1e4   :  { %3058 = vmatpush3.bf16.msra.mxu0 %v3456_v57 }
 0x1e5   :  { %3059 = vmatprep.subr.bf16.mxu0 %v3475_v43 }
 0x1e8   :  { %3060 = vmatpush3.bf16.msra.mxu0 %v3457_v58 }
 0x1e9   :  { %3085 = vmatprep.subr.bf16.mxu0 %v3475_v43 }
 0x1eb   :  { %3062 = vmatmul.mubr.bf16.vlgmr.msra.gmra.mrb[28].mxu0 %v1773_v50 }
 0x1ec   :  { %3101 = vmatprep.mubr.msk.bf16.mxu0 %vm3476_vm0, %v3475_v43  ;;  %3086 = vmatpush3.bf16.msra.mxu0 %v3466_v3 }
 0x1ed   :  { %3087 = vmatprep.subr.bf16.mxu0 %v3475_v43 }
 0x1f0   :  { %3088 = vmatpush3.bf16.msra.mxu0 %v3467_v4 }
 0x1f1   :  { %3089 = vmatprep.subr.bf16.mxu0 %v3475_v43 }
 0x1f4   :  { %3090 = vmatpush3.bf16.msra.mxu0 %v3468_v5 }
 0x1f5   :  { %3091 = vmatprep.subr.bf16.mxu0 %v3475_v43 }
 0x1f8   :  { %3092 = vmatpush3.bf16.msra.mxu0 %v3469_v6 }
 0x1f9   :  { %3093 = vmatprep.subr.bf16.mxu0 %v3475_v43 }
 0x1fc   :  { %3094 = vmatpush3.bf16.msra.mxu0 %v3470_v7 }
 0x1fd   :  { %3095 = vmatprep.subr.bf16.mxu0 %v3475_v43 }
 0x200   :  { %3096 = vmatpush3.bf16.msra.mxu0 %v3471_v8 }
 0x201   :  { %3097 = vmatprep.subr.bf16.mxu0 %v3475_v43 }
 0x204   :  { %3098 = vmatpush3.bf16.msra.mxu0 %v3472_v45 }
 0x205   :  { %3099 = vmatprep.subr.bf16.mxu0 %v3475_v43  ;;  %v2893_v43 = vld [vmem:[%s4259_s8] ss:$0 sm:$0xff] }
 0x208   :  { %3100 = vmatpush3.bf16.msra.mxu0 %v3473_v46 }
 0x276   :  { %v1978_v10 = vpop.f32.mrb[20].mxu1 }
 0x277   :  { %v3003_v11 = vpop.f32.mrb[21].mxu1 }
 0x278   :  { %v1981_v12 = vpop.f32.mrb[22].mxu1 }
 0x279   :  { %v3004_v13 = vpop.f32.mrb[23].mxu1 }
 0x27e   :  { %v1889_v14 = vpop.f32.mrb[20].mxu0 }
 0x27f   :  { %v1979_v15 = vadd.f32 %v1978_v10, %v1889_v14  ;;  %v2983_v16 = vpop.f32.mrb[21].mxu0 }
 0x280   :  { %v1892_v17 = vpop.f32.mrb[22].mxu0 }
 0x281   :  { %v1982_v18 = vadd.f32 %v1981_v12, %v1892_v17  ;;  %v2984_v19 = vpop.f32.mrb[23].mxu0 }
 0x296   :  { %v2192_v20 = vpop.f32.mrb[24].mxu1 }
 0x297   :  { %v3043_v21 = vpop.f32.mrb[25].mxu1 }
 0x298   :  { %v2195_v22 = vpop.f32.mrb[26].mxu1 }
 0x299   :  { %v3044_v23 = vpop.f32.mrb[27].mxu1 }
 0x29e   :  { %v2084_v24 = vpop.f32.mrb[24].mxu0 }
 0x29f   :  { %v2091_v25 = vadd.f32 %v2084_v24, %v1979_v15  ;;  %v3023_v26 = vpop.f32.mrb[25].mxu0 }
 0x2a0   :  { %v2087_v27 = vpop.f32.mrb[26].mxu0 }
 0x2a1   :  { %v2092_v28 = vadd.f32 %v2087_v27, %v1982_v18  ;;  %v3024_v29 = vpop.f32.mrb[27].mxu0  ;;  %v2199_v30 = vadd.f32 %v2192_v20, %v2091_v25 }
 0x2a3   :  { %v2200_v31 = vadd.f32 %v2195_v22, %v2092_v28 }
 0x2be   :  { %v2300_v32 = vpop.f32.mrb[28].mxu0 }
 0x2bf   :  { %v2307_v34 = vadd.f32 %v2300_v32, %v2199_v30  ;;  %v3063_v35 = vpop.f32.mrb[29].mxu0 }
 0x2c0   :  { %v2303_v36 = vpop.f32.mrb[30].mxu0 }
 0x2c1   :  { %v2316_v37 = vadd.f32 %v2883_v33, %v2307_v34  ;;  %v2308_v38 = vadd.f32 %v2303_v36, %v2200_v31  ;;  %v3064_v39 = vpop.f32.mrb[31].mxu0 }
 0x2c3   :  { %v2317_v40 = vadd.f32 %v2883_v33, %v2308_v38  ;;  %v2318_v41 = vmax.f32 %v2316_v37, 0.0 }
 0x2c5   :  { %v2319_v42 = vmax.f32 %v2317_v40, 0.0 }
 0x2c7   :  { %v2320_v44 = vpack.c.bf16 %v2319_v42, %v2318_v41 }
 0x2c9   :  { %3082 = vmatmul.mubr.bf16.vlgmr.msra.gmra.mrb[28].mxu1 %v2320_v44 }
 0x39c   :  { %v2426_v48 = vpop.f32.mrb[28].mxu1 }
 0x39d   :  { %v2427_v49 = vadd.f32 %v2884_v47, %v2426_v48  ;;  %v3083_v50 = vpop.f32.mrb[29].mxu1 }
 0x39e   :  { %v2429_v9 = vpop.f32.mrb[30].mxu1 }
 0x39f   :  { %v2430_v51 = vadd.f32 %v2884_v47, %v2429_v9  ;;  %v3084_v52 = vpop.f32.mrb[31].mxu1  ;;  %v2433_v53 = vmax.f32 %v2427_v49, 0.0 }
 0x3a1   :  { %v2434_v54 = vmax.f32 %v2430_v51, 0.0 }
 0x3a3   :  { %v2435_v55 = vpack.c.bf16 %v2434_v54, %v2433_v53 }
 0x3a5   :  { %3102 = vmatmul.mubr.bf16.vlgmr.msra.gmra.mrb[32].mxu0 %v2435_v55 }
 0x478   :  { %v2541_v56 = vpop.f32.mrb[32].mxu0 }
 0x479   :  { %v2542_v57 = vadd.f32 %v2893_v43, %v2541_v56  ;;  %v3103_v58 = vpop.f32.mrb[33].mxu0 }
 0x47a   :  { %v2544_v59 = vpop.f32.mrb[34].mxu0 }
 0x47b   :  { %2548 = vst [vmem:[%s4260_s9] sm:$0xff] %v2542_v57  ;;  %v2545_v1 = vadd.f32 %v2893_v43, %v2544_v59  ;;  %v3104_v60 = vpop.f32.mrb[35].mxu0 }
 0x47d   :  { %2549 = vst [vmem:[%s4260_s9 + $0x8] sm:$0xff] %v2545_v1 }

// kernel: basicnet_forward.2
= control target key start
LH: loop header
LB: loop body
LE: loop exit
PB: predicated region body
PF: predicated region fallthrough
CT: control target
= control target key end

     0   :  { %v5461_v1 = vmov 0   ;;  %s6579_s1 = inlined_call_operand.vmem [shape: bf16[5,128,256], index: 1, kind: input, shape index: {}]   ;;  %s6580_s0 = inlined_call_operand.vmem [shape: bf16[4,8,16,128], index: 0, kind: input, shape index: {}]   ;;  %s6581_s2 = inlined_call_operand.vmem [shape: f32[1,128], index: 2, kind: input, shape index: {}]   ;;  %s6582_s3 = inlined_call_operand.vmem [shape: bf16[2,7,16,128], index: 3, kind: output, shape index: {}]  }
   0x1   :  { %v5167_v0 = vld [vmem:[%s6579_s1 + $0x84] ss:$8 sps:$4 sm:$0xff]   ;;  %322 = vmatprep.mubr.bf16.mxu0 %v5461_v1  ;;  %1474 = vmatprep.mubr.bf16.mxu1 %v5461_v1  ;;  %v5169_v2 = vld [vmem:[%s6579_s1 + $0x80] ss:$8 sps:$4 sm:$0xff]   ;;  %v5170_v3 = vld [vmem:[%s6579_s1 + $0x94] ss:$8 sps:$4 sm:$0xff]  }
   0x2   :  { %290 = vmatprep.subr.bf16.mxu0 %v5167_v0  ;;  %1442 = vmatprep.subr.bf16.mxu1 %v5167_v0  ;;  %v5172_v4 = vld [vmem:[%s6579_s1 + $0x90] ss:$8 sps:$4 sm:$0xff]   ;;  %v5173_v5 = vld [vmem:[%s6579_s1 + $0xa4] ss:$8 sps:$4 sm:$0xff]   ;;  %v5175_v6 = vld [vmem:[%s6579_s1 + $0xa0] ss:$8 sps:$4 sm:$0xff]  }
   0x3   :  { %291 = vmatpush1.bf16.msra.mxu0 %v5169_v2  ;;  %1443 = vmatpush1.bf16.msra.mxu1 %v5169_v2  ;;  %v5176_v7 = vld [vmem:[%s6579_s1 + $0xb4] ss:$8 sps:$4 sm:$0xff]   ;;  %v5178_v8 = vld [vmem:[%s6579_s1 + $0xb0] ss:$8 sps:$4 sm:$0xff]   ;;  %v5179_v9 = vld [vmem:[%s6579_s1 + $0xc4] ss:$8 sps:$4 sm:$0xff]  }
   0x4   :  { %292 = vmatprep.subr.bf16.mxu0 %v5170_v3  ;;  %1444 = vmatprep.subr.bf16.mxu1 %v5170_v3  ;;  %v5181_v10 = vld [vmem:[%s6579_s1 + $0xc0] ss:$8 sps:$4 sm:$0xff]   ;;  %v5182_v11 = vld [vmem:[%s6579_s1 + $0xd4] ss:$8 sps:$4 sm:$0xff]   ;;  %v5184_v12 = vld [vmem:[%s6579_s1 + $0xd0] ss:$8 sps:$4 sm:$0xff]  }
   0x5   :  { %v5185_v13 = vld [vmem:[%s6579_s1 + $0xe4] ss:$8 sps:$4 sm:$0xff]   ;;  %v5187_v14 = vld [vmem:[%s6579_s1 + $0xe0] ss:$8 sps:$4 sm:$0xff]   ;;  %v5188_v15 = vld [vmem:[%s6579_s1 + $0xf4] ss:$8 sps:$4 sm:$0xff]  }
   0x6   :  { %v5190_v16 = vld [vmem:[%s6579_s1 + $0xf0] ss:$8 sps:$4 sm:$0xff]   ;;  %v5194_v17 = vld [vmem:[%s6579_s1 + $0x4] ss:$8 sps:$4 sm:$0xff]   ;;  %v5192_v20 = vld [vmem:[%s6579_s1] ss:$8 sps:$4 sm:$0xff]  }
   0x7   :  { %293 = vmatpush1.bf16.msra.mxu0 %v5172_v4  ;;  %1445 = vmatpush1.bf16.msra.mxu1 %v5172_v4  ;;  %v5538_v18 = vld [vmem:[%s6580_s0 + $0x40] sm:$0xff]   ;;  %v5198_v21 = vld [vmem:[%s6579_s1 + $0x14] ss:$8 sps:$4 sm:$0xff]   ;;  %v5196_v22 = vld [vmem:[%s6579_s1 + $0x10] ss:$8 sps:$4 sm:$0xff]  }
   0x8   :  { %294 = vmatprep.subr.bf16.mxu0 %v5173_v5  ;;  %1446 = vmatprep.subr.bf16.mxu1 %v5173_v5  ;;  %v5543_v19 = vld [vmem:[%s6580_s0 + $0x80] sm:$0xff]   ;;  %v5564_v24 = vld [vmem:[%s6580_s0 + $0x48] sm:$0xff]   ;;  %v5208_v27 = vld [vmem:[%s6579_s1 + $0x34] ss:$8 sps:$4 sm:$0xff]  }
   0x9   :  { %v5203_v23 = vld [vmem:[%s6579_s1 + $0x24] ss:$8 sps:$4 sm:$0xff]   ;;  %v5201_v26 = vld [vmem:[%s6579_s1 + $0x20] ss:$8 sps:$4 sm:$0xff]   ;;  %v5206_v28 = vld [vmem:[%s6579_s1 + $0x30] ss:$8 sps:$4 sm:$0xff]  }
   0xa   :  { %v5569_v25 = vld [vmem:[%s6580_s0 + $0x88] sm:$0xff]   ;;  %v5590_v30 = vld [vmem:[%s6580_s0 + $0x50] sm:$0xff]   ;;  %v5610_v34 = vld [vmem:[%s6580_s0 + $0x58] sm:$0xff]  }
   0xb   :  { %295 = vmatpush1.bf16.msra.mxu0 %v5175_v6  ;;  %1447 = vmatpush1.bf16.msra.mxu1 %v5175_v6  ;;  %v5213_v29 = vld [vmem:[%s6579_s1 + $0x44] ss:$8 sps:$4 sm:$0xff]   ;;  %v5595_v31 = vld [vmem:[%s6580_s0 + $0x90] sm:$0xff]   ;;  %v5211_v32 = vld [vmem:[%s6579_s1 + $0x40] ss:$8 sps:$4 sm:$0xff]  }
   0xc   :  { %296 = vmatprep.subr.bf16.mxu0 %v5176_v7  ;;  %1448 = vmatprep.subr.bf16.mxu1 %v5176_v7  ;;  %v5218_v33 = vld [vmem:[%s6579_s1 + $0x54] ss:$8 sps:$4 sm:$0xff]   ;;  %v5216_v35 = vld [vmem:[%s6579_s1 + $0x50] ss:$8 sps:$4 sm:$0xff]   ;;  %v5223_v36 = vld [vmem:[%s6579_s1 + $0x64] ss:$8 sps:$4 sm:$0xff]  }
   0xd   :  { %v5621_v37 = vld [vmem:[%s6580_s0 + $0x98] sm:$0xff]   ;;  %v5221_v38 = vld [vmem:[%s6579_s1 + $0x60] ss:$8 sps:$4 sm:$0xff]   ;;  %v5232_v42 = vld [vmem:[%s6579_s1 + $0x104] ss:$8 sps:$4 sm:$0xff]  }
   0xe   :  { %v5228_v39 = vld [vmem:[%s6579_s1 + $0x74] ss:$8 sps:$4 sm:$0xff]   ;;  %v5636_v40 = vld [vmem:[%s6580_s0 + $0x60] sm:$0xff]   ;;  %v5226_v41 = vld [vmem:[%s6579_s1 + $0x70] ss:$8 sps:$4 sm:$0xff]  }
   0xf   :  { %297 = vmatpush1.bf16.msra.mxu0 %v5178_v8  ;;  %1449 = vmatpush1.bf16.msra.mxu1 %v5178_v8  ;;  %v5647_v43 = vld [vmem:[%s6580_s0 + $0xa0] sm:$0xff]   ;;  %v5656_v44 = vld [vmem:[%s6580_s0 + $0x68] sm:$0xff]   ;;  %v5670_v46 = vld [vmem:[%s6580_s0 + $0x70] sm:$0xff]  }
  0x10   :  { %298 = vmatprep.subr.bf16.mxu0 %v5179_v9  ;;  %1450 = vmatprep.subr.bf16.mxu1 %v5179_v9  ;;  %v5661_v45 = vld [vmem:[%s6580_s0 + $0xa8] sm:$0xff]   ;;  %v5675_v47 = vld [vmem:[%s6580_s0 + $0xb0] sm:$0xff]   ;;  %v5229_v48 = vld [vmem:[%s6580_s0] sm:$0xff]  }
  0x11   :  { %v5230_v49 = vld [vmem:[%s6579_s1 + $0x100] ss:$8 sps:$4 sm:$0xff]   ;;  %v5235_v50 = vld [vmem:[%s6579_s1 + $0x114] ss:$8 sps:$4 sm:$0xff]   ;;  %v5233_v51 = vld [vmem:[%s6579_s1 + $0x110] ss:$8 sps:$4 sm:$0xff]  }
  0x12   :  { %v5239_v52 = vld [vmem:[%s6579_s1 + $0x124] ss:$8 sps:$4 sm:$0xff]   ;;  %v5237_v54 = vld [vmem:[%s6579_s1 + $0x120] ss:$8 sps:$4 sm:$0xff]   ;;  %v5243_v55 = vld [vmem:[%s6579_s1 + $0x134] ss:$8 sps:$4 sm:$0xff]  }
  0x13   :  { %299 = vmatpush1.bf16.msra.mxu0 %v5181_v10  ;;  %1451 = vmatpush1.bf16.msra.mxu1 %v5181_v10  ;;  %v5236_v53 = vld [vmem:[%s6580_s0 + $0x8] sm:$0xff]   ;;  %v5241_v56 = vld [vmem:[%s6579_s1 + $0x130] ss:$8 sps:$4 sm:$0xff]   ;;  %v5251_v60 = vld [vmem:[%s6579_s1 + $0x154] ss:$8 sps:$4 sm:$0xff]  }
  0x14   :  { %300 = vmatprep.subr.bf16.mxu0 %v5182_v11  ;;  %1452 = vmatprep.subr.bf16.mxu1 %v5182_v11  ;;  %v5247_v57 = vld [vmem:[%s6579_s1 + $0x144] ss:$8 sps:$4 sm:$0xff]   ;;  %v5240_v58 = vld [vmem:[%s6580_s0 + $0x10] sm:$0xff]   ;;  %v5245_v59 = vld [vmem:[%s6579_s1 + $0x140] ss:$8 sps:$4 sm:$0xff]  }
  0x15   :  { %v5249_v61 = vld [vmem:[%s6579_s1 + $0x150] ss:$8 sps:$4 sm:$0xff]   ;;  %v5255_v62 = vld [vmem:[%s6579_s1 + $0x164] ss:$8 sps:$4 sm:$0xff]   ;;  %v5253_v0 = vld [vmem:[%s6579_s1 + $0x160] ss:$8 sps:$4 sm:$0xff]  }
  0x16   :  { %v5244_v63 = vld [vmem:[%s6580_s0 + $0x18] sm:$0xff]   ;;  %v5262_v4 = vld [vmem:[%s6579_s1 + $0x184] ss:$8 sps:$4 sm:$0xff]   ;;  %v5256_v7 = vld [vmem:[%s6580_s0 + $0x30] sm:$0xff]  }
  0x17   :  { %301 = vmatpush1.bf16.msra.mxu0 %v5184_v12  ;;  %1453 = vmatpush1.bf16.msra.mxu1 %v5184_v12  ;;  %v5259_v2 = vld [vmem:[%s6579_s1 + $0x174] ss:$8 sps:$4 sm:$0xff]   ;;  %v5257_v3 = vld [vmem:[%s6579_s1 + $0x170] ss:$8 sps:$4 sm:$0xff]   ;;  %v5248_v5 = vld [vmem:[%s6580_s0 + $0x20] sm:$0xff]  }
  0x18   :  { %302 = vmatprep.subr.bf16.mxu0 %v5185_v13  ;;  %1454 = vmatprep.subr.bf16.mxu1 %v5185_v13  ;;  %v5252_v6 = vld [vmem:[%s6580_s0 + $0x28] sm:$0xff]   ;;  %v5774_v8 = vld [vmem:[%s6580_s0 + $0xc0] sm:$0xff]   ;;  %v5266_v10 = vld [vmem:[%s6579_s1 + $0x194] ss:$8 sps:$4 sm:$0xff]  }
  0x19   :  { %v5260_v9 = vld [vmem:[%s6579_s1 + $0x180] ss:$8 sps:$4 sm:$0xff]   ;;  %v5264_v11 = vld [vmem:[%s6579_s1 + $0x190] ss:$8 sps:$4 sm:$0xff]   ;;  %v5270_v12 = vld [vmem:[%s6579_s1 + $0x1a4] ss:$8 sps:$4 sm:$0xff]  }
  0x1a   :  { %v5795_v13 = vld [vmem:[%s6580_s0 + $0xc8] sm:$0xff]  }
  0x1b   :  { %303 = vmatpush1.bf16.msra.mxu0 %v5187_v14  ;;  %1455 = vmatpush1.bf16.msra.mxu1 %v5187_v14  ;;  %v5268_v14 = vld [vmem:[%s6579_s1 + $0x1a0] ss:$8 sps:$4 sm:$0xff]  }
  0x1c   :  { %304 = vmatprep.subr.bf16.mxu0 %v5188_v15  ;;  %1456 = vmatprep.subr.bf16.mxu1 %v5188_v15  ;;  %v5274_v15 = vld [vmem:[%s6579_s1 + $0x1b4] ss:$8 sps:$4 sm:$0xff]  }
  0x1f   :  { %305 = vmatpush1.bf16.msra.mxu0 %v5190_v16  ;;  %1457 = vmatpush1.bf16.msra.mxu1 %v5190_v16  ;;  %v5272_v16 = vld [vmem:[%s6579_s1 + $0x1b0] ss:$8 sps:$4 sm:$0xff]  }
  0x20   :  { %515 = vmatprep.subr.bf16.mxu0 %v5194_v17  ;;  %1545 = vmatprep.subr.bf16.mxu1 %v5194_v17  ;;  %v5813_v17 = vld [vmem:[%s6579_s1 + $0x1c4] ss:$8 sps:$4 sm:$0xff]  }
  0x22   :  { %323 = vmatmul.mubr.bf16.vlgmr.msra.gmra.mrb[0].mxu0 %v5538_v18  ;;  %1475 = vmatmul.mubr.bf16.vlgmr.msra.gmra.mrb[0].mxu1 %v5543_v19 }
  0x23   :  { %516 = vmatpush1.bf16.msra.mxu0 %v5192_v20  ;;  %1546 = vmatpush1.bf16.msra.mxu1 %v5192_v20  ;;  %v5830_v20 = vld [vmem:[%s6579_s1 + $0x1d4] ss:$8 sps:$4 sm:$0xff]  }
  0x24   :  { %332 = vmatprep.mubr.bf16.mxu0 %v5461_v1  ;;  %517 = vmatprep.subr.bf16.mxu0 %v5198_v21 }
  0x25   :  { %1484 = vmatprep.mubr.bf16.mxu1 %v5461_v1  ;;  %1547 = vmatprep.subr.bf16.mxu1 %v5198_v21  ;;  %v5841_v21 = vld [vmem:[%s6579_s1 + $0x1d0] ss:$8 sps:$4 sm:$0xff]  }
  0x27   :  { %518 = vmatpush1.bf16.msra.mxu0 %v5196_v22  ;;  %1548 = vmatpush1.bf16.msra.mxu1 %v5196_v22  ;;  %v5848_v22 = vld [vmem:[%s6579_s1 + $0x1e4] ss:$8 sps:$4 sm:$0xff]  }
  0x28   :  { %519 = vmatprep.subr.bf16.mxu0 %v5203_v23  ;;  %1549 = vmatprep.subr.bf16.mxu1 %v5203_v23  ;;  %v5853_v23 = vld [vmem:[%s6580_s0 + $0xd8] sm:$0xff]  }
  0x2a   :  { %333 = vmatmul.mubr.bf16.gmra.mrb[4].mxu0 %v5564_v24  ;;  %1485 = vmatmul.mubr.bf16.gmra.mrb[4].mxu1 %v5569_v25 }
  0x2b   :  { %342 = vmatprep.mubr.bf16.mxu0 %v5461_v1  ;;  %520 = vmatpush1.bf16.msra.mxu0 %v5201_v26 }
  0x2c   :  { %1494 = vmatprep.mubr.bf16.mxu1 %v5461_v1  ;;  %1550 = vmatpush1.bf16.msra.mxu1 %v5201_v26  ;;  %v5288_v26 = vld [vmem:[%s6579_s1 + $0x1f0] ss:$8 sps:$4 sm:$0xff]  }
  0x2d   :  { %521 = vmatprep.subr.bf16.mxu0 %v5208_v27  ;;  %1551 = vmatprep.subr.bf16.mxu1 %v5208_v27  ;;  %v5293_v27 = vld [vmem:[%s6579_s1 + $0x204] ss:$8 sps:$4 sm:$0xff]  }
  0x2f   :  { %522 = vmatpush1.bf16.msra.mxu0 %v5206_v28 }
  0x30   :  { %1552 = vmatpush1.bf16.msra.mxu1 %v5206_v28  ;;  %523 = vmatprep.subr.bf16.mxu0 %v5213_v29  ;;  %v5882_v28 = vld [vmem:[%s6580_s0 + $0xe0] sm:$0xff]  }
  0x31   :  { %1553 = vmatprep.subr.bf16.mxu1 %v5213_v29  ;;  %v5891_v29 = vld [vmem:[%s6580_s0 + $0xe8] sm:$0xff]  }
  0x32   :  { %343 = vmatmul.mubr.bf16.gmra.mrb[8].mxu0 %v5590_v30  ;;  %1495 = vmatmul.mubr.bf16.gmra.mrb[8].mxu1 %v5595_v31 }
  0x33   :  { %352 = vmatprep.mubr.bf16.mxu0 %v5461_v1  ;;  %1504 = vmatprep.mubr.bf16.mxu1 %v5461_v1 }
  0x34   :  { %524 = vmatpush1.bf16.msra.mxu0 %v5211_v32  ;;  %1554 = vmatpush1.bf16.msra.mxu1 %v5211_v32  ;;  %v5291_v32 = vld [vmem:[%s6579_s1 + $0x200] ss:$8 sps:$4 sm:$0xff]  }
  0x35   :  { %525 = vmatprep.subr.bf16.mxu0 %v5218_v33  ;;  %1555 = vmatprep.subr.bf16.mxu1 %v5218_v33  ;;  %v5297_v33 = vld [vmem:[%s6579_s1 + $0x214] ss:$8 sps:$4 sm:$0xff]  }
  0x38   :  { %526 = vmatpush1.bf16.msra.mxu0 %v5216_v35  ;;  %1556 = vmatpush1.bf16.msra.mxu1 %v5216_v35  ;;  %v5301_v35 = vld [vmem:[%s6579_s1 + $0x224] ss:$8 sps:$4 sm:$0xff]  }
  0x39   :  { %527 = vmatprep.subr.bf16.mxu0 %v5223_v36  ;;  %1557 = vmatprep.subr.bf16.mxu1 %v5223_v36  ;;  %v5930_v36 = vld [vmem:[%s6580_s0 + $0x10] sm:$0xff]  }
  0x3a   :  { %353 = vmatmul.mubr.bf16.gmra.mrb[12].mxu0 %v5610_v34  ;;  %1505 = vmatmul.mubr.bf16.gmra.mrb[12].mxu1 %v5621_v37 }
  0x3b   :  { %362 = vmatprep.mubr.bf16.mxu0 %v5461_v1  ;;  %1514 = vmatprep.mubr.bf16.mxu1 %v5461_v1 }
  0x3c   :  { %528 = vmatpush1.bf16.msra.mxu0 %v5221_v38  ;;  %1558 = vmatpush1.bf16.msra.mxu1 %v5221_v38  ;;  %v5305_v38 = vld [vmem:[%s6579_s1 + $0x234] ss:$8 sps:$4 sm:$0xff]  }
  0x3d   :  { %529 = vmatprep.subr.bf16.mxu0 %v5228_v39  ;;  %1559 = vmatprep.subr.bf16.mxu1 %v5228_v39  ;;  %v5303_v39 = vld [vmem:[%s6579_s1 + $0x230] ss:$8 sps:$4 sm:$0xff]  }
  0x40   :  { %530 = vmatpush1.bf16.msra.mxu0 %v5226_v41  ;;  %1560 = vmatpush1.bf16.msra.mxu1 %v5226_v41  ;;  %v5951_v41 = vld [vmem:[%s6580_s0 + $0x18] sm:$0xff]  }
  0x41   :  { %757 = vmatprep.subr.bf16.mxu0 %v5232_v42  ;;  %1648 = vmatprep.subr.bf16.mxu1 %v5232_v42  ;;  %v5307_v42 = vld [vmem:[%s6579_s1 + $0x240] ss:$8 sps:$4 sm:$0xff]  }
  0x42   :  { %363 = vmatmul.mubr.bf16.gmra.mrb[16].mxu0 %v5636_v40  ;;  %1515 = vmatmul.mubr.bf16.gmra.mrb[16].mxu1 %v5647_v43 }
  0x43   :  { %372 = vmatprep.mubr.bf16.mxu0 %v5461_v1  ;;  %1524 = vmatprep.mubr.bf16.mxu1 %v5461_v1 }
  0x4a   :  { %373 = vmatmul.mubr.bf16.gmra.mrb[20].mxu0 %v5656_v44  ;;  %1525 = vmatmul.mubr.bf16.gmra.mrb[20].mxu1 %v5661_v45 }
  0x4b   :  { %382 = vmatprep.mubr.bf16.mxu0 %v5461_v1  ;;  %1534 = vmatprep.mubr.bf16.mxu1 %v5461_v1 }
  0x52   :  { %383 = vmatmul.mubr.bf16.gmra.mrb[24].mxu0 %v5670_v46  ;;  %1535 = vmatmul.mubr.bf16.gmra.mrb[24].mxu1 %v5675_v47 }
  0x53   :  { %547 = vmatprep.mubr.bf16.mxu0 %v5461_v1  ;;  %1577 = vmatprep.mubr.bf16.mxu1 %v5461_v1 }
  0x5a   :  { %548 = vmatmul.mubr.bf16.vlgmr.msra.gmra.mrb[0].mxu0 %v5229_v48  ;;  %1578 = vmatmul.mubr.bf16.vlgmr.msra.gmra.mrb[0].mxu1 %v5538_v18  ;;  %v5818_v18 = vld [vmem:[%s6580_s0 + $0xd0] sm:$0xff]  }
  0x5b   :  { %758 = vmatpush1.bf16.msra.mxu0 %v5230_v49  ;;  %1649 = vmatpush1.bf16.msra.mxu1 %v5230_v49  ;;  %v5321_v48 = vld [vmem:[%s6579_s1 + $0x274] ss:$8 sps:$4 sm:$0xff]   ;;  %v5319_v49 = vld [vmem:[%s6579_s1 + $0x270] ss:$8 sps:$4 sm:$0xff]  }
  0x5c   :  { %557 = vmatprep.mubr.bf16.mxu0 %v5461_v1  ;;  %759 = vmatprep.subr.bf16.mxu0 %v5235_v50 }
  0x5d   :  { %1587 = vmatprep.mubr.bf16.mxu1 %v5461_v1  ;;  %1650 = vmatprep.subr.bf16.mxu1 %v5235_v50  ;;  %v5325_v50 = vld [vmem:[%s6579_s1 + $0x84] ss:$8 sps:$4 sm:$0xff]  }
  0x5f   :  { %760 = vmatpush1.bf16.msra.mxu0 %v5233_v51  ;;  %1651 = vmatpush1.bf16.msra.mxu1 %v5233_v51  ;;  %v5993_v51 = vld [vmem:[%s6580_s0 + $0x28] sm:$0xff]  }
  0x60   :  { %761 = vmatprep.subr.bf16.mxu0 %v5239_v52  ;;  %1652 = vmatprep.subr.bf16.mxu1 %v5239_v52  ;;  %v6002_v52 = vld [vmem:[%s6580_s0 + $0x30] sm:$0xff]  }
  0x62   :  { %558 = vmatmul.mubr.bf16.gmra.mrb[4].mxu0 %v5236_v53  ;;  %1588 = vmatmul.mubr.bf16.gmra.mrb[4].mxu1 %v5564_v24  ;;  %v5860_v24 = vld [vmem:[%s6579_s1 + $0x1e0] ss:$8 sps:$4 sm:$0xff]   ;;  %v6011_v53 = vld [vmem:[%s6580_s0 + $0x38] sm:$0xff]  }
  0x63   :  { %567 = vmatprep.mubr.bf16.mxu0 %v5461_v1  ;;  %762 = vmatpush1.bf16.msra.mxu0 %v5237_v54 }
  0x64   :  { %1597 = vmatprep.mubr.bf16.mxu1 %v5461_v1  ;;  %1653 = vmatpush1.bf16.msra.mxu1 %v5237_v54  ;;  %v6020_v54 = vld [vmem:[%s6580_s0 + $0x48] sm:$0xff]  }
  0x65   :  { %763 = vmatprep.subr.bf16.mxu0 %v5243_v55  ;;  %1654 = vmatprep.subr.bf16.mxu1 %v5243_v55  ;;  %v5323_v55 = vld [vmem:[%s6579_s1 + $0x80] ss:$8 sps:$4 sm:$0xff]  }
  0x67   :  { %764 = vmatpush1.bf16.msra.mxu0 %v5241_v56 }
  0x68   :  { %1655 = vmatpush1.bf16.msra.mxu1 %v5241_v56  ;;  %765 = vmatprep.subr.bf16.mxu0 %v5247_v57  ;;  %v5328_v56 = vld [vmem:[%s6579_s1 + $0x94] ss:$8 sps:$4 sm:$0xff]  }
  0x69   :  { %1656 = vmatprep.subr.bf16.mxu1 %v5247_v57  ;;  %v5326_v57 = vld [vmem:[%s6579_s1 + $0x90] ss:$8 sps:$4 sm:$0xff]  }
  0x6a   :  { %568 = vmatmul.mubr.bf16.gmra.mrb[8].mxu0 %v5240_v58  ;;  %1598 = vmatmul.mubr.bf16.gmra.mrb[8].mxu1 %v5590_v30  ;;  %v5900_v30 = vld [vmem:[%s6580_s0 + $0xf0] sm:$0xff]   ;;  %v5332_v58 = vld [vmem:[%s6579_s1 + $0xa4] ss:$8 sps:$4 sm:$0xff]  }
  0x6b   :  { %577 = vmatprep.mubr.bf16.mxu0 %v5461_v1  ;;  %1607 = vmatprep.mubr.bf16.mxu1 %v5461_v1 }
  0x6c   :  { %766 = vmatpush1.bf16.msra.mxu0 %v5245_v59  ;;  %1657 = vmatpush1.bf16.msra.mxu1 %v5245_v59  ;;  %v6041_v59 = vld [vmem:[%s6580_s0 + $0x50] sm:$0xff]  }
  0x6d   :  { %767 = vmatprep.subr.bf16.mxu0 %v5251_v60  ;;  %1658 = vmatprep.subr.bf16.mxu1 %v5251_v60  ;;  %v5330_v60 = vld [vmem:[%s6579_s1 + $0xa0] ss:$8 sps:$4 sm:$0xff]  }
  0x70   :  { %768 = vmatpush1.bf16.msra.mxu0 %v5249_v61  ;;  %1659 = vmatpush1.bf16.msra.mxu1 %v5249_v61  ;;  %v5336_v61 = vld [vmem:[%s6579_s1 + $0xb4] ss:$8 sps:$4 sm:$0xff]  }
  0x71   :  { %769 = vmatprep.subr.bf16.mxu0 %v5255_v62  ;;  %1660 = vmatprep.subr.bf16.mxu1 %v5255_v62  ;;  %v5334_v62 = vld [vmem:[%s6579_s1 + $0xb0] ss:$8 sps:$4 sm:$0xff]  }
  0x72   :  { %578 = vmatmul.mubr.bf16.gmra.mrb[12].mxu0 %v5244_v63  ;;  %1608 = vmatmul.mubr.bf16.gmra.mrb[12].mxu1 %v5610_v34  ;;  %v5295_v34 = vld [vmem:[%s6579_s1 + $0x210] ss:$8 sps:$4 sm:$0xff]   ;;  %v5340_v63 = vld [vmem:[%s6579_s1 + $0xc4] ss:$8 sps:$4 sm:$0xff]  }
  0x73   :  { %587 = vmatprep.mubr.bf16.mxu0 %v5461_v1  ;;  %1617 = vmatprep.mubr.bf16.mxu1 %v5461_v1 }
  0x74   :  { %770 = vmatpush1.bf16.msra.mxu0 %v5253_v0  ;;  %1661 = vmatpush1.bf16.msra.mxu1 %v5253_v0  ;;  %v6062_v0 = vld [vmem:[%s6580_s0 + $0x58] sm:$0xff]  }
  0x75   :  { %771 = vmatprep.subr.bf16.mxu0 %v5259_v2  ;;  %1662 = vmatprep.subr.bf16.mxu1 %v5259_v2  ;;  %v5338_v2 = vld [vmem:[%s6579_s1 + $0xc0] ss:$8 sps:$4 sm:$0xff]  }
  0x78   :  { %772 = vmatpush1.bf16.msra.mxu0 %v5257_v3  ;;  %1663 = vmatpush1.bf16.msra.mxu1 %v5257_v3  ;;  %v5344_v3 = vld [vmem:[%s6579_s1 + $0xd4] ss:$8 sps:$4 sm:$0xff]  }
  0x79   :  { %1027 = vmatprep.subr.bf16.mxu0 %v5262_v4  ;;  %1779 = vmatprep.subr.bf16.mxu1 %v5262_v4  ;;  %v5342_v4 = vld [vmem:[%s6579_s1 + $0xd0] ss:$8 sps:$4 sm:$0xff]  }
  0x7a   :  { %588 = vmatmul.mubr.bf16.gmra.mrb[16].mxu0 %v5248_v5  ;;  %1618 = vmatmul.mubr.bf16.gmra.mrb[16].mxu1 %v5636_v40  ;;  %v5309_v40 = vld [vmem:[%s6579_s1 + $0x244] ss:$8 sps:$4 sm:$0xff]  }
  0x7b   :  { %597 = vmatprep.mubr.bf16.mxu0 %v5461_v1  ;;  %1627 = vmatprep.mubr.bf16.mxu1 %v5461_v1  ;;  %v5348_v5 = vld [vmem:[%s6579_s1 + $0xe4] ss:$8 sps:$4 sm:$0xff]  }
  0x82   :  { %598 = vmatmul.mubr.bf16.gmra.mrb[20].mxu0 %v5252_v6  ;;  %1628 = vmatmul.mubr.bf16.gmra.mrb[20].mxu1 %v5656_v44  ;;  %v5311_v44 = vld [vmem:[%s6579_s1 + $0x250] ss:$8 sps:$4 sm:$0xff]   ;;  %v6083_v6 = vld [vmem:[%s6580_s0 + $0x60] sm:$0xff]  }
  0x83   :  { %607 = vmatprep.mubr.bf16.mxu0 %v5461_v1  ;;  %1637 = vmatprep.mubr.bf16.mxu1 %v5461_v1 }
  0x8a   :  { %608 = vmatmul.mubr.bf16.gmra.mrb[24].mxu0 %v5256_v7  ;;  %1638 = vmatmul.mubr.bf16.gmra.mrb[24].mxu1 %v5670_v46  ;;  %v5972_v46 = vld [vmem:[%s6580_s0 + $0x20] sm:$0xff]  }
  0x8b   :  { %789 = vmatprep.mubr.bf16.mxu0 %v5461_v1  ;;  %1680 = vmatprep.mubr.bf16.mxu1 %v5461_v1  ;;  %v5346_v7 = vld [vmem:[%s6579_s1 + $0xe0] ss:$8 sps:$4 sm:$0xff]  }
  0x92   :  { %790 = vmatmul.mubr.bf16.vlgmr.msra.gmra.mrb[0].mxu0 %v5543_v19  ;;  %1681 = vmatmul.mubr.bf16.vlgmr.msra.gmra.mrb[0].mxu1 %v5774_v8  ;;  %v5823_v19 = vld [vmem:[%s6579_s1 + $0x1c0] ss:$8 sps:$4 sm:$0xff]  }
  0x93   :  { %1028 = vmatpush1.bf16.msra.mxu0 %v5260_v9  ;;  %1780 = vmatpush1.bf16.msra.mxu1 %v5260_v9  ;;  %v5352_v9 = vld [vmem:[%s6579_s1 + $0xf4] ss:$8 sps:$4 sm:$0xff]  }
  0x94   :  { %799 = vmatprep.mubr.bf16.mxu0 %v5461_v1  ;;  %1029 = vmatprep.subr.bf16.mxu0 %v5266_v10 }
  0x95   :  { %1690 = vmatprep.mubr.bf16.mxu1 %v5461_v1  ;;  %1781 = vmatprep.subr.bf16.mxu1 %v5266_v10  ;;  %v5350_v10 = vld [vmem:[%s6579_s1 + $0xf0] ss:$8 sps:$4 sm:$0xff]  }
  0x97   :  { %1030 = vmatpush1.bf16.msra.mxu0 %v5264_v11  ;;  %1782 = vmatpush1.bf16.msra.mxu1 %v5264_v11  ;;  %v5355_v11 = vld [vmem:[%s6579_s1 + $0x4] ss:$8 sps:$4 sm:$0xff]  }
  0x98   :  { %1031 = vmatprep.subr.bf16.mxu0 %v5270_v12  ;;  %1783 = vmatprep.subr.bf16.mxu1 %v5270_v12  ;;  %v6104_v12 = vld [vmem:[%s6580_s0 + $0x68] sm:$0xff]  }
  0x9a   :  { %800 = vmatmul.mubr.bf16.gmra.mrb[4].mxu0 %v5569_v25  ;;  %1691 = vmatmul.mubr.bf16.gmra.mrb[4].mxu1 %v5795_v13  ;;  %v5290_v25 = vld [vmem:[%s6579_s1 + $0x1f4] ss:$8 sps:$4 sm:$0xff]  }
  0x9b   :  { %809 = vmatprep.mubr.bf16.mxu0 %v5461_v1  ;;  %1032 = vmatpush1.bf16.msra.mxu0 %v5268_v14 }
  0x9c   :  { %1700 = vmatprep.mubr.bf16.mxu1 %v5461_v1  ;;  %1784 = vmatpush1.bf16.msra.mxu1 %v5268_v14  ;;  %v6113_v14 = vld [vmem:[%s6580_s0 + $0x70] sm:$0xff]  }
  0x9d   :  { %1033 = vmatprep.subr.bf16.mxu0 %v5274_v15  ;;  %1785 = vmatprep.subr.bf16.mxu1 %v5274_v15  ;;  %v6122_v15 = vld [vmem:[%s6580_s0 + $0x78] sm:$0xff]  }
  0x9f   :  { %1034 = vmatpush1.bf16.msra.mxu0 %v5272_v16 }
  0xa0   :  { %1786 = vmatpush1.bf16.msra.mxu1 %v5272_v16  ;;  %1035 = vmatprep.subr.bf16.mxu0 %v5813_v17  ;;  %v5353_v16 = vld [vmem:[%s6579_s1] ss:$8 sps:$4 sm:$0xff]  }
  0xa1   :  { %1787 = vmatprep.subr.bf16.mxu1 %v5813_v17 }
  0xa2   :  { %810 = vmatmul.mubr.bf16.gmra.mrb[8].mxu0 %v5595_v31  ;;  %1701 = vmatmul.mubr.bf16.gmra.mrb[8].mxu1 %v5818_v18  ;;  %v5909_v31 = vld [vmem:[%s6580_s0 + $0x8] sm:$0xff]  }
  0xa3   :  { %819 = vmatprep.mubr.bf16.mxu0 %v5461_v1  ;;  %1710 = vmatprep.mubr.bf16.mxu1 %v5461_v1 }
  0xa4   :  { %1036 = vmatpush1.bf16.msra.mxu0 %v5823_v19  ;;  %1788 = vmatpush1.bf16.msra.mxu1 %v5823_v19 }
  0xa5   :  { %1037 = vmatprep.subr.bf16.mxu0 %v5830_v20  ;;  %1789 = vmatprep.subr.bf16.mxu1 %v5830_v20 }
  0xa8   :  { %1038 = vmatpush1.bf16.msra.mxu0 %v5841_v21  ;;  %1790 = vmatpush1.bf16.msra.mxu1 %v5841_v21 }
  0xa9   :  { %1039 = vmatprep.subr.bf16.mxu0 %v5848_v22  ;;  %1791 = vmatprep.subr.bf16.mxu1 %v5848_v22 }
  0xaa   :  { %820 = vmatmul.mubr.bf16.gmra.mrb[12].mxu0 %v5621_v37  ;;  %1711 = vmatmul.mubr.bf16.gmra.mrb[12].mxu1 %v5853_v23  ;;  %v5299_v37 = vld [vmem:[%s6579_s1 + $0x220] ss:$8 sps:$4 sm:$0xff]  }
  0xab   :  { %829 = vmatprep.mubr.bf16.mxu0 %v5461_v1  ;;  %1720 = vmatprep.mubr.bf16.mxu1 %v5461_v1 }
  0xac   :  { %1040 = vmatpush1.bf16.msra.mxu0 %v5860_v24  ;;  %1792 = vmatpush1.bf16.msra.mxu1 %v5860_v24 }
  0xad   :  { %1041 = vmatprep.subr.bf16.mxu0 %v5290_v25  ;;  %1793 = vmatprep.subr.bf16.mxu1 %v5290_v25  ;;  %v5358_v25 = vld [vmem:[%s6579_s1 + $0x14] ss:$8 sps:$4 sm:$0xff]  }
  0xb0   :  { %1042 = vmatpush1.bf16.msra.mxu0 %v5288_v26  ;;  %1794 = vmatpush1.bf16.msra.mxu1 %v5288_v26  ;;  %v5356_v26 = vld [vmem:[%s6579_s1 + $0x10] ss:$8 sps:$4 sm:$0xff]  }
  0xb1   :  { %1297 = vmatprep.subr.bf16.mxu0 %v5293_v27  ;;  %1952 = vmatprep.subr.bf16.mxu1 %v5293_v27  ;;  %v5361_v27 = vld [vmem:[%s6579_s1 + $0x24] ss:$8 sps:$4 sm:$0xff]  }
  0xb2   :  { %830 = vmatmul.mubr.bf16.gmra.mrb[16].mxu0 %v5647_v43  ;;  %1721 = vmatmul.mubr.bf16.gmra.mrb[16].mxu1 %v5882_v28  ;;  %v5313_v43 = vld [vmem:[%s6579_s1 + $0x254] ss:$8 sps:$4 sm:$0xff]  }
  0xb3   :  { %839 = vmatprep.mubr.bf16.mxu0 %v5461_v1  ;;  %1730 = vmatprep.mubr.bf16.mxu1 %v5461_v1 }
  0xba   :  { %840 = vmatmul.mubr.bf16.gmra.mrb[20].mxu0 %v5661_v45  ;;  %1731 = vmatmul.mubr.bf16.gmra.mrb[20].mxu1 %v5891_v29  ;;  %v5317_v45 = vld [vmem:[%s6579_s1 + $0x264] ss:$8 sps:$4 sm:$0xff]  }
  0xbb   :  { %849 = vmatprep.mubr.bf16.mxu0 %v5461_v1  ;;  %1740 = vmatprep.mubr.bf16.mxu1 %v5461_v1 }
  0xc2   :  { %850 = vmatmul.mubr.bf16.gmra.mrb[24].mxu0 %v5675_v47  ;;  %1741 = vmatmul.mubr.bf16.gmra.mrb[24].mxu1 %v5900_v30  ;;  %v5315_v47 = vld [vmem:[%s6579_s1 + $0x260] ss:$8 sps:$4 sm:$0xff]  }
  0xc3   :  { %1059 = vmatprep.mubr.bf16.mxu0 %v5461_v1  ;;  %1811 = vmatprep.mubr.bf16.mxu1 %v5461_v1 }
  0xca   :  { %1060 = vmatmul.mubr.bf16.vlgmr.msra.gmra.mrb[0].mxu0 %v5774_v8  ;;  %1812 = vmatmul.mubr.bf16.vlgmr.msra.gmra.mrb[0].mxu1 %v5909_v31 }
  0xcb   :  { %1298 = vmatpush1.bf16.msra.mxu0 %v5291_v32  ;;  %1953 = vmatpush1.bf16.msra.mxu1 %v5291_v32  ;;  %v5359_v32 = vld [vmem:[%s6579_s1 + $0x20] ss:$8 sps:$4 sm:$0xff]  }
  0xcc   :  { %1069 = vmatprep.mubr.bf16.mxu0 %v5461_v1  ;;  %1299 = vmatprep.subr.bf16.mxu0 %v5297_v33 }
  0xcd   :  { %1821 = vmatprep.mubr.bf16.mxu1 %v5461_v1  ;;  %1954 = vmatprep.subr.bf16.mxu1 %v5297_v33  ;;  %v5364_v33 = vld [vmem:[%s6579_s1 + $0x34] ss:$8 sps:$4 sm:$0xff]  }
  0xcf   :  { %1300 = vmatpush1.bf16.msra.mxu0 %v5295_v34  ;;  %1955 = vmatpush1.bf16.msra.mxu1 %v5295_v34  ;;  %v5362_v34 = vld [vmem:[%s6579_s1 + $0x30] ss:$8 sps:$4 sm:$0xff]  }
  0xd0   :  { %1301 = vmatprep.subr.bf16.mxu0 %v5301_v35  ;;  %1956 = vmatprep.subr.bf16.mxu1 %v5301_v35  ;;  %v5367_v35 = vld [vmem:[%s6579_s1 + $0x44] ss:$8 sps:$4 sm:$0xff]  }
  0xd2   :  { %1070 = vmatmul.mubr.bf16.gmra.mrb[4].mxu0 %v5795_v13  ;;  %1822 = vmatmul.mubr.bf16.gmra.mrb[4].mxu1 %v5930_v36 }
  0xd3   :  { %1079 = vmatprep.mubr.bf16.mxu0 %v5461_v1  ;;  %1302 = vmatpush1.bf16.msra.mxu0 %v5299_v37 }
  0xd4   :  { %1831 = vmatprep.mubr.bf16.mxu1 %v5461_v1  ;;  %1957 = vmatpush1.bf16.msra.mxu1 %v5299_v37  ;;  %v5365_v37 = vld [vmem:[%s6579_s1 + $0x40] ss:$8 sps:$4 sm:$0xff]  }
  0xd5   :  { %1303 = vmatprep.subr.bf16.mxu0 %v5305_v38  ;;  %1958 = vmatprep.subr.bf16.mxu1 %v5305_v38  ;;  %v5370_v38 = vld [vmem:[%s6579_s1 + $0x54] ss:$8 sps:$4 sm:$0xff]  }
  0xd7   :  { %1304 = vmatpush1.bf16.msra.mxu0 %v5303_v39 }
  0xd8   :  { %1959 = vmatpush1.bf16.msra.mxu1 %v5303_v39  ;;  %1305 = vmatprep.subr.bf16.mxu0 %v5309_v40  ;;  %v5368_v39 = vld [vmem:[%s6579_s1 + $0x50] ss:$8 sps:$4 sm:$0xff]  }
  0xd9   :  { %1960 = vmatprep.subr.bf16.mxu1 %v5309_v40  ;;  %v5373_v40 = vld [vmem:[%s6579_s1 + $0x64] ss:$8 sps:$4 sm:$0xff]  }
  0xda   :  { %1080 = vmatmul.mubr.bf16.gmra.mrb[8].mxu0 %v5818_v18  ;;  %1832 = vmatmul.mubr.bf16.gmra.mrb[8].mxu1 %v5951_v41 }
  0xdb   :  { %1089 = vmatprep.mubr.bf16.mxu0 %v5461_v1  ;;  %1841 = vmatprep.mubr.bf16.mxu1 %v5461_v1 }
  0xdc   :  { %1306 = vmatpush1.bf16.msra.mxu0 %v5307_v42  ;;  %1961 = vmatpush1.bf16.msra.mxu1 %v5307_v42  ;;  %v5371_v42 = vld [vmem:[%s6579_s1 + $0x60] ss:$8 sps:$4 sm:$0xff]  }
  0xdd   :  { %1307 = vmatprep.subr.bf16.mxu0 %v5313_v43  ;;  %1962 = vmatprep.subr.bf16.mxu1 %v5313_v43  ;;  %v5376_v43 = vld [vmem:[%s6579_s1 + $0x74] ss:$8 sps:$4 sm:$0xff]  }
  0xe0   :  { %1308 = vmatpush1.bf16.msra.mxu0 %v5311_v44  ;;  %1963 = vmatpush1.bf16.msra.mxu1 %v5311_v44  ;;  %v5374_v44 = vld [vmem:[%s6579_s1 + $0x70] ss:$8 sps:$4 sm:$0xff]  }
  0xe1   :  { %1309 = vmatprep.subr.bf16.mxu0 %v5317_v45  ;;  %1964 = vmatprep.subr.bf16.mxu1 %v5317_v45  ;;  %v5379_v45 = vld [vmem:[%s6579_s1 + $0x104] ss:$8 sps:$4 sm:$0xff]  }
  0xe2   :  { %1090 = vmatmul.mubr.bf16.gmra.mrb[12].mxu0 %v5853_v23  ;;  %1842 = vmatmul.mubr.bf16.gmra.mrb[12].mxu1 %v5972_v46 }
  0xe3   :  { %1099 = vmatprep.mubr.bf16.mxu0 %v5461_v1  ;;  %1851 = vmatprep.mubr.bf16.mxu1 %v5461_v1 }
  0xe4   :  { %1310 = vmatpush1.bf16.msra.mxu0 %v5315_v47  ;;  %1965 = vmatpush1.bf16.msra.mxu1 %v5315_v47  ;;  %v5377_v47 = vld [vmem:[%s6579_s1 + $0x100] ss:$8 sps:$4 sm:$0xff]  }
  0xe5   :  { %1311 = vmatprep.subr.bf16.mxu0 %v5321_v48  ;;  %1966 = vmatprep.subr.bf16.mxu1 %v5321_v48  ;;  %v5382_v48 = vld [vmem:[%s6579_s1 + $0x114] ss:$8 sps:$4 sm:$0xff]  }
  0xe8   :  { %1312 = vmatpush1.bf16.msra.mxu0 %v5319_v49  ;;  %1967 = vmatpush1.bf16.msra.mxu1 %v5319_v49  ;;  %v5454_v49 = vld [vmem:[%s6580_s0 + $0x80] sm:$0xff]  }
  0xe9   :  { %2327 = vmatprep.subr.bf16.mxu0 %v5325_v50  ;;  %3350 = vmatprep.subr.bf16.mxu1 %v5325_v50  ;;  %v5380_v50 = vld [vmem:[%s6579_s1 + $0x110] ss:$8 sps:$4 sm:$0xff]  }
  0xea   :  { %1100 = vmatmul.mubr.bf16.gmra.mrb[16].mxu0 %v5882_v28  ;;  %1852 = vmatmul.mubr.bf16.gmra.mrb[16].mxu1 %v5993_v51 }
  0xeb   :  { %1109 = vmatprep.mubr.bf16.mxu0 %v5461_v1  ;;  %1861 = vmatprep.mubr.bf16.mxu1 %v5461_v1 }
  0xf2   :  { %1110 = vmatmul.mubr.bf16.gmra.mrb[20].mxu0 %v5891_v29  ;;  %1862 = vmatmul.mubr.bf16.gmra.mrb[20].mxu1 %v6002_v52 }
  0xf3   :  { %1119 = vmatprep.mubr.bf16.mxu0 %v5461_v1  ;;  %1871 = vmatprep.mubr.bf16.mxu1 %v5461_v1 }
  0xfa   :  { %1120 = vmatmul.mubr.bf16.gmra.mrb[24].mxu0 %v5900_v30  ;;  %1872 = vmatmul.mubr.bf16.gmra.mrb[24].mxu1 %v6011_v53 }
  0xfb   :  { %1329 = vmatprep.mubr.bf16.mxu0 %v5461_v1  ;;  %1984 = vmatprep.mubr.bf16.mxu1 %v5461_v1 }
 0x102   :  { %1330 = vmatmul.mubr.bf16.vlgmr.msra.gmra.mrb[0].mxu0 %v5909_v31  ;;  %1985 = vmatmul.mubr.bf16.vlgmr.msra.gmra.mrb[0].mxu1 %v6020_v54 }
 0x103   :  { %2328 = vmatpush1.bf16.msra.mxu0 %v5323_v55  ;;  %3351 = vmatpush1.bf16.msra.mxu1 %v5323_v55  ;;  %v5385_v55 = vld [vmem:[%s6579_s1 + $0x124] ss:$8 sps:$4 sm:$0xff]  }
 0x104   :  { %1339 = vmatprep.mubr.bf16.mxu0 %v5461_v1  ;;  %1994 = vmatprep.mubr.bf16.mxu1 %v5461_v1 }
 0x105   :  { %2329 = vmatprep.subr.bf16.mxu0 %v5328_v56  ;;  %3352 = vmatprep.subr.bf16.mxu1 %v5328_v56  ;;  %v5388_v56 = vld [vmem:[%s6579_s1 + $0x134] ss:$8 sps:$4 sm:$0xff]  }
 0x107   :  { %2330 = vmatpush1.bf16.msra.mxu0 %v5326_v57  ;;  %3353 = vmatpush1.bf16.msra.mxu1 %v5326_v57  ;;  %v5455_v57 = vld [vmem:[%s6580_s0 + $0x88] sm:$0xff]  }
 0x108   :  { %2331 = vmatprep.subr.bf16.mxu0 %v5332_v58  ;;  %3354 = vmatprep.subr.bf16.mxu1 %v5332_v58  ;;  %v5386_v58 = vld [vmem:[%s6579_s1 + $0x130] ss:$8 sps:$4 sm:$0xff]  }
 0x10a   :  { %1340 = vmatmul.mubr.bf16.gmra.mrb[4].mxu0 %v5930_v36  ;;  %1995 = vmatmul.mubr.bf16.gmra.mrb[4].mxu1 %v6041_v59 }
 0x10b   :  { %1349 = vmatprep.mubr.bf16.mxu0 %v5461_v1  ;;  %2004 = vmatprep.mubr.bf16.mxu1 %v5461_v1 }
 0x10c   :  { %2332 = vmatpush1.bf16.msra.mxu0 %v5330_v60  ;;  %3355 = vmatpush1.bf16.msra.mxu1 %v5330_v60  ;;  %v5391_v60 = vld [vmem:[%s6579_s1 + $0x144] ss:$8 sps:$4 sm:$0xff]  }
 0x10d   :  { %2333 = vmatprep.subr.bf16.mxu0 %v5336_v61  ;;  %3356 = vmatprep.subr.bf16.mxu1 %v5336_v61  ;;  %v5394_v61 = vld [vmem:[%s6579_s1 + $0x154] ss:$8 sps:$4 sm:$0xff]  }
 0x110   :  { %2334 = vmatpush1.bf16.msra.mxu0 %v5334_v62  ;;  %3357 = vmatpush1.bf16.msra.mxu1 %v5334_v62  ;;  %v5456_v62 = vld [vmem:[%s6580_s0 + $0x90] sm:$0xff]  }
 0x111   :  { %2335 = vmatprep.subr.bf16.mxu0 %v5340_v63  ;;  %3358 = vmatprep.subr.bf16.mxu1 %v5340_v63  ;;  %v5392_v63 = vld [vmem:[%s6579_s1 + $0x150] ss:$8 sps:$4 sm:$0xff]  }
 0x112   :  { %1350 = vmatmul.mubr.bf16.gmra.mrb[8].mxu0 %v5951_v41  ;;  %2005 = vmatmul.mubr.bf16.gmra.mrb[8].mxu1 %v6062_v0 }
 0x113   :  { %1359 = vmatprep.mubr.bf16.mxu0 %v5461_v1  ;;  %2014 = vmatprep.mubr.bf16.mxu1 %v5461_v1 }
 0x114   :  { %2336 = vmatpush1.bf16.msra.mxu0 %v5338_v2  ;;  %3359 = vmatpush1.bf16.msra.mxu1 %v5338_v2  ;;  %v5397_v2 = vld [vmem:[%s6579_s1 + $0x164] ss:$8 sps:$4 sm:$0xff]  }
 0x115   :  { %2337 = vmatprep.subr.bf16.mxu0 %v5344_v3  ;;  %3360 = vmatprep.subr.bf16.mxu1 %v5344_v3  ;;  %v5400_v3 = vld [vmem:[%s6579_s1 + $0x174] ss:$8 sps:$4 sm:$0xff]  }
 0x118   :  { %2338 = vmatpush1.bf16.msra.mxu0 %v5342_v4  ;;  %3361 = vmatpush1.bf16.msra.mxu1 %v5342_v4  ;;  %v5457_v4 = vld [vmem:[%s6580_s0 + $0x98] sm:$0xff]  }
 0x119   :  { %2339 = vmatprep.subr.bf16.mxu0 %v5348_v5  ;;  %3362 = vmatprep.subr.bf16.mxu1 %v5348_v5  ;;  %v5398_v5 = vld [vmem:[%s6579_s1 + $0x170] ss:$8 sps:$4 sm:$0xff]  }
 0x11a   :  { %1360 = vmatmul.mubr.bf16.gmra.mrb[12].mxu0 %v5972_v46  ;;  %2015 = vmatmul.mubr.bf16.gmra.mrb[12].mxu1 %v6083_v6 }
 0x11b   :  { %1369 = vmatprep.mubr.bf16.mxu0 %v5461_v1  ;;  %2024 = vmatprep.mubr.bf16.mxu1 %v5461_v1 }
 0x11c   :  { %2340 = vmatpush1.bf16.msra.mxu0 %v5346_v7  ;;  %3363 = vmatpush1.bf16.msra.mxu1 %v5346_v7  ;;  %v5403_v7 = vld [vmem:[%s6579_s1 + $0x184] ss:$8 sps:$4 sm:$0xff]  }
 0x11d   :  { %2341 = vmatprep.subr.bf16.mxu0 %v5352_v9  ;;  %3364 = vmatprep.subr.bf16.mxu1 %v5352_v9  ;;  %v5459_v9 = vld [vmem:[%s6580_s0 + $0xa8] sm:$0xff]  }
 0x120   :  { %2342 = vmatpush1.bf16.msra.mxu0 %v5350_v10  ;;  %3365 = vmatpush1.bf16.msra.mxu1 %v5350_v10  ;;  %v5460_v10 = vld [vmem:[%s6580_s0 + $0xb0] sm:$0xff]  }
 0x121   :  { %2510 = vmatprep.subr.bf16.mxu0 %v5355_v11  ;;  %3453 = vmatprep.subr.bf16.mxu1 %v5355_v11  ;;  %v5409_v11 = vld [vmem:[%s6579_s1 + $0x1a4] ss:$8 sps:$4 sm:$0xff]  }
 0x122   :  { %1370 = vmatmul.mubr.bf16.gmra.mrb[16].mxu0 %v5993_v51  ;;  %2025 = vmatmul.mubr.bf16.gmra.mrb[16].mxu1 %v6104_v12 }
 0x123   :  { %1379 = vmatprep.mubr.bf16.mxu0 %v5461_v1  ;;  %2034 = vmatprep.mubr.bf16.mxu1 %v5461_v1 }
 0x12a   :  { %1380 = vmatmul.mubr.bf16.gmra.mrb[20].mxu0 %v6002_v52  ;;  %2035 = vmatmul.mubr.bf16.gmra.mrb[20].mxu1 %v6113_v14 }
 0x12b   :  { %1389 = vmatprep.mubr.bf16.mxu0 %v5461_v1  ;;  %2044 = vmatprep.mubr.bf16.mxu1 %v5461_v1 }
 0x132   :  { %1390 = vmatmul.mubr.bf16.gmra.mrb[24].mxu0 %v6011_v53  ;;  %2045 = vmatmul.mubr.bf16.gmra.mrb[24].mxu1 %v6122_v15 }
 0x133   :  { %2359 = vmatprep.mubr.bf16.mxu0 %v5461_v1  ;;  %3382 = vmatprep.mubr.bf16.mxu1 %v5461_v1 }
 0x13a   :  { %2360 = vmatmul.mubr.bf16.vlgmr.msra.gmra.mrb[28].mxu0 %v5774_v8  ;;  %3383 = vmatmul.mubr.bf16.vlgmr.msra.gmra.mrb[28].mxu1 %v5909_v31 }
 0x13b   :  { %2511 = vmatpush1.bf16.msra.mxu0 %v5353_v16  ;;  %3454 = vmatpush1.bf16.msra.mxu1 %v5353_v16  ;;  %v5412_v16 = vld [vmem:[%s6579_s1 + $0x1b4] ss:$8 sps:$4 sm:$0xff]  }
 0x13c   :  { %2369 = vmatprep.mubr.bf16.mxu0 %v5461_v1  ;;  %2512 = vmatprep.subr.bf16.mxu0 %v5358_v25 }
 0x13d   :  { %3392 = vmatprep.mubr.bf16.mxu1 %v5461_v1  ;;  %3455 = vmatprep.subr.bf16.mxu1 %v5358_v25  ;;  %v5410_v25 = vld [vmem:[%s6579_s1 + $0x1b0] ss:$8 sps:$4 sm:$0xff]  }
 0x13f   :  { %2513 = vmatpush1.bf16.msra.mxu0 %v5356_v26  ;;  %3456 = vmatpush1.bf16.msra.mxu1 %v5356_v26 }
 0x140   :  { %2514 = vmatprep.subr.bf16.mxu0 %v5361_v27  ;;  %3457 = vmatprep.subr.bf16.mxu1 %v5361_v27  ;;  %v6363_v27 = vld [vmem:[%s6581_s2] ss:$0 sm:$0xff] }
 0x142   :  { %2370 = vmatmul.mubr.bf16.gmra.mrb[32].mxu0 %v5795_v13  ;;  %3393 = vmatmul.mubr.bf16.gmra.mrb[32].mxu1 %v5930_v36 }
 0x143   :  { %2379 = vmatprep.mubr.bf16.mxu0 %v5461_v1  ;;  %2515 = vmatpush1.bf16.msra.mxu0 %v5359_v32 }
 0x144   :  { %3402 = vmatprep.mubr.bf16.mxu1 %v5461_v1  ;;  %3458 = vmatpush1.bf16.msra.mxu1 %v5359_v32 }
 0x145   :  { %2516 = vmatprep.subr.bf16.mxu0 %v5364_v33  ;;  %3459 = vmatprep.subr.bf16.mxu1 %v5364_v33 }
 0x147   :  { %2517 = vmatpush1.bf16.msra.mxu0 %v5362_v34 }
 0x148   :  { %3460 = vmatpush1.bf16.msra.mxu1 %v5362_v34  ;;  %2518 = vmatprep.subr.bf16.mxu0 %v5367_v35 }
 0x149   :  { %3461 = vmatprep.subr.bf16.mxu1 %v5367_v35 }
 0x14a   :  { %2380 = vmatmul.mubr.bf16.gmra.mrb[36].mxu0 %v5818_v18  ;;  %3403 = vmatmul.mubr.bf16.gmra.mrb[36].mxu1 %v5951_v41 }
 0x14b   :  { %2389 = vmatprep.mubr.bf16.mxu0 %v5461_v1  ;;  %3412 = vmatprep.mubr.bf16.mxu1 %v5461_v1 }
 0x14c   :  { %2519 = vmatpush1.bf16.msra.mxu0 %v5365_v37  ;;  %3462 = vmatpush1.bf16.msra.mxu1 %v5365_v37 }
 0x14d   :  { %2520 = vmatprep.subr.bf16.mxu0 %v5370_v38  ;;  %3463 = vmatprep.subr.bf16.mxu1 %v5370_v38 }
 0x150   :  { %2521 = vmatpush1.bf16.msra.mxu0 %v5368_v39  ;;  %3464 = vmatpush1.bf16.msra.mxu1 %v5368_v39 }
 0x151   :  { %2522 = vmatprep.subr.bf16.mxu0 %v5373_v40  ;;  %3465 = vmatprep.subr.bf16.mxu1 %v5373_v40 }
 0x152   :  { %2390 = vmatmul.mubr.bf16.gmra.mrb[40].mxu0 %v5853_v23  ;;  %3413 = vmatmul.mubr.bf16.gmra.mrb[40].mxu1 %v5972_v46 }
 0x153   :  { %2399 = vmatprep.mubr.bf16.mxu0 %v5461_v1  ;;  %3422 = vmatprep.mubr.bf16.mxu1 %v5461_v1 }
 0x154   :  { %2523 = vmatpush1.bf16.msra.mxu0 %v5371_v42  ;;  %3466 = vmatpush1.bf16.msra.mxu1 %v5371_v42 }
 0x155   :  { %2524 = vmatprep.subr.bf16.mxu0 %v5376_v43  ;;  %3467 = vmatprep.subr.bf16.mxu1 %v5376_v43 }
 0x158   :  { %2525 = vmatpush1.bf16.msra.mxu0 %v5374_v44  ;;  %3468 = vmatpush1.bf16.msra.mxu1 %v5374_v44 }
 0x159   :  { %2709 = vmatprep.subr.bf16.mxu0 %v5379_v45  ;;  %3556 = vmatprep.subr.bf16.mxu1 %v5379_v45  ;;  %v6374_v45 = vld [vmem:[%s6580_s0 + $0x88] sm:$0xff]  }
 0x15a   :  { %2400 = vmatmul.mubr.bf16.gmra.mrb[44].mxu0 %v5882_v28  ;;  %3423 = vmatmul.mubr.bf16.gmra.mrb[44].mxu1 %v5993_v51 }
 0x15b   :  { %2409 = vmatprep.mubr.bf16.mxu0 %v5461_v1  ;;  %3432 = vmatprep.mubr.bf16.mxu1 %v5461_v1 }
 0x162   :  { %2410 = vmatmul.mubr.bf16.gmra.mrb[48].mxu0 %v5891_v29  ;;  %3433 = vmatmul.mubr.bf16.gmra.mrb[48].mxu1 %v6002_v52 }
 0x163   :  { %2419 = vmatprep.mubr.bf16.mxu0 %v5461_v1  ;;  %3442 = vmatprep.mubr.bf16.mxu1 %v5461_v1 }
 0x16a   :  { %2420 = vmatmul.mubr.bf16.gmra.mrb[52].mxu0 %v5900_v30  ;;  %3443 = vmatmul.mubr.bf16.gmra.mrb[52].mxu1 %v6011_v53 }
 0x16b   :  { %2542 = vmatprep.mubr.bf16.mxu0 %v5461_v1  ;;  %3485 = vmatprep.mubr.bf16.mxu1 %v5461_v1 }
 0x172   :  { %2543 = vmatmul.mubr.bf16.vlgmr.msra.gmra.mrb[28].mxu0 %v5454_v49  ;;  %3486 = vmatmul.mubr.bf16.vlgmr.msra.gmra.mrb[28].mxu1 %v5774_v8  ;;  %v5383_v8 = vld [vmem:[%s6579_s1 + $0x120] ss:$8 sps:$4 sm:$0xff]  }
 0x173   :  { %2710 = vmatpush1.bf16.msra.mxu0 %v5377_v47  ;;  %3557 = vmatpush1.bf16.msra.mxu1 %v5377_v47 }
 0x174   :  { %2552 = vmatprep.mubr.bf16.mxu0 %v5461_v1  ;;  %2711 = vmatprep.subr.bf16.mxu0 %v5382_v48 }
 0x175   :  { %3495 = vmatprep.mubr.bf16.mxu1 %v5461_v1  ;;  %3558 = vmatprep.subr.bf16.mxu1 %v5382_v48 }
 0x177   :  { %2712 = vmatpush1.bf16.msra.mxu0 %v5380_v50  ;;  %3559 = vmatpush1.bf16.msra.mxu1 %v5380_v50 }
 0x178   :  { %2713 = vmatprep.subr.bf16.mxu0 %v5385_v55  ;;  %3560 = vmatprep.subr.bf16.mxu1 %v5385_v55 }
 0x17a   :  { %2553 = vmatmul.mubr.bf16.gmra.mrb[32].mxu0 %v5455_v57  ;;  %3496 = vmatmul.mubr.bf16.gmra.mrb[32].mxu1 %v5795_v13  ;;  %v5389_v13 = vld [vmem:[%s6579_s1 + $0x140] ss:$8 sps:$4 sm:$0xff]  }
 0x17b   :  { %2562 = vmatprep.mubr.bf16.mxu0 %v5461_v1  ;;  %2714 = vmatpush1.bf16.msra.mxu0 %v5383_v8 }
 0x17c   :  { %3505 = vmatprep.mubr.bf16.mxu1 %v5461_v1  ;;  %3561 = vmatpush1.bf16.msra.mxu1 %v5383_v8  ;;  %v5416_v8 = vld [vmem:[%s6579_s1 + $0x200] ss:$8 sps:$4 sm:$0xff]  }
 0x17d   :  { %2715 = vmatprep.subr.bf16.mxu0 %v5388_v56  ;;  %3562 = vmatprep.subr.bf16.mxu1 %v5388_v56 }
 0x17f   :  { %2716 = vmatpush1.bf16.msra.mxu0 %v5386_v58 }
 0x180   :  { %3563 = vmatpush1.bf16.msra.mxu1 %v5386_v58  ;;  %2717 = vmatprep.subr.bf16.mxu0 %v5391_v60  ;;  %v5422_v58 = vld [vmem:[%s6579_s1 + $0x214] ss:$8 sps:$4 sm:$0xff]  }
 0x181   :  { %3564 = vmatprep.subr.bf16.mxu1 %v5391_v60 }
 0x182   :  { %2563 = vmatmul.mubr.bf16.gmra.mrb[36].mxu0 %v5456_v62  ;;  %3506 = vmatmul.mubr.bf16.gmra.mrb[36].mxu1 %v5818_v18  ;;  %v5395_v18 = vld [vmem:[%s6579_s1 + $0x160] ss:$8 sps:$4 sm:$0xff]  }
 0x183   :  { %2572 = vmatprep.mubr.bf16.mxu0 %v5461_v1  ;;  %3515 = vmatprep.mubr.bf16.mxu1 %v5461_v1 }
 0x184   :  { %2718 = vmatpush1.bf16.msra.mxu0 %v5389_v13  ;;  %3565 = vmatpush1.bf16.msra.mxu1 %v5389_v13 }
 0x185   :  { %2719 = vmatprep.subr.bf16.mxu0 %v5394_v61  ;;  %3566 = vmatprep.subr.bf16.mxu1 %v5394_v61 }
 0x188   :  { %2720 = vmatpush1.bf16.msra.mxu0 %v5392_v63  ;;  %3567 = vmatpush1.bf16.msra.mxu1 %v5392_v63 }
 0x189   :  { %2721 = vmatprep.subr.bf16.mxu0 %v5397_v2  ;;  %3568 = vmatprep.subr.bf16.mxu1 %v5397_v2 }
 0x18a   :  { %2573 = vmatmul.mubr.bf16.gmra.mrb[40].mxu0 %v5457_v4  ;;  %3516 = vmatmul.mubr.bf16.gmra.mrb[40].mxu1 %v5853_v23  ;;  %v5458_v23 = vld [vmem:[%s6580_s0 + $0xa0] sm:$0xff]  }
 0x18b   :  { %2582 = vmatprep.mubr.bf16.mxu0 %v5461_v1  ;;  %3525 = vmatprep.mubr.bf16.mxu1 %v5461_v1 }
 0x18c   :  { %2722 = vmatpush1.bf16.msra.mxu0 %v5395_v18  ;;  %3569 = vmatpush1.bf16.msra.mxu1 %v5395_v18  ;;  %v5420_v18 = vld [vmem:[%s6579_s1 + $0x210] ss:$8 sps:$4 sm:$0xff]  }
 0x18d   :  { %2723 = vmatprep.subr.bf16.mxu0 %v5400_v3  ;;  %3570 = vmatprep.subr.bf16.mxu1 %v5400_v3 }
 0x190   :  { %2724 = vmatpush1.bf16.msra.mxu0 %v5398_v5  ;;  %3571 = vmatpush1.bf16.msra.mxu1 %v5398_v5 }
 0x191   :  { %2936 = vmatprep.subr.bf16.mxu0 %v5403_v7  ;;  %3687 = vmatprep.subr.bf16.mxu1 %v5403_v7 }
 0x192   :  { %2583 = vmatmul.mubr.bf16.gmra.mrb[44].mxu0 %v5458_v23  ;;  %3526 = vmatmul.mubr.bf16.gmra.mrb[44].mxu1 %v5882_v28  ;;  %v5401_v28 = vld [vmem:[%s6579_s1 + $0x180] ss:$8 sps:$4 sm:$0xff]  }
 0x193   :  { %2592 = vmatprep.mubr.bf16.mxu0 %v5461_v1  ;;  %3535 = vmatprep.mubr.bf16.mxu1 %v5461_v1 }
 0x19a   :  { %2593 = vmatmul.mubr.bf16.gmra.mrb[48].mxu0 %v5459_v9  ;;  %3536 = vmatmul.mubr.bf16.gmra.mrb[48].mxu1 %v5891_v29  ;;  %v5406_v29 = vld [vmem:[%s6579_s1 + $0x194] ss:$8 sps:$4 sm:$0xff]  }
 0x19b   :  { %2602 = vmatprep.mubr.bf16.mxu0 %v5461_v1  ;;  %3545 = vmatprep.mubr.bf16.mxu1 %v5461_v1  ;;  %v6400_v9 = vld [vmem:[%s6580_s0 + $0x90] sm:$0xff]  }
 0x1a2   :  { %2603 = vmatmul.mubr.bf16.gmra.mrb[52].mxu0 %v5460_v10  ;;  %3546 = vmatmul.mubr.bf16.gmra.mrb[52].mxu1 %v5900_v30  ;;  %v5404_v30 = vld [vmem:[%s6579_s1 + $0x190] ss:$8 sps:$4 sm:$0xff]  }
 0x1a3   :  { %2741 = vmatprep.mubr.bf16.mxu0 %v5461_v1  ;;  %3588 = vmatprep.mubr.bf16.mxu1 %v5461_v1 }
 0x1aa   :  { %2742 = vmatmul.mubr.bf16.vlgmr.msra.gmra.mrb[28].mxu0 %v5909_v31  ;;  %3589 = vmatmul.mubr.bf16.vlgmr.msra.gmra.mrb[28].mxu1 %v6020_v54  ;;  %v5407_v31 = vld [vmem:[%s6579_s1 + $0x1a0] ss:$8 sps:$4 sm:$0xff]  }
 0x1ab   :  { %2937 = vmatpush1.bf16.msra.mxu0 %v5401_v28  ;;  %3688 = vmatpush1.bf16.msra.mxu1 %v5401_v28 }
 0x1ac   :  { %2751 = vmatprep.mubr.bf16.mxu0 %v5461_v1  ;;  %2938 = vmatprep.subr.bf16.mxu0 %v5406_v29 }
 0x1ad   :  { %3598 = vmatprep.mubr.bf16.mxu1 %v5461_v1  ;;  %3689 = vmatprep.subr.bf16.mxu1 %v5406_v29 }
 0x1af   :  { %2939 = vmatpush1.bf16.msra.mxu0 %v5404_v30  ;;  %3690 = vmatpush1.bf16.msra.mxu1 %v5404_v30 }
 0x1b0   :  { %2940 = vmatprep.subr.bf16.mxu0 %v5409_v11  ;;  %3691 = vmatprep.subr.bf16.mxu1 %v5409_v11 }
 0x1b2   :  { %2752 = vmatmul.mubr.bf16.gmra.mrb[32].mxu0 %v5930_v36  ;;  %3599 = vmatmul.mubr.bf16.gmra.mrb[32].mxu1 %v6041_v59 }
 0x1b3   :  { %2761 = vmatprep.mubr.bf16.mxu0 %v5461_v1  ;;  %2941 = vmatpush1.bf16.msra.mxu0 %v5407_v31 }
 0x1b4   :  { %3608 = vmatprep.mubr.bf16.mxu1 %v5461_v1  ;;  %3692 = vmatpush1.bf16.msra.mxu1 %v5407_v31 }
 0x1b5   :  { %2942 = vmatprep.subr.bf16.mxu0 %v5412_v16  ;;  %3693 = vmatprep.subr.bf16.mxu1 %v5412_v16  ;;  %v5424_v16 = vld [vmem:[%s6579_s1 + $0x220] ss:$8 sps:$4 sm:$0xff]  }
 0x1b7   :  { %2943 = vmatpush1.bf16.msra.mxu0 %v5410_v25 }
 0x1b8   :  { %3694 = vmatpush1.bf16.msra.mxu1 %v5410_v25  ;;  %2944 = vmatprep.subr.bf16.mxu0 %v5813_v17 }
 0x1b9   :  { %3695 = vmatprep.subr.bf16.mxu1 %v5813_v17  ;;  %v5415_v17 = vld [vmem:[%s6579_s1 + $0x1f4] ss:$8 sps:$4 sm:$0xff]  }
 0x1ba   :  { %2762 = vmatmul.mubr.bf16.gmra.mrb[36].mxu0 %v5951_v41  ;;  %3609 = vmatmul.mubr.bf16.gmra.mrb[36].mxu1 %v6062_v0 }
 0x1bb   :  { %2771 = vmatprep.mubr.bf16.mxu0 %v5461_v1  ;;  %3618 = vmatprep.mubr.bf16.mxu1 %v5461_v1 }
 0x1bc   :  { %2945 = vmatpush1.bf16.msra.mxu0 %v5823_v19  ;;  %3696 = vmatpush1.bf16.msra.mxu1 %v5823_v19  ;;  %v5413_v19 = vld [vmem:[%s6579_s1 + $0x1f0] ss:$8 sps:$4 sm:$0xff]  }
 0x1bd   :  { %2946 = vmatprep.subr.bf16.mxu0 %v5830_v20  ;;  %3697 = vmatprep.subr.bf16.mxu1 %v5830_v20  ;;  %v5418_v20 = vld [vmem:[%s6579_s1 + $0x204] ss:$8 sps:$4 sm:$0xff]  }
 0x1c0   :  { %2947 = vmatpush1.bf16.msra.mxu0 %v5841_v21  ;;  %3698 = vmatpush1.bf16.msra.mxu1 %v5841_v21 }
 0x1c1   :  { %2948 = vmatprep.subr.bf16.mxu0 %v5848_v22  ;;  %3699 = vmatprep.subr.bf16.mxu1 %v5848_v22 }
 0x1c2   :  { %2772 = vmatmul.mubr.bf16.gmra.mrb[40].mxu0 %v5972_v46  ;;  %3619 = vmatmul.mubr.bf16.gmra.mrb[40].mxu1 %v6083_v6 }
 0x1c3   :  { %2781 = vmatprep.mubr.bf16.mxu0 %v5461_v1  ;;  %3628 = vmatprep.mubr.bf16.mxu1 %v5461_v1 }
 0x1c4   :  { %2949 = vmatpush1.bf16.msra.mxu0 %v5860_v24  ;;  %3700 = vmatpush1.bf16.msra.mxu1 %v5860_v24 }
 0x1c5   :  { %2950 = vmatprep.subr.bf16.mxu0 %v5415_v17  ;;  %3701 = vmatprep.subr.bf16.mxu1 %v5415_v17 }
 0x1c8   :  { %2951 = vmatpush1.bf16.msra.mxu0 %v5413_v19  ;;  %3702 = vmatpush1.bf16.msra.mxu1 %v5413_v19 }
 0x1c9   :  { %3205 = vmatprep.subr.bf16.mxu0 %v5418_v20  ;;  %3860 = vmatprep.subr.bf16.mxu1 %v5418_v20 }
 0x1ca   :  { %2782 = vmatmul.mubr.bf16.gmra.mrb[44].mxu0 %v5993_v51  ;;  %3629 = vmatmul.mubr.bf16.gmra.mrb[44].mxu1 %v6104_v12 }
 0x1cb   :  { %2791 = vmatprep.mubr.bf16.mxu0 %v5461_v1  ;;  %3638 = vmatprep.mubr.bf16.mxu1 %v5461_v1 }
 0x1d2   :  { %2792 = vmatmul.mubr.bf16.gmra.mrb[48].mxu0 %v6002_v52  ;;  %3639 = vmatmul.mubr.bf16.gmra.mrb[48].mxu1 %v6113_v14 }
 0x1d3   :  { %2801 = vmatprep.mubr.bf16.mxu0 %v5461_v1  ;;  %3648 = vmatprep.mubr.bf16.mxu1 %v5461_v1 }
 0x1d5   :  { %v1331_v21 = vpop.f32.mrb[0].mxu0  ;;  %v1986_v22 = vpop.f32.mrb[0].mxu1 }
 0x1d6   :  { %v1333_v24 = vpop.f32.mrb[1].mxu0  ;;  %v1988_v36 = vpop.f32.mrb[1].mxu1 }
 0x1d7   :  { %v1428_v41 = vmax.f32 %v1331_v21, %v1333_v24  ;;  %v2083_v46 = vmax.f32 %v1986_v22, %v1988_v36  ;;  %v1335_v51 = vpop.f32.mrb[2].mxu0  ;;  %v1990_v26 = vpop.f32.mrb[2].mxu1  ;;  %v5430_v24 = vld [vmem:[%s6579_s1 + $0x234] ss:$8 sps:$4 sm:$0xff]  }
 0x1d8   :  { %v1337_v52 = vpop.f32.mrb[3].mxu0  ;;  %v1992_v32 = vpop.f32.mrb[3].mxu1 }
 0x1d9   :  { %v2097_v33 = vmax.f32 %v1428_v41, %v2083_v46  ;;  %v1429_v34 = vmax.f32 %v1335_v51, %v1337_v52  ;;  %v2084_v35 = vmax.f32 %v1990_v26, %v1992_v32  ;;  %v5428_v46 = vld [vmem:[%s6579_s1 + $0x230] ss:$8 sps:$4 sm:$0xff]  }
 0x1da   :  { %2802 = vmatmul.mubr.bf16.gmra.mrb[52].mxu0 %v6011_v53  ;;  %3649 = vmatmul.mubr.bf16.gmra.mrb[52].mxu1 %v6122_v15 }
 0x1db   :  { %v2117_v37 = vadd.f32 %v6363_v27, %v2097_v33  ;;  %v2098_v38 = vmax.f32 %v1429_v34, %v2084_v35  ;;  %2968 = vmatprep.mubr.bf16.mxu0 %v5461_v1  ;;  %3719 = vmatprep.mubr.bf16.mxu1 %v5461_v1  ;;  %v6426_v34 = vld [vmem:[%s6580_s0 + $0x98] sm:$0xff]  }
 0x1dd   :  { %v2118_v39 = vadd.f32 %v6363_v27, %v2098_v38  ;;  %v1341_v40 = vpop.f32.mrb[4].mxu0  ;;  %v1996_v42 = vpop.f32.mrb[4].mxu1  ;;  %v2131_v53 = vmax.f32 %v2117_v37, 0.0 }
 0x1de   :  { %v1343_v43 = vpop.f32.mrb[5].mxu0  ;;  %v1998_v44 = vpop.f32.mrb[5].mxu1 }
 0x1df   :  { %v2132_v47 = vmax.f32 %v2118_v39, 0.0  ;;  %v1430_v48 = vmax.f32 %v1341_v40, %v1343_v43  ;;  %v2085_v49 = vmax.f32 %v1996_v42, %v1998_v44  ;;  %v1345_v50 = vpop.f32.mrb[6].mxu0  ;;  %v2000_v55 = vpop.f32.mrb[6].mxu1 }
 0x1e0   :  { %v1347_v56 = vpop.f32.mrb[7].mxu0  ;;  %v2002_v57 = vpop.f32.mrb[7].mxu1 }
 0x1e1   :  { %v4638_v60 = vpack.c.bf16 %v2132_v47, %v2131_v53  ;;  %v2099_v13 = vmax.f32 %v1430_v48, %v2085_v49  ;;  %v1431_v61 = vmax.f32 %v1345_v50, %v1347_v56  ;;  %v2086_v62 = vmax.f32 %v2000_v55, %v2002_v57  ;;  %v5432_v53 = vld [vmem:[%s6579_s1 + $0x240] ss:$8 sps:$4 sm:$0xff]   ;;  %v5438_v55 = vld [vmem:[%s6579_s1 + $0x254] ss:$8 sps:$4 sm:$0xff]   ;;  %v5436_v57 = vld [vmem:[%s6579_s1 + $0x250] ss:$8 sps:$4 sm:$0xff]  }
 0x1e2   :  { %2969 = vmatmul.mubr.bf16.vlgmr.msra.gmra.mrb[28].mxu0 %v6020_v54  ;;  %3720 = vmatmul.mubr.bf16.vlgmr.msra.gmra.mrb[28].mxu1 %v6374_v45  ;;  %v5426_v54 = vld [vmem:[%s6579_s1 + $0x224] ss:$8 sps:$4 sm:$0xff]  }
 0x1e3   :  { %4639 = vst [vmem:[%s6582_s3] sm:$0xff] %v4638_v60   ;;  %v2119_v63 = vadd.f32 %v6363_v27, %v2099_v13  ;;  %v2100_v2 = vmax.f32 %v1431_v61, %v2086_v62  ;;  %3206 = vmatpush1.bf16.msra.mxu0 %v5416_v8  ;;  %3861 = vmatpush1.bf16.msra.mxu1 %v5416_v8  ;;  %v5442_v13 = vld [vmem:[%s6579_s1 + $0x264] ss:$8 sps:$4 sm:$0xff]  }
 0x1e4   :  { %2978 = vmatprep.mubr.bf16.mxu0 %v5461_v1  ;;  %3207 = vmatprep.subr.bf16.mxu0 %v5422_v58 }
 0x1e5   :  { %v2120_v3 = vadd.f32 %v6363_v27, %v2100_v2  ;;  %v1351_v4 = vpop.f32.mrb[8].mxu0  ;;  %v2006_v5 = vpop.f32.mrb[8].mxu1  ;;  %3729 = vmatprep.mubr.bf16.mxu1 %v5461_v1  ;;  %3862 = vmatprep.subr.bf16.mxu1 %v5422_v58  ;;  %v2133_v10 = vmax.f32 %v2119_v63, 0.0  ;;  %v6452_v63 = vld [vmem:[%s6580_s0 + $0xa0] sm:$0xff]  }
 0x1e6   :  { %v1353_v7 = vpop.f32.mrb[9].mxu0  ;;  %v2008_v23 = vpop.f32.mrb[9].mxu1 }
 0x1e7   :  { %v2134_v28 = vmax.f32 %v2120_v3, 0.0  ;;  %v1432_v29 = vmax.f32 %v1351_v4, %v1353_v7  ;;  %v2087_v30 = vmax.f32 %v2006_v5, %v2008_v23  ;;  %v1355_v11 = vpop.f32.mrb[10].mxu0  ;;  %v2010_v31 = vpop.f32.mrb[10].mxu1  ;;  %3208 = vmatpush1.bf16.msra.mxu0 %v5420_v18  ;;  %3863 = vmatpush1.bf16.msra.mxu1 %v5420_v18 }
 0x1e8   :  { %v1357_v25 = vpop.f32.mrb[11].mxu0  ;;  %v2012_v17 = vpop.f32.mrb[11].mxu1  ;;  %3209 = vmatprep.subr.bf16.mxu0 %v5426_v54  ;;  %3864 = vmatprep.subr.bf16.mxu1 %v5426_v54 }
 0x1e9   :  { %v4643_v19 = vpack.c.bf16 %v2134_v28, %v2133_v10  ;;  %v2101_v20 = vmax.f32 %v1432_v29, %v2087_v30  ;;  %v1433_v21 = vmax.f32 %v1355_v11, %v1357_v25  ;;  %v2088_v22 = vmax.f32 %v2010_v31, %v2012_v17  ;;  %v5440_v10 = vld [vmem:[%s6579_s1 + $0x260] ss:$8 sps:$4 sm:$0xff]   ;;  %v5446_v31 = vld [vmem:[%s6579_s1 + $0x274] ss:$8 sps:$4 sm:$0xff]   ;;  %v5444_v17 = vld [vmem:[%s6579_s1 + $0x270] ss:$8 sps:$4 sm:$0xff]  }
 0x1ea   :  { %2979 = vmatmul.mubr.bf16.gmra.mrb[32].mxu0 %v6041_v59  ;;  %3730 = vmatmul.mubr.bf16.gmra.mrb[32].mxu1 %v6400_v9  ;;  %v5434_v59 = vld [vmem:[%s6579_s1 + $0x244] ss:$8 sps:$4 sm:$0xff]  }
 0x1eb   :  { %4705 = vst [vmem:[%s6582_s3 + $0x8] sm:$0xff] %v4643_v19   ;;  %v2121_v36 = vadd.f32 %v6363_v27, %v2101_v20  ;;  %v2102_v41 = vmax.f32 %v1433_v21, %v2088_v22  ;;  %2988 = vmatprep.mubr.bf16.mxu0 %v5461_v1  ;;  %3210 = vmatpush1.bf16.msra.mxu0 %v5424_v16 }
 0x1ec   :  { %3739 = vmatprep.mubr.bf16.mxu1 %v5461_v1  ;;  %3865 = vmatpush1.bf16.msra.mxu1 %v5424_v16 }
 0x1ed   :  { %v2122_v51 = vadd.f32 %v6363_v27, %v2102_v41  ;;  %v1361_v26 = vpop.f32.mrb[12].mxu0  ;;  %v2016_v52 = vpop.f32.mrb[12].mxu1  ;;  %3211 = vmatprep.subr.bf16.mxu0 %v5430_v24  ;;  %3866 = vmatprep.subr.bf16.mxu1 %v5430_v24  ;;  %v2135_v35 = vmax.f32 %v2121_v36, 0.0  ;;  %v6475_v24 = vld [vmem:[%s6580_s0 + $0xa8] sm:$0xff]  }
 0x1ee   :  { %v1363_v32 = vpop.f32.mrb[13].mxu0  ;;  %v2018_v33 = vpop.f32.mrb[13].mxu1 }
 0x1ef   :  { %v2136_v37 = vmax.f32 %v2122_v51, 0.0  ;;  %v1434_v38 = vmax.f32 %v1361_v26, %v1363_v32  ;;  %v2089_v39 = vmax.f32 %v2016_v52, %v2018_v33  ;;  %v1365_v40 = vpop.f32.mrb[14].mxu0  ;;  %v2020_v42 = vpop.f32.mrb[14].mxu1  ;;  %3212 = vmatpush1.bf16.msra.mxu0 %v5428_v46 }
 0x1f0   :  { %v1367_v43 = vpop.f32.mrb[15].mxu0  ;;  %v2022_v44 = vpop.f32.mrb[15].mxu1  ;;  %3867 = vmatpush1.bf16.msra.mxu1 %v5428_v46  ;;  %3213 = vmatprep.subr.bf16.mxu0 %v5434_v59 }
 0x1f1   :  { %v4648_v47 = vpack.c.bf16 %v2136_v37, %v2135_v35  ;;  %v2103_v48 = vmax.f32 %v1434_v38, %v2089_v39  ;;  %v1435_v49 = vmax.f32 %v1365_v40, %v1367_v43  ;;  %v2090_v50 = vmax.f32 %v2020_v42, %v2022_v44  ;;  %3868 = vmatprep.subr.bf16.mxu1 %v5434_v59 }
 0x1f2   :  { %2989 = vmatmul.mubr.bf16.gmra.mrb[36].mxu0 %v6062_v0  ;;  %3740 = vmatmul.mubr.bf16.gmra.mrb[36].mxu1 %v6426_v34 }
 0x1f3   :  { %4706 = vst [vmem:[%s6582_s3 + $0x10] sm:$0xff] %v4648_v47   ;;  %v2123_v8 = vadd.f32 %v6363_v27, %v2103_v48  ;;  %v2104_v56 = vmax.f32 %v1435_v49, %v2090_v50  ;;  %2998 = vmatprep.mubr.bf16.mxu0 %v5461_v1  ;;  %3749 = vmatprep.mubr.bf16.mxu1 %v5461_v1 }
 0x1f4   :  { %3214 = vmatpush1.bf16.msra.mxu0 %v5432_v53  ;;  %3869 = vmatpush1.bf16.msra.mxu1 %v5432_v53 }
 0x1f5   :  { %v2124_v0 = vadd.f32 %v6363_v27, %v2104_v56  ;;  %v1371_v58 = vpop.f32.mrb[16].mxu0  ;;  %v2026_v60 = vpop.f32.mrb[16].mxu1  ;;  %3215 = vmatprep.subr.bf16.mxu0 %v5438_v55  ;;  %3870 = vmatprep.subr.bf16.mxu1 %v5438_v55  ;;  %v2137_v2 = vmax.f32 %v2123_v8, 0.0 }
 0x1f6   :  { %v1373_v61 = vpop.f32.mrb[17].mxu0  ;;  %v2028_v62 = vpop.f32.mrb[17].mxu1 }
 0x1f7   :  { %v2138_v18 = vmax.f32 %v2124_v0, 0.0  ;;  %v1436_v54 = vmax.f32 %v1371_v58, %v1373_v61  ;;  %v2091_v3 = vmax.f32 %v2026_v60, %v2028_v62  ;;  %v1375_v4 = vpop.f32.mrb[18].mxu0  ;;  %v2030_v5 = vpop.f32.mrb[18].mxu1 }
 0x1f8   :  { %v1377_v7 = vpop.f32.mrb[19].mxu0  ;;  %v2032_v23 = vpop.f32.mrb[19].mxu1  ;;  %3216 = vmatpush1.bf16.msra.mxu0 %v5436_v57  ;;  %3871 = vmatpush1.bf16.msra.mxu1 %v5436_v57 }
 0x1f9   :  { %v4653_v28 = vpack.c.bf16 %v2138_v18, %v2137_v2  ;;  %v2105_v29 = vmax.f32 %v1436_v54, %v2091_v3  ;;  %v1437_v30 = vmax.f32 %v1375_v4, %v1377_v7  ;;  %v2092_v11 = vmax.f32 %v2030_v5, %v2032_v23  ;;  %3217 = vmatprep.subr.bf16.mxu0 %v5442_v13  ;;  %v5443_v54 = vld [vmem:[%s6580_s0 + $0xb8] sm:$0xff]   ;;  %v5447_v5 = vld [vmem:[%s6580_s0 + $0xc8] sm:$0xff]  }
 0x1fa   :  { %2999 = vmatmul.mubr.bf16.gmra.mrb[40].mxu0 %v6083_v6  ;;  %3750 = vmatmul.mubr.bf16.gmra.mrb[40].mxu1 %v6452_v63  ;;  %v5453_v7 = vld [vmem:[%s6580_s0 + $0xf8] sm:$0xff]  }
 0x1fb   :  { %4707 = vst [vmem:[%s6582_s3 + $0x18] sm:$0xff] %v4653_v28   ;;  %v2125_v16 = vadd.f32 %v6363_v27, %v2105_v29  ;;  %v2106_v25 = vmax.f32 %v1437_v30, %v2092_v11  ;;  %3008 = vmatprep.mubr.bf16.mxu0 %v5461_v1  ;;  %3759 = vmatprep.mubr.bf16.mxu1 %v5461_v1 }
 0x1fc   :  { %3872 = vmatprep.subr.bf16.mxu1 %v5442_v13  ;;  %3218 = vmatpush1.bf16.msra.mxu0 %v5440_v10 }
 0x1fd   :  { %v2126_v6 = vadd.f32 %v6363_v27, %v2106_v25  ;;  %v1381_v19 = vpop.f32.mrb[20].mxu0  ;;  %v2036_v20 = vpop.f32.mrb[20].mxu1  ;;  %3873 = vmatpush1.bf16.msra.mxu1 %v5440_v10  ;;  %3219 = vmatprep.subr.bf16.mxu0 %v5446_v31  ;;  %v2139_v36 = vmax.f32 %v2125_v16, 0.0 }
 0x1fe   :  { %v1383_v21 = vpop.f32.mrb[21].mxu0  ;;  %v2038_v22 = vpop.f32.mrb[21].mxu1  ;;  %3874 = vmatprep.subr.bf16.mxu1 %v5446_v31 }
 0x1ff   :  { %v2140_v41 = vmax.f32 %v2126_v6, 0.0  ;;  %v1438_v46 = vmax.f32 %v1381_v19, %v1383_v21  ;;  %v2093_v59 = vmax.f32 %v2036_v20, %v2038_v22  ;;  %v1385_v51 = vpop.f32.mrb[22].mxu0  ;;  %v2040_v26 = vpop.f32.mrb[22].mxu1 }
 0x200   :  { %v1387_v52 = vpop.f32.mrb[23].mxu0  ;;  %v2042_v32 = vpop.f32.mrb[23].mxu1  ;;  %3220 = vmatpush1.bf16.msra.mxu0 %v5444_v17 }
 0x201   :  { %v4658_v33 = vpack.c.bf16 %v2140_v41, %v2139_v36  ;;  %v2107_v35 = vmax.f32 %v1438_v46, %v2093_v59  ;;  %v1439_v37 = vmax.f32 %v1385_v51, %v1387_v52  ;;  %v2094_v38 = vmax.f32 %v2040_v26, %v2042_v32  ;;  %3875 = vmatpush1.bf16.msra.mxu1 %v5444_v17 }
 0x202   :  { %3009 = vmatmul.mubr.bf16.gmra.mrb[44].mxu0 %v6104_v12  ;;  %3760 = vmatmul.mubr.bf16.gmra.mrb[44].mxu1 %v6475_v24  ;;  %v5439_v12 = vld [vmem:[%s6580_s0 + $0xb0] sm:$0xff]  }
 0x203   :  { %4708 = vst [vmem:[%s6582_s3 + $0x20] sm:$0xff] %v4658_v33   ;;  %v2127_v39 = vadd.f32 %v6363_v27, %v2107_v35  ;;  %v2108_v40 = vmax.f32 %v1439_v37, %v2094_v38  ;;  %3018 = vmatprep.mubr.bf16.mxu0 %v5461_v1  ;;  %3769 = vmatprep.mubr.bf16.mxu1 %v5461_v1 }
 0x205   :  { %v2128_v42 = vadd.f32 %v6363_v27, %v2108_v40  ;;  %v1391_v43 = vpop.f32.mrb[24].mxu0  ;;  %v2046_v44 = vpop.f32.mrb[24].mxu1  ;;  %v2141_v48 = vmax.f32 %v2127_v39, 0.0 }
 0x206   :  { %v1393_v53 = vpop.f32.mrb[25].mxu0  ;;  %v2048_v47 = vpop.f32.mrb[25].mxu1 }
 0x207   :  { %v2142_v49 = vmax.f32 %v2128_v42, 0.0  ;;  %v1440_v50 = vmax.f32 %v1391_v43, %v1393_v53  ;;  %v2095_v55 = vmax.f32 %v2046_v44, %v2048_v47  ;;  %v1395_v8 = vpop.f32.mrb[26].mxu0  ;;  %v2050_v56 = vpop.f32.mrb[26].mxu1 }
 0x208   :  { %v1397_v57 = vpop.f32.mrb[27].mxu0  ;;  %v2052_v0 = vpop.f32.mrb[27].mxu1 }
 0x209   :  { %v4663_v58 = vpack.c.bf16 %v2142_v49, %v2141_v48  ;;  %v2109_v60 = vmax.f32 %v1440_v50, %v2095_v55  ;;  %v1441_v13 = vmax.f32 %v1395_v8, %v1397_v57  ;;  %v2096_v61 = vmax.f32 %v2050_v56, %v2052_v0 }
 0x20a   :  { %3019 = vmatmul.mubr.bf16.gmra.mrb[48].mxu0 %v6113_v14  ;;  %3770 = vmatmul.mubr.bf16.gmra.mrb[48].mxu1 %v5439_v12 }
 0x20b   :  { %4709 = vst [vmem:[%s6582_s3 + $0x28] sm:$0xff] %v4663_v58   ;;  %v2129_v62 = vadd.f32 %v6363_v27, %v2109_v60  ;;  %v2110_v2 = vmax.f32 %v1441_v13, %v2096_v61  ;;  %3028 = vmatprep.mubr.bf16.mxu0 %v5461_v1  ;;  %3779 = vmatprep.mubr.bf16.mxu1 %v5461_v1 }
 0x20d   :  { %v2130_v18 = vadd.f32 %v6363_v27, %v2110_v2  ;;  %v2143_v3 = vmax.f32 %v2129_v62, 0.0 }
 0x20f   :  { %v2144_v14 = vmax.f32 %v2130_v18, 0.0 }
 0x211   :  { %v4668_v4 = vpack.c.bf16 %v2144_v14, %v2143_v3 }
 0x212   :  { %3029 = vmatmul.mubr.bf16.gmra.mrb[52].mxu0 %v6122_v15  ;;  %3780 = vmatmul.mubr.bf16.gmra.mrb[52].mxu1 %v5443_v54  ;;  %v5448_v15 = vld [vmem:[%s6580_s0 + $0xd0] sm:$0xff]  }
 0x213   :  { %4710 = vst [vmem:[%s6582_s3 + $0x30] sm:$0xff] %v4668_v4   ;;  %3237 = vmatprep.mubr.bf16.mxu0 %v5461_v1  ;;  %3892 = vmatprep.mubr.bf16.mxu1 %v5461_v1 }
 0x21a   :  { %3238 = vmatmul.mubr.bf16.vlgmr.msra.gmra.mrb[28].mxu0 %v6374_v45  ;;  %3893 = vmatmul.mubr.bf16.vlgmr.msra.gmra.mrb[28].mxu1 %v5447_v5  ;;  %v5449_v45 = vld [vmem:[%s6580_s0 + $0xd8] sm:$0xff]  }
 0x21b   :  { %3247 = vmatprep.mubr.bf16.mxu0 %v5461_v1  ;;  %3902 = vmatprep.mubr.bf16.mxu1 %v5461_v1 }
 0x222   :  { %3248 = vmatmul.mubr.bf16.gmra.mrb[32].mxu0 %v6400_v9  ;;  %3903 = vmatmul.mubr.bf16.gmra.mrb[32].mxu1 %v5448_v15  ;;  %v5450_v9 = vld [vmem:[%s6580_s0 + $0xe0] sm:$0xff]  }
 0x223   :  { %3257 = vmatprep.mubr.bf16.mxu0 %v5461_v1  ;;  %3912 = vmatprep.mubr.bf16.mxu1 %v5461_v1 }
 0x22a   :  { %3258 = vmatmul.mubr.bf16.gmra.mrb[36].mxu0 %v6426_v34  ;;  %3913 = vmatmul.mubr.bf16.gmra.mrb[36].mxu1 %v5449_v45  ;;  %v5451_v34 = vld [vmem:[%s6580_s0 + $0xe8] sm:$0xff]  }
 0x22b   :  { %3267 = vmatprep.mubr.bf16.mxu0 %v5461_v1  ;;  %3922 = vmatprep.mubr.bf16.mxu1 %v5461_v1 }
 0x232   :  { %3268 = vmatmul.mubr.bf16.gmra.mrb[40].mxu0 %v6452_v63  ;;  %3923 = vmatmul.mubr.bf16.gmra.mrb[40].mxu1 %v5450_v9  ;;  %v5452_v63 = vld [vmem:[%s6580_s0 + $0xf0] sm:$0xff]  }
 0x233   :  { %3277 = vmatprep.mubr.bf16.mxu0 %v5461_v1  ;;  %3932 = vmatprep.mubr.bf16.mxu1 %v5461_v1 }
 0x23a   :  { %3278 = vmatmul.mubr.bf16.gmra.mrb[44].mxu0 %v6475_v24  ;;  %3933 = vmatmul.mubr.bf16.gmra.mrb[44].mxu1 %v5451_v34 }
 0x23b   :  { %3287 = vmatprep.mubr.bf16.mxu0 %v5461_v1  ;;  %3942 = vmatprep.mubr.bf16.mxu1 %v5461_v1 }
 0x242   :  { %3288 = vmatmul.mubr.bf16.gmra.mrb[48].mxu0 %v5439_v12  ;;  %3943 = vmatmul.mubr.bf16.gmra.mrb[48].mxu1 %v5452_v63 }
 0x243   :  { %3297 = vmatprep.mubr.bf16.mxu0 %v5461_v1  ;;  %3952 = vmatprep.mubr.bf16.mxu1 %v5461_v1 }
 0x24a   :  { %3298 = vmatmul.mubr.bf16.gmra.mrb[52].mxu0 %v5443_v54  ;;  %3953 = vmatmul.mubr.bf16.gmra.mrb[52].mxu1 %v5453_v7 }
 0x2ed   :  { %v3239_v23 = vpop.f32.mrb[28].mxu0  ;;  %v3894_v10 = vpop.f32.mrb[28].mxu1 }
 0x2ee   :  { %v3241_v28 = vpop.f32.mrb[29].mxu0  ;;  %v3896_v29 = vpop.f32.mrb[29].mxu1 }
 0x2ef   :  { %v3336_v30 = vmax.f32 %v3239_v23, %v3241_v28  ;;  %v3991_v11 = vmax.f32 %v3894_v10, %v3896_v29  ;;  %v3243_v31 = vpop.f32.mrb[30].mxu0  ;;  %v3898_v16 = vpop.f32.mrb[30].mxu1 }
 0x2f0   :  { %v3245_v25 = vpop.f32.mrb[31].mxu0  ;;  %v3900_v17 = vpop.f32.mrb[31].mxu1 }
 0x2f1   :  { %v4005_v6 = vmax.f32 %v3336_v30, %v3991_v11  ;;  %v3337_v19 = vmax.f32 %v3243_v31, %v3245_v25  ;;  %v3992_v20 = vmax.f32 %v3898_v16, %v3900_v17 }
 0x2f3   :  { %v4019_v1 = vadd.f32 %v6363_v27, %v4005_v6  ;;  %v4006_v21 = vmax.f32 %v3337_v19, %v3992_v20 }
 0x2f5   :  { %v4020_v22 = vadd.f32 %v6363_v27, %v4006_v21  ;;  %v3249_v24 = vpop.f32.mrb[32].mxu0  ;;  %v3904_v36 = vpop.f32.mrb[32].mxu1  ;;  %v4033_v59 = vmax.f32 %v4019_v1, 0.0 }
 0x2f6   :  { %v3251_v41 = vpop.f32.mrb[33].mxu0  ;;  %v3906_v46 = vpop.f32.mrb[33].mxu1 }
 0x2f7   :  { %v4034_v51 = vmax.f32 %v4020_v22, 0.0  ;;  %v3338_v26 = vmax.f32 %v3249_v24, %v3251_v41  ;;  %v3993_v52 = vmax.f32 %v3904_v36, %v3906_v46  ;;  %v3253_v32 = vpop.f32.mrb[34].mxu0  ;;  %v3908_v33 = vpop.f32.mrb[34].mxu1 }
 0x2f8   :  { %v3255_v35 = vpop.f32.mrb[35].mxu0  ;;  %v3910_v37 = vpop.f32.mrb[35].mxu1 }
 0x2f9   :  { %v4673_v38 = vpack.c.bf16 %v4034_v51, %v4033_v59  ;;  %v4007_v39 = vmax.f32 %v3338_v26, %v3993_v52  ;;  %v3339_v40 = vmax.f32 %v3253_v32, %v3255_v35  ;;  %v3994_v42 = vmax.f32 %v3908_v33, %v3910_v37 }
 0x2fb   :  { %4711 = vst [vmem:[%s6582_s3 + $0x38] sm:$0xff] %v4673_v38   ;;  %v4021_v43 = vadd.f32 %v6363_v27, %v4007_v39  ;;  %v4008_v44 = vmax.f32 %v3339_v40, %v3994_v42 }
 0x2fd   :  { %v4022_v53 = vadd.f32 %v6363_v27, %v4008_v44  ;;  %v3259_v47 = vpop.f32.mrb[36].mxu0  ;;  %v3914_v12 = vpop.f32.mrb[36].mxu1  ;;  %v4035_v50 = vmax.f32 %v4021_v43, 0.0 }
 0x2fe   :  { %v3261_v48 = vpop.f32.mrb[37].mxu0  ;;  %v3916_v49 = vpop.f32.mrb[37].mxu1 }
 0x2ff   :  { %v4036_v55 = vmax.f32 %v4022_v53, 0.0  ;;  %v3340_v8 = vmax.f32 %v3259_v47, %v3261_v48  ;;  %v3995_v56 = vmax.f32 %v3914_v12, %v3916_v49  ;;  %v3263_v57 = vpop.f32.mrb[38].mxu0  ;;  %v3918_v0 = vpop.f32.mrb[38].mxu1 }
 0x300   :  { %v3265_v58 = vpop.f32.mrb[39].mxu0  ;;  %v3920_v60 = vpop.f32.mrb[39].mxu1 }
 0x301   :  { %v4678_v13 = vpack.c.bf16 %v4036_v55, %v4035_v50  ;;  %v4009_v61 = vmax.f32 %v3340_v8, %v3995_v56  ;;  %v3341_v62 = vmax.f32 %v3263_v57, %v3265_v58  ;;  %v3996_v2 = vmax.f32 %v3918_v0, %v3920_v60 }
 0x303   :  { %4712 = vst [vmem:[%s6582_s3 + $0x40] sm:$0xff] %v4678_v13   ;;  %v4023_v18 = vadd.f32 %v6363_v27, %v4009_v61  ;;  %v4010_v54 = vmax.f32 %v3341_v62, %v3996_v2 }
 0x305   :  { %v4024_v3 = vadd.f32 %v6363_v27, %v4010_v54  ;;  %v3269_v14 = vpop.f32.mrb[40].mxu0  ;;  %v3924_v4 = vpop.f32.mrb[40].mxu1  ;;  %v4037_v45 = vmax.f32 %v4023_v18, 0.0 }
 0x306   :  { %v3271_v5 = vpop.f32.mrb[41].mxu0  ;;  %v3926_v15 = vpop.f32.mrb[41].mxu1 }
 0x307   :  { %v4038_v9 = vmax.f32 %v4024_v3, 0.0  ;;  %v3342_v34 = vmax.f32 %v3269_v14, %v3271_v5  ;;  %v3997_v63 = vmax.f32 %v3924_v4, %v3926_v15  ;;  %v3273_v7 = vpop.f32.mrb[42].mxu0  ;;  %v3928_v23 = vpop.f32.mrb[42].mxu1 }
 0x308   :  { %v3275_v10 = vpop.f32.mrb[43].mxu0  ;;  %v3930_v28 = vpop.f32.mrb[43].mxu1 }
 0x309   :  { %v4683_v29 = vpack.c.bf16 %v4038_v9, %v4037_v45  ;;  %v4011_v30 = vmax.f32 %v3342_v34, %v3997_v63  ;;  %v3343_v11 = vmax.f32 %v3273_v7, %v3275_v10  ;;  %v3998_v31 = vmax.f32 %v3928_v23, %v3930_v28 }
 0x30b   :  { %4713 = vst [vmem:[%s6582_s3 + $0x48] sm:$0xff] %v4683_v29   ;;  %v4025_v16 = vadd.f32 %v6363_v27, %v4011_v30  ;;  %v4012_v25 = vmax.f32 %v3343_v11, %v3998_v31 }
 0x30d   :  { %v4026_v17 = vadd.f32 %v6363_v27, %v4012_v25  ;;  %v3279_v6 = vpop.f32.mrb[44].mxu0  ;;  %v3934_v19 = vpop.f32.mrb[44].mxu1  ;;  %v4039_v21 = vmax.f32 %v4025_v16, 0.0 }
 0x30e   :  { %v3281_v20 = vpop.f32.mrb[45].mxu0  ;;  %v3936_v1 = vpop.f32.mrb[45].mxu1 }
 0x30f   :  { %v4040_v22 = vmax.f32 %v4026_v17, 0.0  ;;  %v3344_v24 = vmax.f32 %v3279_v6, %v3281_v20  ;;  %v3999_v36 = vmax.f32 %v3934_v19, %v3936_v1  ;;  %v3283_v41 = vpop.f32.mrb[46].mxu0  ;;  %v3938_v46 = vpop.f32.mrb[46].mxu1 }
 0x310   :  { %v3285_v59 = vpop.f32.mrb[47].mxu0  ;;  %v3940_v51 = vpop.f32.mrb[47].mxu1 }
 0x311   :  { %v4688_v26 = vpack.c.bf16 %v4040_v22, %v4039_v21  ;;  %v4013_v52 = vmax.f32 %v3344_v24, %v3999_v36  ;;  %v3345_v32 = vmax.f32 %v3283_v41, %v3285_v59  ;;  %v4000_v33 = vmax.f32 %v3938_v46, %v3940_v51 }
 0x313   :  { %4714 = vst [vmem:[%s6582_s3 + $0x50] sm:$0xff] %v4688_v26   ;;  %v4027_v35 = vadd.f32 %v6363_v27, %v4013_v52  ;;  %v4014_v37 = vmax.f32 %v3345_v32, %v4000_v33 }
 0x315   :  { %v4028_v38 = vadd.f32 %v6363_v27, %v4014_v37  ;;  %v3289_v39 = vpop.f32.mrb[48].mxu0  ;;  %v3944_v40 = vpop.f32.mrb[48].mxu1  ;;  %v4041_v44 = vmax.f32 %v4027_v35, 0.0 }
 0x316   :  { %v3291_v42 = vpop.f32.mrb[49].mxu0  ;;  %v3946_v43 = vpop.f32.mrb[49].mxu1 }
 0x317   :  { %v4042_v53 = vmax.f32 %v4028_v38, 0.0  ;;  %v3346_v47 = vmax.f32 %v3289_v39, %v3291_v42  ;;  %v4001_v12 = vmax.f32 %v3944_v40, %v3946_v43  ;;  %v3293_v48 = vpop.f32.mrb[50].mxu0  ;;  %v3948_v49 = vpop.f32.mrb[50].mxu1 }
 0x318   :  { %v3295_v50 = vpop.f32.mrb[51].mxu0  ;;  %v3950_v55 = vpop.f32.mrb[51].mxu1 }
 0x319   :  { %v4693_v8 = vpack.c.bf16 %v4042_v53, %v4041_v44  ;;  %v4015_v56 = vmax.f32 %v3346_v47, %v4001_v12  ;;  %v3347_v57 = vmax.f32 %v3293_v48, %v3295_v50  ;;  %v4002_v0 = vmax.f32 %v3948_v49, %v3950_v55 }
 0x31b   :  { %4715 = vst [vmem:[%s6582_s3 + $0x58] sm:$0xff] %v4693_v8   ;;  %v4029_v58 = vadd.f32 %v6363_v27, %v4015_v56  ;;  %v4016_v60 = vmax.f32 %v3347_v57, %v4002_v0 }
 0x31d   :  { %v4030_v13 = vadd.f32 %v6363_v27, %v4016_v60  ;;  %v3299_v61 = vpop.f32.mrb[52].mxu0  ;;  %v3954_v62 = vpop.f32.mrb[52].mxu1  ;;  %v4043_v54 = vmax.f32 %v4029_v58, 0.0 }
 0x31e   :  { %v3301_v2 = vpop.f32.mrb[53].mxu0  ;;  %v3956_v18 = vpop.f32.mrb[53].mxu1 }
 0x31f   :  { %v4044_v3 = vmax.f32 %v4030_v13, 0.0  ;;  %v3348_v14 = vmax.f32 %v3299_v61, %v3301_v2  ;;  %v4003_v4 = vmax.f32 %v3954_v62, %v3956_v18  ;;  %v3303_v5 = vpop.f32.mrb[54].mxu0  ;;  %v3958_v15 = vpop.f32.mrb[54].mxu1 }
 0x320   :  { %v3305_v45 = vpop.f32.mrb[55].mxu0  ;;  %v3960_v9 = vpop.f32.mrb[55].mxu1 }
 0x321   :  { %v4698_v34 = vpack.c.bf16 %v4044_v3, %v4043_v54  ;;  %v4017_v63 = vmax.f32 %v3348_v14, %v4003_v4  ;;  %v3349_v7 = vmax.f32 %v3303_v5, %v3305_v45  ;;  %v4004_v23 = vmax.f32 %v3958_v15, %v3960_v9 }
 0x323   :  { %4716 = vst [vmem:[%s6582_s3 + $0x60] sm:$0xff] %v4698_v34   ;;  %v4031_v10 = vadd.f32 %v6363_v27, %v4017_v63  ;;  %v4018_v28 = vmax.f32 %v3349_v7, %v4004_v23 }
 0x325   :  { %v4032_v29 = vadd.f32 %v6363_v27, %v4018_v28  ;;  %v4045_v30 = vmax.f32 %v4031_v10, 0.0 }
 0x327   :  { %v4046_v11 = vmax.f32 %v4032_v29, 0.0 }
 0x329   :  { %v4703_v31 = vpack.c.bf16 %v4046_v11, %v4045_v30 }
 0x32b   :  { %4717 = vst [vmem:[%s6582_s3 + $0x68] sm:$0xff] %v4703_v31  }

</bundles_post_ra>
